<compile_context>
chip_gen: v7x
topology: tpu7x:2x2x1
jax: 0.10.0
libtpu: 0.0.40
codegen_flags: <defaults>
</compile_context>

<pallas_src>
import jax
import jax.numpy as jnp
from jax.experimental import pallas as pl
from jax.experimental.pallas import tpu as pltpu


def _conv_k2s2_kernel(x_ref, t_ref, b_ref, o_ref):
    # x_ref : (BN, C, TR, G*2W)      x2[n,c,r, g*2W+kh*W+w] = x[n,c,2*(G*r+g)+kh,w]
    # t_ref : (C, G*2W, OC*G*OW)     folded conv weights (block-diag over g, one-hot over ow)
    # b_ref : (1, OC*G*OW)           bias broadcast row
    # o_ref : (BN, OC, TR, G*OW)     y2[n,oc,r, g*OW+ow] = y[n,oc,G*r+g,ow]
    BN = x_ref.shape[0]
    C = x_ref.shape[1]
    OC = o_ref.shape[1]
    LO = o_ref.shape[3]

    bias_row = b_ref[...]                      # hoisted once per grid step
    for b in range(BN):
        # All (oc, kh, kw, ow) work for one batch element in C MXU matmuls.
        acc = jnp.dot(x_ref[b, 0], t_ref[0], preferred_element_type=jnp.float32)
        for c in range(1, C):
            acc = acc + jnp.dot(x_ref[b, c], t_ref[c],
                                preferred_element_type=jnp.float32)
        acc = acc + bias_row
        # Lane-aligned slices (LO is 128-multiple in the dense case) -> unmasked stores.
        for oc in range(OC):
            o_ref[b, oc] = acc[:, oc * LO:(oc + 1) * LO].astype(o_ref.dtype)


def _largest_divisor_leq(n, cap):
    cap = max(1, min(n, cap))
    for d in range(cap, 0, -1):
        if n % d == 0:
            return d
    return 1


def _pick_group(oh, ow, c, oc, w, t_budget_bytes=12 << 20):
    """Output rows packed per lane-group: G | OH, G*OW lane-dense, T matrix bounded."""
    def t_bytes(g):
        return c * (g * 2 * w) * (oc * g * ow) * 4

    divs = [d for d in range(1, oh + 1) if oh % d == 0]
    feas = [d for d in divs if t_bytes(d) <= t_budget_bytes] or [1]
    dense = [d for d in feas if (d * ow) % 128 == 0]
    if dense:
        return min(dense)                       # smallest G reaching a 128-lane multiple
    ge = [d for d in feas if d * ow >= 128]
    if ge:
        return min(ge, key=lambda d: d * ow)
    return max(feas)                            # small shapes: best we can do


def _pick_tiles(n, rh, in_row_bytes, out_row_bytes, budget_bytes=8 << 20, max_rows=64):
    """Pick (batch block BN, grouped-row block TR)."""
    def tr_candidates():
        return sorted(d for d in range(1, rh + 1)
                      if rh % d == 0 and (d % 8 == 0 or d == rh))

    def pick_tr(bn):
        per_row = bn * (in_row_bytes + out_row_bytes)
        cands = tr_candidates()
        good = [d for d in cands if d * per_row <= budget_bytes and d <= max_rows]
        if not good:
            good = [d for d in cands if d * per_row <= budget_bytes]
        # TODO(synk): pathological RH (e.g. large prime) may force a full-extent block
        # past the budget; padding OH or a masked ragged tile would be needed there.
        return max(good) if good else min(cands)

    bn = _largest_divisor_leq(n, 8)
    tr = pick_tr(bn)
    # Ensure >= 2 grid steps (v7x has 2 TensorCores; also enables pipelining).
    while (n // bn) * (rh // tr) < 2 and bn > 1:
        bn = _largest_divisor_leq(n, bn - 1)
        tr = pick_tr(bn)
    if (n // bn) * (rh // tr) < 2:
        smaller = [d for d in tr_candidates() if d < tr]
        if smaller:
            tr = max(smaller)
    return bn, tr


def conv2d_k2s2(x, weight, bias):
    """nn.Conv2d(C, OC, kernel_size=2, stride=2, padding=0) forward, NCHW in / NCHW out."""
    N, C, H, W = x.shape
    OC, Cw, KH, KW = weight.shape
    assert Cw == C and KH == 2 and KW == 2
    # TODO(synk): odd H/W (trailing row/col ignored by the conv) would need a crop first.
    assert H % 2 == 0 and W % 2 == 0
    OH, OW = H // 2, W // 2

    G = _pick_group(OH, OW, C, OC, W)
    RH = OH // G                       # grouped output rows
    G2W = G * 2 * W                    # input lanes per grouped row (per channel)
    LO = G * OW                        # output lanes per grouped row (per out-channel)
    f32 = jnp.float32

    # Free row-major reshape: x2[n, c, r, g*2W + kh*W + w] = x[n, c, 2*(G*r+g)+kh, w]
    x2 = x.reshape(N, C, RH, G2W)

    # Folded weights T[c, u, j]:
    #   u = g*2W + kh*W + w,  j = oc*LO + g'*OW + ow
    #   T[c,u,j] = weight[oc, c, kh, w % 2]  iff  g == g' and w // 2 == ow, else 0.
    uu = jnp.arange(G2W)
    jj = jnp.arange(OC * LO)
    g_u, kh_u, w_u = uu // (2 * W), (uu % (2 * W)) // W, uu % W
    oc_j, g_j, ow_j = jj // LO, (jj % LO) // OW, jj % OW
    mask = (g_u[:, None] == g_j[None, :]) & ((w_u[:, None] // 2) == ow_j[None, :])
    wvals = weight.astype(f32)[oc_j[None, None, :],
                               jnp.arange(C)[:, None, None],
                               kh_u[None, :, None],
                               (w_u % 2)[None, :, None]]          # (C, G2W, OC*LO)
    t_mat = jnp.where(mask[None, :, :], wvals, jnp.zeros((), f32))

    bias_row = jnp.repeat(bias.astype(f32), LO).reshape(1, OC * LO)

    itemsize = jnp.dtype(x.dtype).itemsize
    in_row_bytes = C * G2W * itemsize
    out_row_bytes = OC * LO * itemsize
    BN, TR = _pick_tiles(N, RH, in_row_bytes, out_row_bytes)
    grid = (N // BN, RH // TR)

    in_block = BN * C * TR * G2W * itemsize
    out_block = BN * OC * TR * LO * itemsize
    t_bytes = int(t_mat.size) * 4
    vmem_need = 2 * (in_block + out_block) + t_bytes + OC * LO * 4 + (1 << 20)
    vmem_limit = int(min(max(vmem_need, 32 << 20), 48 << 20))   # safe for v7x's 64 MiB

    cost = pl.CostEstimate(
        flops=2 * N * OH * OW * OC * C * KH * KW,
        transcendentals=0,
        bytes_accessed=int(x.size) * itemsize + N * OC * OH * OW * itemsize
                        + t_bytes + int(bias_row.size) * 4,
    )

    out = pl.pallas_call(
        _conv_k2s2_kernel,
        out_shape=jax.ShapeDtypeStruct((N, OC, RH, LO), x.dtype),
        grid_spec=pltpu.PrefetchScalarGridSpec(
            num_scalar_prefetch=0,
            grid=grid,
            in_specs=[
                pl.BlockSpec((BN, C, TR, G2W), lambda i, t: (i, 0, t, 0)),
                pl.BlockSpec((C, G2W, OC * LO), lambda i, t: (0, 0, 0)),
                pl.BlockSpec((1, OC * LO), lambda i, t: (0, 0)),
            ],
            out_specs=pl.BlockSpec((BN, OC, TR, LO), lambda i, t: (i, 0, t, 0)),
        ),
        compiler_params=pltpu.CompilerParams(
            dimension_semantics=("parallel", "parallel"),
            vmem_limit_bytes=vmem_limit,
        ),
        cost_estimate=cost,
    )(x2, t_mat, bias_row)

    # Free row-major reshape back to NCHW.
    return out.reshape(N, OC, OH, OW)


if __name__ == "__main__":
    key = jax.random.PRNGKey(0)
    kx, kw_, kb = jax.random.split(key, 3)

    # Shapes implied by the module: Conv2d(3, 6, 2, stride=2).  Small test input,
    # spatial 32 so the lane-dense (G*OW = 128) path is exercised.
    N, C, H, W = 2, 3, 32, 32
    OC, KH, KW = 6, 2, 2

    x = jax.random.normal(kx, (N, C, H, W), dtype=jnp.float32)
    fan_in = C * KH * KW
    bound = 1.0 / (fan_in ** 0.5)
    weight = jax.random.uniform(kw_, (OC, C, KH, KW), jnp.float32, -bound, bound)
    bias = jax.random.uniform(kb, (OC,), jnp.float32, -bound, bound)

    out = conv2d_k2s2(x, weight, bias)
    out = jax.block_until_ready(out)

    # Reference check against XLA's conv.
    ref = jax.lax.conv_general_dilated(
        x, weight, window_strides=(2, 2), padding="VALID",
        dimension_numbers=("NCHW", "OIHW", "NCHW"),
        precision=jax.lax.Precision.HIGHEST,
    ) + bias.reshape(1, OC, 1, 1)

    assert out.shape == (N, OC, H // 2, W // 2)
    max_err = float(jnp.max(jnp.abs(out - ref)))
    assert max_err < 1e-3, f"max abs error {max_err}"

    print("KERNEL_OK")
</pallas_src>

<mosaic_0001>
module attributes {stable_mosaic.version = 11 : i64} {
  func.func @_conv_k2s2_kernel(%arg0: i32, %arg1: i32, %arg2: memref<1x3x2x512xf32, #tpu.memory_space<vmem>>, %arg3: memref<3x512x768xf32, #tpu.memory_space<vmem>>, %arg4: memref<1x768xf32, #tpu.memory_space<vmem>>, %arg5: memref<1x6x2x128xf32, #tpu.memory_space<vmem>>) attributes {dimension_semantics = [#tpu.dimension_semantics<parallel>, #tpu.dimension_semantics<parallel>], iteration_bounds = array<i64: 2, 1>, scalar_prefetch = 0 : i64, scratch_operands = 0 : i64, tpu.core_type = #tpu.core_type<tc>, window_params = [{transform_indices = @transform_0, window_bounds = array<i64: 1, 3, 2, 512>}, {pipeline_mode = #tpu.pipeline_mode<synchronous>, transform_indices = @transform_1, window_bounds = array<i64: 3, 512, 768>}, {pipeline_mode = #tpu.pipeline_mode<synchronous>, transform_indices = @transform_2, window_bounds = array<i64: 1, 768>}, {transform_indices = @transform_3, window_bounds = array<i64: 1, 6, 2, 128>}]} {
    %c0 = arith.constant 0 : index
    %c0_0 = arith.constant 0 : index
    %0 = vector.load %arg4[%c0, %c0_0] : memref<1x768xf32, #tpu.memory_space<vmem>>, vector<1x768xf32>
    %c0_1 = arith.constant 0 : index
    %c0_2 = arith.constant 0 : index
    %c0_3 = arith.constant 0 : index
    %c0_4 = arith.constant 0 : index
    %1 = vector.load %arg2[%c0_1, %c0_2, %c0_3, %c0_4] : memref<1x3x2x512xf32, #tpu.memory_space<vmem>>, vector<1x1x2x512xf32>
    %2 = vector.shape_cast %1 : vector<1x1x2x512xf32> to vector<2x512xf32>
    %c0_5 = arith.constant 0 : index
    %c0_6 = arith.constant 0 : index
    %c0_7 = arith.constant 0 : index
    %3 = vector.load %arg3[%c0_5, %c0_6, %c0_7] : memref<3x512x768xf32, #tpu.memory_space<vmem>>, vector<1x512x768xf32>
    %4 = vector.shape_cast %3 : vector<1x512x768xf32> to vector<512x768xf32>
    %cst = arith.constant dense<0.000000e+00> : vector<2x768xf32>
    %5 = tpu.matmul %2, %4, %cst {dimension_numbers = #tpu.dot_dimension_numbers<[1], [0], [0], [1], [0, 0, 1, 1], [], []>} : vector<2x512xf32>, vector<512x768xf32>, vector<2x768xf32> -> vector<2x768xf32>
    %c0_8 = arith.constant 0 : index
    %c1 = arith.constant 1 : index
    %c0_9 = arith.constant 0 : index
    %c0_10 = arith.constant 0 : index
    %6 = vector.load %arg2[%c0_8, %c1, %c0_9, %c0_10] : memref<1x3x2x512xf32, #tpu.memory_space<vmem>>, vector<1x1x2x512xf32>
    %7 = vector.shape_cast %6 : vector<1x1x2x512xf32> to vector<2x512xf32>
    %c1_11 = arith.constant 1 : index
    %c0_12 = arith.constant 0 : index
    %c0_13 = arith.constant 0 : index
    %8 = vector.load %arg3[%c1_11, %c0_12, %c0_13] : memref<3x512x768xf32, #tpu.memory_space<vmem>>, vector<1x512x768xf32>
    %9 = vector.shape_cast %8 : vector<1x512x768xf32> to vector<512x768xf32>
    %cst_14 = arith.constant dense<0.000000e+00> : vector<2x768xf32>
    %10 = tpu.matmul %7, %9, %cst_14 {dimension_numbers = #tpu.dot_dimension_numbers<[1], [0], [0], [1], [0, 0, 1, 1], [], []>} : vector<2x512xf32>, vector<512x768xf32>, vector<2x768xf32> -> vector<2x768xf32>
    %11 = arith.addf %5, %10 : vector<2x768xf32>
    %c0_15 = arith.constant 0 : index
    %c2 = arith.constant 2 : index
    %c0_16 = arith.constant 0 : index
    %c0_17 = arith.constant 0 : index
    %12 = vector.load %arg2[%c0_15, %c2, %c0_16, %c0_17] : memref<1x3x2x512xf32, #tpu.memory_space<vmem>>, vector<1x1x2x512xf32>
    %13 = vector.shape_cast %12 : vector<1x1x2x512xf32> to vector<2x512xf32>
    %c2_18 = arith.constant 2 : index
    %c0_19 = arith.constant 0 : index
    %c0_20 = arith.constant 0 : index
    %14 = vector.load %arg3[%c2_18, %c0_19, %c0_20] : memref<3x512x768xf32, #tpu.memory_space<vmem>>, vector<1x512x768xf32>
    %15 = vector.shape_cast %14 : vector<1x512x768xf32> to vector<512x768xf32>
    %cst_21 = arith.constant dense<0.000000e+00> : vector<2x768xf32>
    %16 = tpu.matmul %13, %15, %cst_21 {dimension_numbers = #tpu.dot_dimension_numbers<[1], [0], [0], [1], [0, 0, 1, 1], [], []>} : vector<2x512xf32>, vector<512x768xf32>, vector<2x768xf32> -> vector<2x768xf32>
    %17 = arith.addf %11, %16 : vector<2x768xf32>
    %18 = vector.broadcast %0 : vector<1x768xf32> to vector<2x768xf32>
    %19 = arith.addf %17, %18 : vector<2x768xf32>
    %20 = vector.extract_strided_slice %19 {offsets = [0, 0], sizes = [2, 128], strides = [1, 1]} : vector<2x768xf32> to vector<2x128xf32>
    %c0_22 = arith.constant 0 : index
    %c0_23 = arith.constant 0 : index
    %c0_24 = arith.constant 0 : index
    %c0_25 = arith.constant 0 : index
    %21 = vector.load %arg5[%c0_22, %c0_23, %c0_24, %c0_25] : memref<1x6x2x128xf32, #tpu.memory_space<vmem>>, vector<1x1x2x128xf32>
    %22 = vector.shape_cast %21 : vector<1x1x2x128xf32> to vector<2x128xf32>
    %23 = vector.shape_cast %20 : vector<2x128xf32> to vector<1x1x2x128xf32>
    tpu.vector_store %arg5[%c0_22, %c0_23, %c0_24, %c0_25], %23 {strides = array<i32>} : memref<1x6x2x128xf32, #tpu.memory_space<vmem>>, vector<1x1x2x128xf32>,
    %24 = vector.extract_strided_slice %19 {offsets = [0, 128], sizes = [2, 128], strides = [1, 1]} : vector<2x768xf32> to vector<2x128xf32>
    %c0_26 = arith.constant 0 : index
    %c1_27 = arith.constant 1 : index
    %c0_28 = arith.constant 0 : index
    %c0_29 = arith.constant 0 : index
    %25 = vector.load %arg5[%c0_26, %c1_27, %c0_28, %c0_29] : memref<1x6x2x128xf32, #tpu.memory_space<vmem>>, vector<1x1x2x128xf32>
    %26 = vector.shape_cast %25 : vector<1x1x2x128xf32> to vector<2x128xf32>
    %27 = vector.shape_cast %24 : vector<2x128xf32> to vector<1x1x2x128xf32>
    tpu.vector_store %arg5[%c0_26, %c1_27, %c0_28, %c0_29], %27 {strides = array<i32>} : memref<1x6x2x128xf32, #tpu.memory_space<vmem>>, vector<1x1x2x128xf32>,
    %28 = vector.extract_strided_slice %19 {offsets = [0, 256], sizes = [2, 128], strides = [1, 1]} : vector<2x768xf32> to vector<2x128xf32>
    %c0_30 = arith.constant 0 : index
    %c2_31 = arith.constant 2 : index
    %c0_32 = arith.constant 0 : index
    %c0_33 = arith.constant 0 : index
    %29 = vector.load %arg5[%c0_30, %c2_31, %c0_32, %c0_33] : memref<1x6x2x128xf32, #tpu.memory_space<vmem>>, vector<1x1x2x128xf32>
    %30 = vector.shape_cast %29 : vector<1x1x2x128xf32> to vector<2x128xf32>
    %31 = vector.shape_cast %28 : vector<2x128xf32> to vector<1x1x2x128xf32>
    tpu.vector_store %arg5[%c0_30, %c2_31, %c0_32, %c0_33], %31 {strides = array<i32>} : memref<1x6x2x128xf32, #tpu.memory_space<vmem>>, vector<1x1x2x128xf32>,
    %32 = vector.extract_strided_slice %19 {offsets = [0, 384], sizes = [2, 128], strides = [1, 1]} : vector<2x768xf32> to vector<2x128xf32>
    %c0_34 = arith.constant 0 : index
    %c3 = arith.constant 3 : index
    %c0_35 = arith.constant 0 : index
    %c0_36 = arith.constant 0 : index
    %33 = vector.load %arg5[%c0_34, %c3, %c0_35, %c0_36] : memref<1x6x2x128xf32, #tpu.memory_space<vmem>>, vector<1x1x2x128xf32>
    %34 = vector.shape_cast %33 : vector<1x1x2x128xf32> to vector<2x128xf32>
    %35 = vector.shape_cast %32 : vector<2x128xf32> to vector<1x1x2x128xf32>
    tpu.vector_store %arg5[%c0_34, %c3, %c0_35, %c0_36], %35 {strides = array<i32>} : memref<1x6x2x128xf32, #tpu.memory_space<vmem>>, vector<1x1x2x128xf32>,
    %36 = vector.extract_strided_slice %19 {offsets = [0, 512], sizes = [2, 128], strides = [1, 1]} : vector<2x768xf32> to vector<2x128xf32>
    %c0_37 = arith.constant 0 : index
    %c4 = arith.constant 4 : index
    %c0_38 = arith.constant 0 : index
    %c0_39 = arith.constant 0 : index
    %37 = vector.load %arg5[%c0_37, %c4, %c0_38, %c0_39] : memref<1x6x2x128xf32, #tpu.memory_space<vmem>>, vector<1x1x2x128xf32>
    %38 = vector.shape_cast %37 : vector<1x1x2x128xf32> to vector<2x128xf32>
    %39 = vector.shape_cast %36 : vector<2x128xf32> to vector<1x1x2x128xf32>
    tpu.vector_store %arg5[%c0_37, %c4, %c0_38, %c0_39], %39 {strides = array<i32>} : memref<1x6x2x128xf32, #tpu.memory_space<vmem>>, vector<1x1x2x128xf32>,
    %40 = vector.extract_strided_slice %19 {offsets = [0, 640], sizes = [2, 128], strides = [1, 1]} : vector<2x768xf32> to vector<2x128xf32>
    %c0_40 = arith.constant 0 : index
    %c5 = arith.constant 5 : index
    %c0_41 = arith.constant 0 : index
    %c0_42 = arith.constant 0 : index
    %41 = vector.load %arg5[%c0_40, %c5, %c0_41, %c0_42] : memref<1x6x2x128xf32, #tpu.memory_space<vmem>>, vector<1x1x2x128xf32>
    %42 = vector.shape_cast %41 : vector<1x1x2x128xf32> to vector<2x128xf32>
    %43 = vector.shape_cast %40 : vector<2x128xf32> to vector<1x1x2x128xf32>
    tpu.vector_store %arg5[%c0_40, %c5, %c0_41, %c0_42], %43 {strides = array<i32>} : memref<1x6x2x128xf32, #tpu.memory_space<vmem>>, vector<1x1x2x128xf32>,
    return
  }
  func.func @transform_0(%arg0: i32, %arg1: i32) -> (i32, i32, i32, i32) {
    %c0_i32 = arith.constant 0 : i32
    %c0_i32_0 = arith.constant 0 : i32
    %c0_i32_1 = arith.constant 0 : i32
    return %arg0, %c0_i32, %arg1, %c0_i32_0 : i32, i32, i32, i32
  }
  func.func @transform_1(%arg0: i32, %arg1: i32) -> (i32, i32, i32) {
    %c0_i32 = arith.constant 0 : i32
    %c0_i32_0 = arith.constant 0 : i32
    %c0_i32_1 = arith.constant 0 : i32
    %c0_i32_2 = arith.constant 0 : i32
    return %c0_i32, %c0_i32_0, %c0_i32_1 : i32, i32, i32
  }
  func.func @transform_2(%arg0: i32, %arg1: i32) -> (i32, i32) {
    %c0_i32 = arith.constant 0 : i32
    %c0_i32_0 = arith.constant 0 : i32
    %c0_i32_1 = arith.constant 0 : i32
    return %c0_i32, %c0_i32_0 : i32, i32
  }
  func.func @transform_3(%arg0: i32, %arg1: i32) -> (i32, i32, i32, i32) {
    %c0_i32 = arith.constant 0 : i32
    %c0_i32_0 = arith.constant 0 : i32
    %c0_i32_1 = arith.constant 0 : i32
    return %arg0, %c0_i32, %arg1, %c0_i32_0 : i32, i32, i32, i32
  }
}

</mosaic_0001>

<bundles_post_ra>
// kernel: tpu_custom_call.1
= control target key start
LH: loop header
LB: loop body
LE: loop exit
PB: predicated region body
PF: predicated region fallthrough
CT: control target
= control target key end

     0   :  { %8 = vsyncpa [#allocation3], 0  ;;  %s4787_s0 = inlined_call_operand.hbm [shape: f32[2,3,2,512], index: 0, kind: input, shape index: {}]   ;;  %s4788_s1 = inlined_call_operand.hbm [shape: f32[3,512,768], index: 1, kind: input, shape index: {}]   ;;  %s4789_s2 = inlined_call_operand.hbm [shape: f32[1,768], index: 2, kind: input, shape index: {}]   ;;  %s4790_s3 = inlined_call_operand.hbm [shape: f32[2,6,2,128], index: 3, kind: output, shape index: {}]  }
   0x1   :  { %10 = vsyncpa [#allocation3 + $0x1], 0 }
   0x2   :  { %11 = vsyncpa [#allocation6], 0 }
   0x3   :  { %12 = vsyncpa [#allocation4], 0 }
   0x4   :  { %14 = vsyncpa [#allocation4 + $0x1], 0  ;;  %s4417_s12 = smov 0   ;;  %s4419_s13 = smov 0  }
   0x5   :  { %s4421_s14 = smov 0   ;;  %s4423_s15 = smov 0  }
   0x6   :  { %s4425_s16 = smov 0   ;;  %s4427_s17 = smov 0  }
   0x7 LB: > { %s2912_s18 = sadd.s32 4294967295, %s4384_s17   ;;  %s2913_s19 = sadd.s32 4294967294, %s4384_s17   ;;  %s4384_s17 = sphi %s4427_s17, %s20_s17   ;;  %s4380_s16 = sphi %s4425_s16, %s4812_s16   ;;  %s4376_s15 = sphi %s4423_s15, %s4811_s15   ;;  %s4372_s14 = sphi %s4421_s14, %s4810_s14   ;;  %s4368_s13 = sphi %s4419_s13, %s4809_s13   ;;  %s4364_s12 = sphi %s4417_s12, %s4808_s12  }
   0x8   : > { %p54_p0 = scmp.ne.s32.totalorder %s4368_s13, %s4364_s12  ;;  %p4451_p1 = scmp.eq.s32.totalorder %s2912_s18, 0 }
   0x9   : > { %p4455_p2 = scmp.eq.s32.totalorder %s2912_s18, 1  ;;  %p128_p3 = scmp.eq.s32.totalorder %s2913_s19, 1 }
   0xa   : > { %s4795_s20 = scalar_select %p4451_p1, 1, 0 }
   0xb   : > { %p4461_p4 = por %p4451_p1, %p54_p0  ;;  %p2914_p5 = scmp.ge.s32.totalorder %s4384_s17, 1 }
   0xc   : > { %p4466_p6 = por %p128_p3, %p54_p0  ;;  %p135_p7 = scmp.lt.s32.totalorder %s4384_s17, 3 }
   0xd   : > { %s4797_s22 = scalar_select %p4461_p4, 1, 0 }
   0xe   : > { %s4798_s23 = scalar_select %p4466_p6, 1, 0 }
   0xf   : > { %p4471_p8 = pnand %p2914_p5, %p135_p7  ;;  %s4386_s25 = smov [#allocation5]  }
  0x10   : > { %s147_s26 = sshll.u32 %s4386_s25, 4  ;;  %s4387_s28 = smov [#allocation7]   ;;  %s4475_s26 = int_to_ptr.vmem [resolvable:$true] %s147_s26 }
  0x11   : > { %p4131_p9 = pneg %p4471_p8  ;;  %s161_s29 = sshll.u32 %s4387_s28, 4  ;;  %s4486_s29 = int_to_ptr.vmem [resolvable:$true] %s161_s29 }
  0x12   : > { %s4212_s5 = scalar_lea.hbm %s4788_s1, 147456 }
  0x13   : > { %p4482_p11 = pnand %p4131_p9, %p4451_p1  ;;  %p4213_p12 = scmp.ne.s32.totalorder %s4788_s1, %s4212_s5 }
  0x14   : > { %p4219_p5 = scmp.lt.u32.totalorder %s4212_s5, %s4788_s1 }
  0x15   : > { %p4214_p13 = pneg %p4482_p11 }
  0x17   : > { %p4215_p0 = pnand %p4214_p13, %p4213_p12 }
  0x19   : > { %p4216_p3 = pneg %p4215_p0 }
  0x1b   : > { %p4221_p7 = pnand %p4219_p5, %p4216_p3 }
  0x1d   : > { %4224 = shalt.err (!%p4221_p7)
}
  0x1e   : > { %s4225_s10 = scalar_lea.vmem %s4475_s26, 147456  ;;  %p4233_p1 = scmp.lt.s32.totalorder %s4475_s26, %s4475_s26 }
  0x1f   : > { %p4226_p9 = scmp.ne.s32.totalorder %s4475_s26, %s4225_s10  ;;  %p4234_p12 = scmp.lt.s32.totalorder %s4225_s10, %s4225_s10 }
  0x21   : > { %p4228_p10 = pnand %p4226_p9, %p4214_p13  ;;  %p4235_p0 = por %p4234_p12, %p4233_p1 }
  0x23   : > { %p4229_p6 = pneg %p4228_p10 }
  0x25   : > { %p4236_p4 = pnand %p4235_p0, %p4229_p6 }
  0x27   : > { %4239 = shalt.err (!%p4236_p4)
}
  0x28   : > { %s4388_s11 = smov 768   ;;  %s4389_s18 = smov 48  }
  0x29   : > { %4134 = dma.hbm_to_vmem [thread:$0]  (!%p4482_p11), %s4788_s1, 147456, %s4475_s26, [#allocation6], %s4388_s11, %s4388_s11, %s4389_s18  }
  0x2a   : > { %s4240_s4 = scalar_lea.hbm %s4789_s2, 96 }
  0x2b   : > { %p4241_p1 = scmp.ne.s32.totalorder %s4789_s2, %s4240_s4  ;;  %p4247_p10 = scmp.lt.u32.totalorder %s4240_s4, %s4789_s2 }
  0x2d   : > { %p4243_p4 = pnand %p4241_p1, %p4214_p13 }
  0x2f   : > { %p4244_p6 = pneg %p4243_p4 }
  0x31   : > { %p4249_p3 = pnand %p4247_p10, %p4244_p6 }
  0x33   : > { %4252 = shalt.err (!%p4249_p3)
}
  0x34   : > { %s4253_s26 = scalar_lea.vmem %s4486_s29, 96  ;;  %p4261_p12 = scmp.lt.s32.totalorder %s4486_s29, %s4486_s29 }
  0x35   : > { %p4254_p5 = scmp.ne.s32.totalorder %s4486_s29, %s4253_s26  ;;  %p4262_p0 = scmp.lt.s32.totalorder %s4253_s26, %s4253_s26 }
  0x37   : > { %p4256_p7 = pnand %p4254_p5, %p4214_p13  ;;  %p4263_p1 = por %p4262_p0, %p4261_p12 }
  0x39   : > { %p4257_p9 = pneg %p4256_p7 }
  0x3b   : > { %p4264_p4 = pnand %p4263_p1, %p4257_p9 }
  0x3d   : > { %4267 = shalt.err (!%p4264_p4)
}
  0x3e   : > { %4137 = dma.hbm_to_vmem [thread:$0]  (!%p4482_p11), %s4789_s2, 96, %s4486_s29, [#allocation6]  }
  0x3f   : > { %s32_s11 = sadd.s32 1, %s4380_s16  ;;  %s41_s18 = sadd.s32 1, %s4372_s14 }
  0x40   : > { %p34_p13 = scmp.ge.s32.totalorder %s32_s11, 2  ;;  %p48_p6 = scmp.ne.s32.totalorder %s4372_s14, %s4368_s13 }
  0x41   : > { %p49_p10 = scmp.eq.s32.totalorder %s4384_s17, 0  ;;  %p4148_p3 = scmp.lt.s32.totalorder %s4384_s17, 2 }
  0x42   : > { %s4814_s11 = smov (%p34_p13, %s32_s11), 0  ;;  %p4550_p7 = por %p4455_p2, %p48_p6 }
  0x43   : > { %p50_p5 = por %p49_p10, %p48_p6  ;;  %s36_s19 = ssub.s32 %s4380_s16, %s4814_s11 }
  0x44   : > { %s4801_s27 = scalar_select %p4550_p7, 1, 0 }
  0x45   : > { %s172_s25 = sand.u32 1, %s4372_s14   ;;  %p39_p9 = scmp.eq.s32.totalorder %s36_s19, 0 }
  0x46   : > { %s4114_s29 = smul.u32 24, %s172_s25  ;;  %p4557_p11 = pnand %p4148_p3, %p50_p5 }
  0x47   : > { %s4562_s30 = scalar_select %p39_p9, %s4372_s14, %s41_s18  }
  0x48   : > { %s4115_s4 = smul.u32 384, %s4380_s16  ;;  %s176_s5 = scalar_lea.vmem [#allocation2], %s4114_s29 }
  0x49   : > { %s185_s6 = sshll.u32 %s176_s5, 4  ;;  %s4572_s26 = scalar_lea.sflag [#allocation3], %s172_s25  ;;  %s4570_s6 = int_to_ptr.vmem [resolvable:$true] %s185_s6 }
  0x4a   : > { %s4568_s8 = scalar_lea.hbm %s4787_s0, %s4115_s4  ;;  %p4270_p12 = pneg %p4557_p11 }
  0x4b   : > { %s4268_s9 = scalar_lea.hbm %s4568_s8, 384  ;;  %s4273_s19 = scalar_lea.hbm %s4787_s0, 768 }
  0x4c   : > { %p4269_p2 = scmp.ne.s32.totalorder %s4568_s8, %s4268_s9  ;;  %p4274_p4 = scmp.lt.u32.totalorder %s4568_s8, %s4787_s0 }
  0x4d   : > { %p4275_p13 = scmp.lt.u32.totalorder %s4273_s19, %s4268_s9  ;;  %p4277_p10 = scmp.lt.u32.totalorder %s4268_s9, %s4568_s8 }
  0x4e   : > { %p4271_p0 = pnand %p4270_p12, %p4269_p2 }
  0x4f   : > { %p4276_p6 = por %p4275_p13, %p4274_p4 }
  0x50   : > { %p4272_p1 = pneg %p4271_p0 }
  0x51   : > { %p4278_p3 = por %p4277_p10, %p4276_p6 }
  0x53   : > { %p4279_p5 = pnand %p4278_p3, %p4272_p1 }
  0x55   : > { %4282 = shalt.err (!%p4279_p5)
}
  0x56   : > { %s4283_s25 = scalar_lea.vmem %s4570_s6, 384  ;;  %s4390_s5 = smov [#allocation2]  }
  0x57   : > { %p4284_p9 = scmp.ne.s32.totalorder %s4570_s6, %s4283_s25  ;;  %s4288_s21 = sshll.u32 %s4390_s5, 4  ;;  %s4289_s21 = int_to_ptr.vmem [resolvable:$false] %s4288_s21 }
  0x58   : > { %s4290_s7 = scalar_lea.vmem %s4289_s21, 768  ;;  %p4291_p7 = scmp.lt.s32.totalorder %s4570_s6, %s4289_s21 }
  0x59   : > { %p4286_p2 = pnand %p4284_p9, %p4270_p12  ;;  %p4292_p4 = scmp.lt.s32.totalorder %s4290_s7, %s4283_s25 }
  0x5b   : > { %p4287_p0 = pneg %p4286_p2  ;;  %p4293_p13 = por %p4292_p4, %p4291_p7 }
  0x5d   : > { %p4294_p6 = pnand %p4293_p13, %p4287_p0 }
  0x5f   : > { %4297 = shalt.err (!%p4294_p6)
}
  0x60   : > { %s4391_s9 = smov 128   ;;  %s4392_s10 = smov 8  }
  0x61   : > { %4141 = dma.hbm_to_vmem [thread:$0]  (!%p4557_p11), %s4568_s8, 384, %s4570_s6, %s4572_s26, %s4391_s9, %s4391_s9, %s4392_s10  }
  0x62   : > { %197 = sbr.rel (%p4471_p8) target bundleno = 922 (0x39a), region = 32  ;;  %s4603_s18 = sand.u32 (!%p4471_p8), 1, %s4368_s13  }
  0x63   : > { %s4116_s19 = smul.u32 (!%p4471_p8), 24, %s4603_s18  ;;  %s200_s29 = scalar_lea.sflag (!%p4471_p8), [#allocation3], %s4603_s18 }
  0x64   : > { %p4803_p7 = scmp.ne.s32.totalorder (!%p4471_p8), %s4797_s22, 0 }
  0x65   : > { %s4607_s4 = scalar_lea.vmem (!%p4471_p8), [#allocation2], %s4116_s19 }
  0x69   : > { %4351 = dma.done.wait (%p4803_p7), %s200_s29, 384  }
  0x6a   : > { %4353 = vsyncadd (%p4803_p7), %s200_s29, 4294966912  ;;  %p4804_p11 = scmp.ne.s32.totalorder %s4795_s20, 0 }
  0x6c   : > { %4355 = dma.done.wait (%p4804_p11), [#allocation6], 147552  }
  0x6d   : > { %4357 = vsyncadd (%p4804_p11), [#allocation6], 4294819744  ;;  %v624_v0 = vld [vmem:[#allocation5 + $0xc08] sm:$0xff]  ;;  %v630_v1 = vld [vmem:[#allocation5 + $0xc38] sm:$0xff]  ;;  %s4117_s20 = smul.u32 12, %s4603_s18  ;;  %s2793_s26 = scalar_lea.sflag [#allocation4], %s4603_s18 }
  0x6e   : > { %v820_v2 = vld [vmem:[#allocation5 + $0x1228] sm:$0xff]  ;;  %v2932_v3 = vpack.c.bf16 %v630_v1, %v624_v0  ;;  %v826_v4 = vld [vmem:[#allocation5 + $0x1258] sm:$0xff]  ;;  %v623_v5 = vld [vmem:[#allocation5 + $0xc00] sm:$0xff]  ;;  %s4118_s28 = smul.u32 192, %s4376_s15  ;;  %p4805_p12 = scmp.ne.s32.totalorder %s4801_s27, 0 }
  0x6f   : > { %v629_v6 = vld [vmem:[#allocation5 + $0xc30] sm:$0xff]  ;;  %v3252_v7 = vpack.c.bf16 %v826_v4, %v820_v2  ;;  %v819_v9 = vld [vmem:[#allocation5 + $0x1220] sm:$0xff]  ;;  %v636_v11 = vld [vmem:[#allocation5 + $0xc68] sm:$0xff]  ;;  %s233_s22 = scalar_lea.vmem [#allocation8], %s4117_s20  ;;  %s4394_s5 = smov [#allocation8]  }
  0x70   : > { %v2934_v8 = vpack.c.bf16 %v629_v6, %v623_v5  ;;  %v825_v10 = vld [vmem:[#allocation5 + $0x1250] sm:$0xff]  ;;  %2933 = vmatprep.subr.bf16.mxu1 %v2932_v3  ;;  %v642_v13 = vld [vmem:[#allocation5 + $0xc98] sm:$0xff]  ;;  %v832_v14 = vld [vmem:[#allocation5 + $0x1288] sm:$0xff]  ;;  %s2807_s24 = sshll.u32 %s233_s22, 4  ;;  %s4738_s8 = scalar_lea.hbm %s4790_s3, %s4118_s28  ;;  %s4732_s24 = int_to_ptr.vmem [resolvable:$true] %s2807_s24 }
  0x71   : > { %v3254_v12 = vpack.c.bf16 %v825_v10, %v819_v9  ;;  %v838_v15 = vld [vmem:[#allocation5 + $0x12b8] sm:$0xff]  ;;  %3253 = vmatprep.subr.bf16.mxu0 %v3252_v7  ;;  %v2936_v16 = vpack.c.bf16 %v642_v13, %v636_v11  ;;  %v635_v18 = vld [vmem:[#allocation5 + $0xc60] sm:$0xff]  ;;  %v641_v19 = vld [vmem:[#allocation5 + $0xc90] sm:$0xff]  ;;  %s4298_s25 = scalar_lea.vmem %s4732_s24, 192  ;;  %s4302_s21 = sshll.u32 %s4394_s5, 4  ;;  %s4303_s21 = int_to_ptr.vmem [resolvable:$false] %s4302_s21 }
  0x72   : > { %2935 = vmatpush1.bf16.msra.mxu1 %v2934_v8  ;;  %v3256_v17 = vpack.c.bf16 %v838_v15, %v832_v14  ;;  %v831_v20 = vld [vmem:[#allocation5 + $0x1280] sm:$0xff]  ;;  %v2938_v21 = vpack.c.bf16 %v641_v19, %v635_v18  ;;  %v837_v22 = vld [vmem:[#allocation5 + $0x12b0] sm:$0xff]  ;;  %v648_v23 = vld [vmem:[#allocation5 + $0xcc8] sm:$0xff]  ;;  %p4299_p8 = scmp.ne.s32.totalorder %s4732_s24, %s4298_s25  ;;  %s4304_s7 = scalar_lea.vmem %s4303_s21, 384 }
  0x73   : > { %3255 = vmatpush1.bf16.msra.mxu0 %v3254_v12  ;;  %v654_v24 = vld [vmem:[#allocation5 + $0xcf8] sm:$0xff]  ;;  %2937 = vmatprep.subr.bf16.mxu1 %v2936_v16  ;;  %v3258_v25 = vpack.c.bf16 %v837_v22, %v831_v20  ;;  %v844_v27 = vld [vmem:[#allocation5 + $0x12e8] sm:$0xff]  ;;  %v647_v29 = vld [vmem:[#allocation5 + $0xcc0] sm:$0xff]  ;;  %p4305_p3 = scmp.lt.s32.totalorder %s4732_s24, %s4303_s21  ;;  %p4306_p5 = scmp.lt.s32.totalorder %s4304_s7, %s4298_s25 }
  0x74   : > { %3257 = vmatprep.subr.bf16.mxu0 %v3256_v17  ;;  %v2940_v26 = vpack.c.bf16 %v654_v24, %v648_v23  ;;  %v850_v28 = vld [vmem:[#allocation5 + $0x1318] sm:$0xff]  ;;  %v653_v31 = vld [vmem:[#allocation5 + $0xcf0] sm:$0xff]  ;;  %v843_v32 = vld [vmem:[#allocation5 + $0x12e0] sm:$0xff]  ;;  %p4300_p1 = pnand %p4299_p8, %p4805_p12 }
  0x75   : > { %v3260_v30 = vpack.c.bf16 %v850_v28, %v844_v27  ;;  %v849_v33 = vld [vmem:[#allocation5 + $0x1310] sm:$0xff]  ;;  %v2942_v34 = vpack.c.bf16 %v653_v31, %v647_v29  ;;  %v660_v35 = vld [vmem:[#allocation5 + $0xd28] sm:$0xff]  ;;  %v666_v36 = vld [vmem:[#allocation5 + $0xd58] sm:$0xff]  ;;  %p4307_p9 = por %p4306_p5, %p4305_p3 }
  0x76   : > { %2939 = vmatpush1.bf16.msra.mxu1 %v2938_v21  ;;  %v856_v37 = vld [vmem:[#allocation5 + $0x1348] sm:$0xff]  ;;  %v3262_v38 = vpack.c.bf16 %v849_v33, %v843_v32  ;;  %v2944_v39 = vpack.c.bf16 %v666_v36, %v660_v35  ;;  %v862_v40 = vld [vmem:[#allocation5 + $0x1378] sm:$0xff]  ;;  %v659_v41 = vld [vmem:[#allocation5 + $0xd20] sm:$0xff]  ;;  %p4301_p10 = pneg %p4300_p1 }
  0x77   : > { %3259 = vmatpush1.bf16.msra.mxu0 %v3258_v25  ;;  %2941 = vmatprep.subr.bf16.mxu1 %v2940_v26  ;;  %v665_v42 = vld [vmem:[#allocation5 + $0xd50] sm:$0xff]  ;;  %v3264_v43 = vpack.c.bf16 %v862_v40, %v856_v37  ;;  %v855_v44 = vld [vmem:[#allocation5 + $0x1340] sm:$0xff]  ;;  %v672_v46 = vld [vmem:[#allocation5 + $0xd88] sm:$0xff] }
  0x78   : > { %3261 = vmatprep.subr.bf16.mxu0 %v3260_v30  ;;  %v861_v45 = vld [vmem:[#allocation5 + $0x1370] sm:$0xff]  ;;  %v678_v47 = vld [vmem:[#allocation5 + $0xdb8] sm:$0xff]  ;;  %v868_v48 = vld [vmem:[#allocation5 + $0x13a8] sm:$0xff]  ;;  %v2946_v50 = vpack.c.bf16 %v665_v42, %v659_v41  ;;  %p4308_p2 = pnand %p4307_p9, %p4301_p10 }
  0x79   : > { %v874_v49 = vld [vmem:[#allocation5 + $0x13d8] sm:$0xff]  ;;  %v3266_v51 = vpack.c.bf16 %v861_v45, %v855_v44  ;;  %v2948_v52 = vpack.c.bf16 %v678_v47, %v672_v46  ;;  %v671_v53 = vld [vmem:[#allocation5 + $0xd80] sm:$0xff]  ;;  %v677_v54 = vld [vmem:[#allocation5 + $0xdb0] sm:$0xff]  ;;  %v4393_v46 = vmov 1983009808  }
  0x7a   : > { %2943 = vmatpush1.bf16.msra.mxu1 %v2942_v34  ;;  %v867_v55 = vld [vmem:[#allocation5 + $0x13a0] sm:$0xff]  ;;  %v3268_v56 = vpack.c.bf16 %v874_v49, %v868_v48  ;;  %v873_v57 = vld [vmem:[#allocation5 + $0x13d0] sm:$0xff]  ;;  %v684_v58 = vld [vmem:[#allocation5 + $0xde8] sm:$0xff]  ;;  %v2950_v62 = vpack.c.bf16 %v677_v54, %v671_v53  ;;  %v1010_v47 = vunpack.c.l.s4 %v4393_v46  ;;  %v1012_v48 = vlaneseq }
  0x7b   : > { %3263 = vmatpush1.bf16.msra.mxu0 %v3262_v38  ;;  %2945 = vmatprep.subr.bf16.mxu1 %v2944_v39  ;;  %v690_v59 = vld [vmem:[#allocation5 + $0xe18] sm:$0xff]  ;;  %v880_v60 = vld [vmem:[#allocation5 + $0x1408] sm:$0xff]  ;;  %v3270_v63 = vpack.c.bf16 %v873_v57, %v867_v55  ;;  %v683_v1 = vld [vmem:[#allocation5 + $0xde0] sm:$0xff] }
  0x7c   : > { %3265 = vmatprep.subr.bf16.mxu0 %v3264_v43  ;;  %v886_v61 = vld [vmem:[#allocation5 + $0x1438] sm:$0xff]  ;;  %v2952_v0 = vpack.c.bf16 %v690_v59, %v684_v58  ;;  %v689_v2 = vld [vmem:[#allocation5 + $0xe10] sm:$0xff]  ;;  %v879_v3 = vld [vmem:[#allocation5 + $0x1400] sm:$0xff] }
  0x7d   : > { %v3272_v4 = vpack.c.bf16 %v886_v61, %v880_v60  ;;  %v885_v5 = vld [vmem:[#allocation5 + $0x1430] sm:$0xff]  ;;  %v696_v6 = vld [vmem:[#allocation5 + $0xe48] sm:$0xff]  ;;  %v702_v7 = vld [vmem:[#allocation5 + $0xe78] sm:$0xff]  ;;  %v2954_v10 = vpack.c.bf16 %v689_v2, %v683_v1  ;;  %v1011_v61 = vunpack.c.0.s8 %v1010_v47 }
  0x7e   : > { %2947 = vmatpush1.bf16.msra.mxu1 %v2946_v50  ;;  %v892_v8 = vld [vmem:[#allocation5 + $0x1468] sm:$0xff]  ;;  %v898_v9 = vld [vmem:[#allocation5 + $0x1498] sm:$0xff]  ;;  %v3274_v11 = vpack.c.bf16 %v885_v5, %v879_v3  ;;  %v2956_v12 = vpack.c.bf16 %v702_v7, %v696_v6  ;;  %v695_v13 = vld [vmem:[#allocation5 + $0xe40] sm:$0xff] }
  0x7f   : > { %3267 = vmatpush1.bf16.msra.mxu0 %v3266_v51  ;;  %2949 = vmatprep.subr.bf16.mxu1 %v2948_v52  ;;  %v701_v14 = vld [vmem:[#allocation5 + $0xe70] sm:$0xff]  ;;  %v891_v15 = vld [vmem:[#allocation5 + $0x1460] sm:$0xff]  ;;  %v3276_v16 = vpack.c.bf16 %v898_v9, %v892_v8  ;;  %v708_v18 = vld [vmem:[#allocation5 + $0xea8] sm:$0xff] }
  0x80   : > { %3269 = vmatprep.subr.bf16.mxu0 %v3268_v56  ;;  %v897_v17 = vld [vmem:[#allocation5 + $0x1490] sm:$0xff]  ;;  %v714_v19 = vld [vmem:[#allocation5 + $0xed8] sm:$0xff]  ;;  %v904_v20 = vld [vmem:[#allocation5 + $0x14c8] sm:$0xff]  ;;  %v2958_v22 = vpack.c.bf16 %v701_v14, %v695_v13 }
  0x81   : > { %v910_v21 = vld [vmem:[#allocation5 + $0x14f8] sm:$0xff]  ;;  %v3278_v23 = vpack.c.bf16 %v897_v17, %v891_v15  ;;  %v2960_v24 = vpack.c.bf16 %v714_v19, %v708_v18  ;;  %v707_v25 = vld [vmem:[#allocation5 + $0xea0] sm:$0xff]  ;;  %v713_v26 = vld [vmem:[#allocation5 + $0xed0] sm:$0xff] }
  0x82   : > { %2951 = vmatpush1.bf16.msra.mxu1 %v2950_v62  ;;  %v903_v27 = vld [vmem:[#allocation5 + $0x14c0] sm:$0xff]  ;;  %v3280_v28 = vpack.c.bf16 %v910_v21, %v904_v20  ;;  %v909_v29 = vld [vmem:[#allocation5 + $0x14f0] sm:$0xff]  ;;  %v720_v30 = vld [vmem:[#allocation5 + $0xf08] sm:$0xff]  ;;  %v2962_v34 = vpack.c.bf16 %v713_v26, %v707_v25  ;;  %v4617_v62 = vshrl.u32 %v1012_v48, 7 }
  0x83   : > { %3271 = vmatpush1.bf16.msra.mxu0 %v3270_v63  ;;  %2953 = vmatprep.subr.bf16.mxu1 %v2952_v0  ;;  %v726_v31 = vld [vmem:[#allocation5 + $0xf38] sm:$0xff]  ;;  %v916_v32 = vld [vmem:[#allocation5 + $0x1528] sm:$0xff]  ;;  %v3282_v35 = vpack.c.bf16 %v909_v29, %v903_v27  ;;  %v719_v37 = vld [vmem:[#allocation5 + $0xf00] sm:$0xff] }
  0x84   : > { %3273 = vmatprep.subr.bf16.mxu0 %v3272_v4  ;;  %v922_v33 = vld [vmem:[#allocation5 + $0x1558] sm:$0xff]  ;;  %v2964_v36 = vpack.c.bf16 %v726_v31, %v720_v30  ;;  %v725_v38 = vld [vmem:[#allocation5 + $0xf30] sm:$0xff]  ;;  %v915_v39 = vld [vmem:[#allocation5 + $0x1520] sm:$0xff] }
  0x85   : > { %v3284_v40 = vpack.c.bf16 %v922_v33, %v916_v32  ;;  %v921_v41 = vld [vmem:[#allocation5 + $0x1550] sm:$0xff]  ;;  %v732_v42 = vld [vmem:[#allocation5 + $0xf68] sm:$0xff]  ;;  %v738_v43 = vld [vmem:[#allocation5 + $0xf98] sm:$0xff]  ;;  %v2966_v49 = vpack.c.bf16 %v725_v38, %v719_v37 }
  0x86   : > { %2955 = vmatpush1.bf16.msra.mxu1 %v2954_v10  ;;  %v928_v44 = vld [vmem:[#allocation5 + $0x1588] sm:$0xff]  ;;  %v934_v45 = vld [vmem:[#allocation5 + $0x15b8] sm:$0xff]  ;;  %v3286_v50 = vpack.c.bf16 %v921_v41, %v915_v39  ;;  %v2968_v51 = vpack.c.bf16 %v738_v43, %v732_v42  ;;  %v731_v52 = vld [vmem:[#allocation5 + $0xf60] sm:$0xff] }
  0x87   : > { %3275 = vmatpush1.bf16.msra.mxu0 %v3274_v11  ;;  %2957 = vmatprep.subr.bf16.mxu1 %v2956_v12  ;;  %v737_v53 = vld [vmem:[#allocation5 + $0xf90] sm:$0xff]  ;;  %v927_v54 = vld [vmem:[#allocation5 + $0x1580] sm:$0xff]  ;;  %v3288_v55 = vpack.c.bf16 %v934_v45, %v928_v44  ;;  %v744_v57 = vld [vmem:[#allocation5 + $0xfc8] sm:$0xff]  ;;  %v4620_v11 = vsub.s32 %v1011_v61, %v4617_v62 }
  0x88   : > { %3277 = vmatprep.subr.bf16.mxu0 %v3276_v16  ;;  %v933_v56 = vld [vmem:[#allocation5 + $0x15b0] sm:$0xff]  ;;  %v750_v58 = vld [vmem:[#allocation5 + $0xff8] sm:$0xff]  ;;  %v940_v59 = vld [vmem:[#allocation5 + $0x15e8] sm:$0xff]  ;;  %v2970_v63 = vpack.c.bf16 %v737_v53, %v731_v52 }
  0x89   : > { %v946_v60 = vld [vmem:[#allocation5 + $0x1618] sm:$0xff]  ;;  %v3290_v0 = vpack.c.bf16 %v933_v56, %v927_v54  ;;  %v2972_v1 = vpack.c.bf16 %v750_v58, %v744_v57  ;;  %v743_v2 = vld [vmem:[#allocation5 + $0xfc0] sm:$0xff]  ;;  %v749_v3 = vld [vmem:[#allocation5 + $0xff0] sm:$0xff] }
  0x8a   : > { %2959 = vmatpush1.bf16.msra.mxu1 %v2958_v22  ;;  %v939_v4 = vld [vmem:[#allocation5 + $0x15e0] sm:$0xff]  ;;  %v3292_v5 = vpack.c.bf16 %v946_v60, %v940_v59  ;;  %v945_v6 = vld [vmem:[#allocation5 + $0x1610] sm:$0xff]  ;;  %v756_v7 = vld [vmem:[#allocation5 + $0x1028] sm:$0xff]  ;;  %v2974_v12 = vpack.c.bf16 %v749_v3, %v743_v2 }
  0x8b   : > { %3279 = vmatpush1.bf16.msra.mxu0 %v3278_v23  ;;  %2961 = vmatprep.subr.bf16.mxu1 %v2960_v24  ;;  %v762_v8 = vld [vmem:[#allocation5 + $0x1058] sm:$0xff]  ;;  %v952_v9 = vld [vmem:[#allocation5 + $0x1648] sm:$0xff]  ;;  %v755_v13 = vld [vmem:[#allocation5 + $0x1020] sm:$0xff]  ;;  %v3294_v14 = vpack.c.bf16 %v945_v6, %v939_v4 }
  0x8c   : > { %3281 = vmatprep.subr.bf16.mxu0 %v3280_v28  ;;  %v958_v10 = vld [vmem:[#allocation5 + $0x1678] sm:$0xff]  ;;  %v2976_v15 = vpack.c.bf16 %v762_v8, %v756_v7  ;;  %v761_v16 = vld [vmem:[#allocation5 + $0x1050] sm:$0xff]  ;;  %v951_v17 = vld [vmem:[#allocation5 + $0x1640] sm:$0xff] }
  0x8d   : > { %v957_v18 = vld [vmem:[#allocation5 + $0x1670] sm:$0xff]  ;;  %v3296_v19 = vpack.c.bf16 %v958_v10, %v952_v9  ;;  %v768_v20 = vld [vmem:[#allocation5 + $0x1088] sm:$0xff]  ;;  %v774_v21 = vld [vmem:[#allocation5 + $0x10b8] sm:$0xff]  ;;  %v2978_v27 = vpack.c.bf16 %v761_v16, %v755_v13 }
  0x8e   : > { %2963 = vmatpush1.bf16.msra.mxu1 %v2962_v34  ;;  %v2922_v22 = vld [vmem:[%s4607_s4 + $0x8] sm:$0xff]  ;;  %v964_v23 = vld [vmem:[#allocation5 + $0x16a8] sm:$0xff]  ;;  %v3298_v28 = vpack.c.bf16 %v957_v18, %v951_v17  ;;  %v2980_v29 = vpack.c.bf16 %v774_v21, %v768_v20  ;;  %v767_v30 = vld [vmem:[#allocation5 + $0x1080] sm:$0xff] }
  0x8f   : > { %3283 = vmatpush1.bf16.msra.mxu0 %v3282_v35  ;;  %2965 = vmatprep.subr.bf16.mxu1 %v2964_v36  ;;  %v970_v24 = vld [vmem:[#allocation5 + $0x16d8] sm:$0xff]  ;;  %v4624_v25 = vrot.slane %v2922_v22, %v4620_v11  ;;  %v1008_v26 = vcombine.high %v2922_v22, %v2922_v22  ;;  %v773_v31 = vld [vmem:[#allocation5 + $0x10b0] sm:$0xff]  ;;  %v963_v32 = vld [vmem:[#allocation5 + $0x16a0] sm:$0xff] }
  0x90   : > { %3285 = vmatprep.subr.bf16.mxu0 %v3284_v40  ;;  %v3300_v35 = vpack.c.bf16 %v970_v24, %v964_v23  ;;  %v969_v36 = vld [vmem:[#allocation5 + $0x16d0] sm:$0xff]  ;;  %v780_v37 = vld [vmem:[#allocation5 + $0x10e8] sm:$0xff]  ;;  %v786_v38 = vld [vmem:[#allocation5 + $0x1118] sm:$0xff]  ;;  %v2982_v42 = vpack.c.bf16 %v773_v31, %v767_v30 }
  0x91   : > { %v4628_v33 = vcombine.high %v4624_v25, %v4624_v25  ;;  %v4631_v34 = vrot.slane %v1008_v26, %v4620_v11  ;;  %v976_v39 = vld [vmem:[#allocation5 + $0x1708] sm:$0xff]  ;;  %v982_v40 = vld [vmem:[#allocation5 + $0x1738] sm:$0xff]  ;;  %v3302_v43 = vpack.c.bf16 %v969_v36, %v963_v32  ;;  %v2984_v44 = vpack.c.bf16 %v786_v38, %v780_v37  ;;  %v779_v45 = vld [vmem:[#allocation5 + $0x10e0] sm:$0xff] }
  0x92   : > { %2967 = vmatpush1.bf16.msra.mxu1 %v2966_v49  ;;  %v785_v46 = vld [vmem:[#allocation5 + $0x1110] sm:$0xff]  ;;  %v975_v47 = vld [vmem:[#allocation5 + $0x1700] sm:$0xff]  ;;  %v3304_v48 = vpack.c.bf16 %v982_v40, %v976_v39  ;;  %v988_v52 = vld [vmem:[#allocation5 + $0x1768] sm:$0xff] }
  0x93   : > { %3287 = vmatpush1.bf16.msra.mxu0 %v3286_v50  ;;  %2969 = vmatprep.subr.bf16.mxu1 %v2968_v51  ;;  %v4636_v41 = vcombine.high %v4631_v34, %v4631_v34  ;;  %v981_v49 = vld [vmem:[#allocation5 + $0x1730] sm:$0xff]  ;;  %v792_v50 = vld [vmem:[#allocation5 + $0x1148] sm:$0xff]  ;;  %v798_v51 = vld [vmem:[#allocation5 + $0x1178] sm:$0xff]  ;;  %v2986_v54 = vpack.c.bf16 %v785_v46, %v779_v45 }
  0x94   : > { %3289 = vmatprep.subr.bf16.mxu0 %v3288_v55  ;;  %1093 = vmatprep.mubr.f32.mxu1 %v4628_v33  ;;  %v994_v53 = vld [vmem:[#allocation5 + $0x1798] sm:$0xff]  ;;  %v3306_v55 = vpack.c.bf16 %v981_v49, %v975_v47  ;;  %v2988_v56 = vpack.c.bf16 %v798_v51, %v792_v50  ;;  %v791_v57 = vld [vmem:[#allocation5 + $0x1140] sm:$0xff]  ;;  %v797_v58 = vld [vmem:[#allocation5 + $0x1170] sm:$0xff] }
  0x95   : > { %1448 = vmatprep.mubr.f32.mxu0 %v4636_v41  ;;  %v987_v59 = vld [vmem:[#allocation5 + $0x1760] sm:$0xff]  ;;  %v3308_v60 = vpack.c.bf16 %v994_v53, %v988_v52  ;;  %v993_v61 = vld [vmem:[#allocation5 + $0x1790] sm:$0xff]  ;;  %v1006_v2 = vld [vmem:[#allocation5 + $0x17f8] sm:$0xff]  ;;  %v2990_v3 = vpack.c.bf16 %v797_v58, %v791_v57 }
  0x96   : > { %2971 = vmatpush1.bf16.msra.mxu1 %v2970_v63  ;;  %v804_v63 = vld [vmem:[#allocation5 + $0x11a8] sm:$0xff]  ;;  %v3310_v4 = vpack.c.bf16 %v993_v61, %v987_v59  ;;  %v803_v6 = vld [vmem:[#allocation5 + $0x11a0] sm:$0xff]  ;;  %v809_v7 = vld [vmem:[#allocation5 + $0x11d0] sm:$0xff] }
  0x97   : > { %3291 = vmatpush1.bf16.msra.mxu0 %v3290_v0  ;;  %2973 = vmatprep.subr.bf16.mxu1 %v2972_v1  ;;  %v810_v0 = vld [vmem:[#allocation5 + $0x11d8] sm:$0xff]  ;;  %v1000_v1 = vld [vmem:[#allocation5 + $0x17c8] sm:$0xff]  ;;  %v999_v8 = vld [vmem:[#allocation5 + $0x17c0] sm:$0xff]  ;;  %v2994_v16 = vpack.c.bf16 %v809_v7, %v803_v6 }
  0x98   : > { %3293 = vmatprep.subr.bf16.mxu0 %v3292_v5  ;;  %v2992_v5 = vpack.c.bf16 %v810_v0, %v804_v63  ;;  %v3312_v9 = vpack.c.bf16 %v1006_v2, %v1000_v1  ;;  %v1005_v10 = vld [vmem:[#allocation5 + $0x17f0] sm:$0xff]  ;;  %v822_v13 = vld [vmem:[#allocation5 + $0x1238] sm:$0xff]  ;;  %v236_v21 = vld [vmem:[#allocation5] sm:$0xff] }
  0x99   : > { %v3314_v17 = vpack.c.bf16 %v1005_v10, %v999_v8  ;;  %v821_v20 = vld [vmem:[#allocation5 + $0x1230] sm:$0xff]  ;;  %v828_v24 = vld [vmem:[#allocation5 + $0x1268] sm:$0xff]  ;;  %v834_v26 = vld [vmem:[#allocation5 + $0x1298] sm:$0xff] }
  0x9a   : > { %2975 = vmatpush1.bf16.msra.mxu1 %v2974_v12  ;;  %v816_v12 = vld [vmem:[#allocation5 + $0x1208] sm:$0xff]  ;;  %v242_v23 = vld [vmem:[#allocation5 + $0x30] sm:$0xff]  ;;  %v3000_v31 = vpack.c.bf16 %v834_v26, %v828_v24  ;;  %v827_v32 = vld [vmem:[#allocation5 + $0x1260] sm:$0xff] }
  0x9b   : > { %3295 = vmatpush1.bf16.msra.mxu0 %v3294_v14  ;;  %2977 = vmatprep.subr.bf16.mxu1 %v2976_v15  ;;  %v237_v14 = vld [vmem:[#allocation5 + $0x8] sm:$0xff]  ;;  %v243_v15 = vld [vmem:[#allocation5 + $0x38] sm:$0xff]  ;;  %v2996_v18 = vpack.c.bf16 %v822_v13, %v816_v12  ;;  %v3318_v30 = vpack.c.bf16 %v242_v23, %v236_v21  ;;  %v248_v36 = vld [vmem:[#allocation5 + $0x60] sm:$0xff] }
  0x9c   : > { %3297 = vmatprep.subr.bf16.mxu0 %v3296_v19  ;;  %v815_v19 = vld [vmem:[#allocation5 + $0x1200] sm:$0xff]  ;;  %v3316_v22 = vpack.c.bf16 %v243_v15, %v237_v14  ;;  %v254_v38 = vld [vmem:[#allocation5 + $0x90] sm:$0xff]  ;;  %v840_v39 = vld [vmem:[#allocation5 + $0x12c8] sm:$0xff] }
  0x9d   : > { %v846_v40 = vld [vmem:[#allocation5 + $0x12f8] sm:$0xff]  ;;  %v3322_v45 = vpack.c.bf16 %v254_v38, %v248_v36  ;;  %v839_v47 = vld [vmem:[#allocation5 + $0x12c0] sm:$0xff]  ;;  %v266_v51 = vld [vmem:[#allocation5 + $0xf0] sm:$0xff] }
  0x9e   : > { %2979 = vmatpush1.bf16.msra.mxu1 %v2978_v27  ;;  %v249_v27 = vld [vmem:[#allocation5 + $0x68] sm:$0xff]  ;;  %v3004_v46 = vpack.c.bf16 %v846_v40, %v840_v39  ;;  %v260_v49 = vld [vmem:[#allocation5 + $0xc0] sm:$0xff]  ;;  %v858_v53 = vld [vmem:[#allocation5 + $0x1358] sm:$0xff] }
  0x9f   : > { %3299 = vmatpush1.bf16.msra.mxu0 %v3298_v28  ;;  %2981 = vmatprep.subr.bf16.mxu1 %v2980_v29  ;;  %v255_v28 = vld [vmem:[#allocation5 + $0x98] sm:$0xff]  ;;  %v2998_v29 = vpack.c.bf16 %v821_v20, %v815_v19  ;;  %v852_v52 = vld [vmem:[#allocation5 + $0x1328] sm:$0xff]  ;;  %v3326_v57 = vpack.c.bf16 %v266_v51, %v260_v49  ;;  %v851_v59 = vld [vmem:[#allocation5 + $0x1320] sm:$0xff] }
  0xa0   : > { %3301 = vmatprep.subr.bf16.mxu0 %v3300_v35  ;;  %v833_v35 = vld [vmem:[#allocation5 + $0x1290] sm:$0xff]  ;;  %v3320_v37 = vpack.c.bf16 %v255_v28, %v249_v27  ;;  %v3008_v58 = vpack.c.bf16 %v858_v53, %v852_v52  ;;  %v272_v61 = vld [vmem:[#allocation5 + $0x120] sm:$0xff]  ;;  %v864_v1 = vld [vmem:[#allocation5 + $0x1388] sm:$0xff] }
  0xa1   : > { %v278_v0 = vld [vmem:[#allocation5 + $0x150] sm:$0xff]  ;;  %v870_v2 = vld [vmem:[#allocation5 + $0x13b8] sm:$0xff]  ;;  %v863_v8 = vld [vmem:[#allocation5 + $0x1380] sm:$0xff] }
  0xa2   : > { %2983 = vmatpush1.bf16.msra.mxu1 %v2982_v42  ;;  %v261_v42 = vld [vmem:[#allocation5 + $0xc8] sm:$0xff]  ;;  %v3330_v6 = vpack.c.bf16 %v278_v0, %v272_v61  ;;  %v3012_v7 = vpack.c.bf16 %v870_v2, %v864_v1  ;;  %v284_v10 = vld [vmem:[#allocation5 + $0x180] sm:$0xff]  ;;  %v290_v13 = vld [vmem:[#allocation5 + $0x1b0] sm:$0xff] }
  0xa3   : > { %3303 = vmatpush1.bf16.msra.mxu0 %v3302_v43  ;;  %2985 = vmatprep.subr.bf16.mxu1 %v2984_v44  ;;  %v267_v43 = vld [vmem:[#allocation5 + $0xf8] sm:$0xff]  ;;  %v3002_v44 = vpack.c.bf16 %v833_v35, %v827_v32  ;;  %v876_v14 = vld [vmem:[#allocation5 + $0x13e8] sm:$0xff]  ;;  %v3334_v19 = vpack.c.bf16 %v290_v13, %v284_v10  ;;  %v875_v21 = vld [vmem:[#allocation5 + $0x13e0] sm:$0xff] }
  0xa4   : > { %3305 = vmatprep.subr.bf16.mxu0 %v3304_v48  ;;  %v845_v48 = vld [vmem:[#allocation5 + $0x12f0] sm:$0xff]  ;;  %v3324_v50 = vpack.c.bf16 %v267_v43, %v261_v42  ;;  %v882_v15 = vld [vmem:[#allocation5 + $0x1418] sm:$0xff]  ;;  %v296_v23 = vld [vmem:[#allocation5 + $0x1e0] sm:$0xff] }
  0xa5   : > { %v3016_v20 = vpack.c.bf16 %v882_v15, %v876_v14  ;;  %v302_v26 = vld [vmem:[#allocation5 + $0x210] sm:$0xff]  ;;  %v888_v27 = vld [vmem:[#allocation5 + $0x1448] sm:$0xff]  ;;  %v894_v28 = vld [vmem:[#allocation5 + $0x1478] sm:$0xff] }
  0xa6   : > { %2987 = vmatpush1.bf16.msra.mxu1 %v2986_v54  ;;  %v273_v54 = vld [vmem:[#allocation5 + $0x128] sm:$0xff]  ;;  %v887_v32 = vld [vmem:[#allocation5 + $0x1440] sm:$0xff]  ;;  %v3338_v35 = vpack.c.bf16 %v302_v26, %v296_v23  ;;  %v3020_v36 = vpack.c.bf16 %v894_v28, %v888_v27  ;;  %v314_v39 = vld [vmem:[#allocation5 + $0x270] sm:$0xff] }
  0xa7   : > { %3307 = vmatpush1.bf16.msra.mxu0 %v3306_v55  ;;  %2989 = vmatprep.subr.bf16.mxu1 %v2988_v56  ;;  %v279_v55 = vld [vmem:[#allocation5 + $0x158] sm:$0xff]  ;;  %v3006_v56 = vpack.c.bf16 %v845_v48, %v839_v47  ;;  %v308_v38 = vld [vmem:[#allocation5 + $0x240] sm:$0xff]  ;;  %v900_v42 = vld [vmem:[#allocation5 + $0x14a8] sm:$0xff] }
  0xa8   : > { %3309 = vmatprep.subr.bf16.mxu0 %v3308_v60  ;;  %v857_v60 = vld [vmem:[#allocation5 + $0x1350] sm:$0xff]  ;;  %v3328_v63 = vpack.c.bf16 %v279_v55, %v273_v54  ;;  %v906_v43 = vld [vmem:[#allocation5 + $0x14d8] sm:$0xff]  ;;  %v3342_v49 = vpack.c.bf16 %v314_v39, %v308_v38  ;;  %v899_v51 = vld [vmem:[#allocation5 + $0x14a0] sm:$0xff] }
  0xa9   : > { %v905_v52 = vld [vmem:[#allocation5 + $0x14d0] sm:$0xff]  ;;  %v320_v53 = vld [vmem:[#allocation5 + $0x2a0] sm:$0xff] }
  0xaa   : > { %2991 = vmatpush1.bf16.msra.mxu1 %v2990_v3  ;;  %v285_v3 = vld [vmem:[#allocation5 + $0x188] sm:$0xff]  ;;  %v3026_v61 = vpack.c.bf16 %v905_v52, %v899_v51  ;;  %v911_v1 = vld [vmem:[#allocation5 + $0x1500] sm:$0xff]  ;;  %v917_v2 = vld [vmem:[#allocation5 + $0x1530] sm:$0xff] }
  0xab   : > { %3311 = vmatpush1.bf16.msra.mxu0 %v3310_v4  ;;  %2993 = vmatprep.subr.bf16.mxu1 %v2992_v5  ;;  %v291_v4 = vld [vmem:[#allocation5 + $0x1b8] sm:$0xff]  ;;  %v3010_v5 = vpack.c.bf16 %v857_v60, %v851_v59  ;;  %v333_v59 = vld [vmem:[#allocation5 + $0x308] sm:$0xff]  ;;  %v3030_v10 = vpack.c.bf16 %v917_v2, %v911_v1  ;;  %v923_v14 = vld [vmem:[#allocation5 + $0x1560] sm:$0xff] }
  0xac   : > { %3313 = vmatprep.subr.bf16.mxu0 %v3312_v9  ;;  %v869_v9 = vld [vmem:[#allocation5 + $0x13b0] sm:$0xff]  ;;  %v3332_v12 = vpack.c.bf16 %v291_v4, %v285_v3  ;;  %v339_v60 = vld [vmem:[#allocation5 + $0x338] sm:$0xff]  ;;  %v332_v3 = vld [vmem:[#allocation5 + $0x300] sm:$0xff] }
  0xad   : > { %v3348_v4 = vpack.c.bf16 %v339_v60, %v333_v59  ;;  %v929_v15 = vld [vmem:[#allocation5 + $0x1590] sm:$0xff]  ;;  %v935_v27 = vld [vmem:[#allocation5 + $0x15c0] sm:$0xff]  ;;  %v381_v51 = vld [vmem:[#allocation5 + $0x488] sm:$0xff] }
  0xae   : > { %2995 = vmatpush1.bf16.msra.mxu1 %v2994_v16  ;;  %v297_v16 = vld [vmem:[#allocation5 + $0x1e8] sm:$0xff]  ;;  %v3034_v23 = vpack.c.bf16 %v929_v15, %v923_v14  ;;  %v941_v28 = vld [vmem:[#allocation5 + $0x15f0] sm:$0xff]  ;;  %v387_v52 = vld [vmem:[#allocation5 + $0x4b8] sm:$0xff] }
  0xaf   : > { %3315 = vmatpush1.bf16.msra.mxu0 %v3314_v17  ;;  %2997 = vmatprep.subr.bf16.mxu1 %v2996_v18  ;;  %v303_v17 = vld [vmem:[#allocation5 + $0x218] sm:$0xff]  ;;  %v3014_v18 = vpack.c.bf16 %v869_v9, %v863_v8  ;;  %v345_v8 = vld [vmem:[#allocation5 + $0x368] sm:$0xff]  ;;  %v3038_v38 = vpack.c.bf16 %v941_v28, %v935_v27  ;;  %v380_v59 = vld [vmem:[#allocation5 + $0x480] sm:$0xff]  ;;  %v3364_v60 = vpack.c.bf16 %v387_v52, %v381_v51 }
  0xb0   : > { %3317 = vmatprep.subr.bf16.mxu0 %v3316_v22  ;;  %v881_v22 = vld [vmem:[#allocation5 + $0x1410] sm:$0xff]  ;;  %v3336_v24 = vpack.c.bf16 %v303_v17, %v297_v16  ;;  %v351_v9 = vld [vmem:[#allocation5 + $0x398] sm:$0xff]  ;;  %v344_v16 = vld [vmem:[#allocation5 + $0x360] sm:$0xff] }
  0xb1   : > { %1094 = vmatmul.mubr.f32.vlgmr.msra.gmra.mrb[0].mxu1 %v4624_v25  ;;  %v3352_v17 = vpack.c.bf16 %v351_v9, %v345_v8  ;;  %v393_v1 = vld [vmem:[#allocation5 + $0x4e8] sm:$0xff]  ;;  %v399_v2 = vld [vmem:[#allocation5 + $0x518] sm:$0xff]  ;;  %v392_v8 = vld [vmem:[#allocation5 + $0x4e0] sm:$0xff] }
  0xb2   : > { %2999 = vmatpush1.bf16.msra.mxu1 %v2998_v29  ;;  %1449 = vmatmul.mubr.f32.vlgmr.msra.gmra.mrb[0].mxu0 %v4631_v34  ;;  %v309_v29 = vld [vmem:[#allocation5 + $0x248] sm:$0xff]  ;;  %v3368_v9 = vpack.c.bf16 %v399_v2, %v393_v1  ;;  %v411_v15 = vld [vmem:[#allocation5 + $0x578] sm:$0xff]  ;;  %v631_v51 = vld [vmem:[#allocation5 + $0xc40] sm:$0xff] }
  0xb3   : > { %3319 = vmatpush1.bf16.msra.mxu0 %v3318_v30  ;;  %3001 = vmatprep.subr.bf16.mxu1 %v3000_v31  ;;  %v315_v30 = vld [vmem:[#allocation5 + $0x278] sm:$0xff]  ;;  %v3018_v31 = vpack.c.bf16 %v881_v22, %v875_v21  ;;  %v357_v21 = vld [vmem:[#allocation5 + $0x3c8] sm:$0xff]  ;;  %v428_v52 = vld [vmem:[#allocation5 + $0x600] sm:$0xff] }
  0xb4   : > { %3321 = vmatprep.subr.bf16.mxu0 %v3320_v37  ;;  %1164 = vmatprep.mubr.f32.mxu1 %v4636_v41  ;;  %v893_v37 = vld [vmem:[#allocation5 + $0x1470] sm:$0xff]  ;;  %v3340_v40 = vpack.c.bf16 %v315_v30, %v309_v29  ;;  %v363_v22 = vld [vmem:[#allocation5 + $0x3f8] sm:$0xff]  ;;  %v356_v29 = vld [vmem:[#allocation5 + $0x3c0] sm:$0xff] }
  0xb5   : > { %v3022_v48 = vpack.c.bf16 %v893_v37, %v887_v32  ;;  %v3356_v30 = vpack.c.bf16 %v363_v22, %v357_v21  ;;  %v948_v32 = vld [vmem:[#allocation5 + $0x1628] sm:$0xff]  ;;  %v375_v37 = vld [vmem:[#allocation5 + $0x458] sm:$0xff]  ;;  %v404_v21 = vld [vmem:[#allocation5 + $0x540] sm:$0xff] }
  0xb6   : > { %3003 = vmatpush1.bf16.msra.mxu1 %v3002_v44  ;;  %v4643_v44 = vld [vmem:[%s4607_s4] sm:$0xff]  ;;  %v423_v28 = vld [vmem:[#allocation5 + $0x5d8] sm:$0xff]  ;;  %v643_v1 = vld [vmem:[#allocation5 + $0xca0] sm:$0xff] }
  0xb7   : > { %3323 = vmatpush1.bf16.msra.mxu0 %v3322_v45  ;;  %3005 = vmatprep.subr.bf16.mxu1 %v3004_v46  ;;  %v321_v45 = vld [vmem:[#allocation5 + $0x2a8] sm:$0xff]  ;;  %v327_v46 = vld [vmem:[#allocation5 + $0x2d8] sm:$0xff]  ;;  %v4647_v47 = vrot.slane %v4643_v44, %v4620_v11  ;;  %v440_v2 = vld [vmem:[#allocation5 + $0x660] sm:$0xff] }
  0xb8   : > { %3325 = vmatprep.subr.bf16.mxu0 %v3324_v50  ;;  %v3024_v50 = vpack.c.bf16 %v906_v43, %v900_v42  ;;  %v3344_v55 = vpack.c.bf16 %v327_v46, %v321_v45  ;;  %v947_v42 = vld [vmem:[#allocation5 + $0x1620] sm:$0xff]  ;;  %v953_v43 = vld [vmem:[#allocation5 + $0x1650] sm:$0xff]  ;;  %v405_v14 = vld [vmem:[#allocation5 + $0x548] sm:$0xff] }
  0xb9   : > { %v4651_v54 = vcombine.high %v4647_v47, %v4647_v47  ;;  %v368_v45 = vld [vmem:[#allocation5 + $0x420] sm:$0xff]  ;;  %v3372_v22 = vpack.c.bf16 %v411_v15, %v405_v14  ;;  %v417_v27 = vld [vmem:[#allocation5 + $0x5a8] sm:$0xff]  ;;  %v649_v14 = vld [vmem:[#allocation5 + $0xcd0] sm:$0xff] }
  0xba   : > { %3007 = vmatpush1.bf16.msra.mxu1 %v3006_v56  ;;  %v326_v56 = vld [vmem:[#allocation5 + $0x2d0] sm:$0xff]  ;;  %v655_v15 = vld [vmem:[#allocation5 + $0xd00] sm:$0xff] }
  0xbb   : > { %3327 = vmatpush1.bf16.msra.mxu0 %v3326_v57  ;;  %3009 = vmatprep.subr.bf16.mxu1 %v3008_v58  ;;  %v912_v57 = vld [vmem:[#allocation5 + $0x1508] sm:$0xff]  ;;  %v918_v58 = vld [vmem:[#allocation5 + $0x1538] sm:$0xff] }
  0xbc   : > { %3329 = vmatprep.subr.bf16.mxu0 %v3328_v63  ;;  %1541 = vmatprep.mubr.f32.mxu0 %v4651_v54  ;;  %v3346_v63 = vpack.c.bf16 %v326_v56, %v320_v53  ;;  %v3028_v0 = vpack.c.bf16 %v918_v58, %v912_v57  ;;  %v3042_v53 = vpack.c.bf16 %v953_v43, %v947_v42  ;;  %v959_v57 = vld [vmem:[#allocation5 + $0x1680] sm:$0xff]  ;;  %v965_v58 = vld [vmem:[#allocation5 + $0x16b0] sm:$0xff]  ;;  %v429_v42 = vld [vmem:[#allocation5 + $0x608] sm:$0xff] }
  0xbd   : > { %v435_v43 = vld [vmem:[#allocation5 + $0x638] sm:$0xff] }
  0xbe   : > { %3011 = vmatpush1.bf16.msra.mxu1 %v3010_v5  ;;  %v338_v5 = vld [vmem:[#allocation5 + $0x330] sm:$0xff] }
  0xbf   : > { %3331 = vmatpush1.bf16.msra.mxu0 %v3330_v6  ;;  %3013 = vmatprep.subr.bf16.mxu1 %v3012_v7  ;;  %v924_v6 = vld [vmem:[#allocation5 + $0x1568] sm:$0xff]  ;;  %v930_v7 = vld [vmem:[#allocation5 + $0x1598] sm:$0xff] }
  0xc0   : > { %3333 = vmatprep.subr.bf16.mxu0 %v3332_v12  ;;  %v3350_v12 = vpack.c.bf16 %v338_v5, %v332_v3  ;;  %v3032_v13 = vpack.c.bf16 %v930_v7, %v924_v6  ;;  %v3046_v3 = vpack.c.bf16 %v965_v58, %v959_v57  ;;  %v971_v6 = vld [vmem:[#allocation5 + $0x16e0] sm:$0xff]  ;;  %v977_v7 = vld [vmem:[#allocation5 + $0x1710] sm:$0xff]  ;;  %v644_v57 = vld [vmem:[#allocation5 + $0xca8] sm:$0xff] }
  0xc1   : > { %v441_v58 = vld [vmem:[#allocation5 + $0x668] sm:$0xff] }
  0xc2   : > { %3015 = vmatpush1.bf16.msra.mxu1 %v3014_v18  ;;  %v350_v18 = vld [vmem:[#allocation5 + $0x390] sm:$0xff] }
  0xc3   : > { %3335 = vmatpush1.bf16.msra.mxu0 %v3334_v19  ;;  %3017 = vmatprep.subr.bf16.mxu1 %v3016_v20  ;;  %v936_v19 = vld [vmem:[#allocation5 + $0x15c8] sm:$0xff]  ;;  %v942_v20 = vld [vmem:[#allocation5 + $0x15f8] sm:$0xff] }
  0xc4   : > { %3337 = vmatprep.subr.bf16.mxu0 %v3336_v24  ;;  %v3354_v24 = vpack.c.bf16 %v350_v18, %v344_v16  ;;  %v3036_v26 = vpack.c.bf16 %v942_v20, %v936_v19  ;;  %v3050_v16 = vpack.c.bf16 %v977_v7, %v971_v6  ;;  %v983_v19 = vld [vmem:[#allocation5 + $0x1740] sm:$0xff]  ;;  %v989_v20 = vld [vmem:[#allocation5 + $0x1770] sm:$0xff]  ;;  %v656_v6 = vld [vmem:[#allocation5 + $0xd08] sm:$0xff] }
  0xc5   : > { %v453_v7 = vld [vmem:[#allocation5 + $0x6c8] sm:$0xff] }
  0xc6   : > { %3019 = vmatpush1.bf16.msra.mxu1 %v3018_v31  ;;  %v362_v31 = vld [vmem:[#allocation5 + $0x3f0] sm:$0xff] }
  0xc7   : > { %3339 = vmatpush1.bf16.msra.mxu0 %v3338_v35  ;;  %3021 = vmatprep.subr.bf16.mxu1 %v3020_v36  ;;  %v954_v35 = vld [vmem:[#allocation5 + $0x1658] sm:$0xff]  ;;  %v369_v36 = vld [vmem:[#allocation5 + $0x428] sm:$0xff]  ;;  %v3358_v39 = vpack.c.bf16 %v362_v31, %v356_v29  ;;  %v3054_v29 = vpack.c.bf16 %v989_v20, %v983_v19 }
  0xc8   : > { %3341 = vmatprep.subr.bf16.mxu0 %v3340_v40  ;;  %v3040_v40 = vpack.c.bf16 %v954_v35, %v948_v32  ;;  %v3360_v46 = vpack.c.bf16 %v375_v37, %v369_v36  ;;  %v995_v32 = vld [vmem:[#allocation5 + $0x17a0] sm:$0xff]  ;;  %v1001_v35 = vld [vmem:[#allocation5 + $0x17d0] sm:$0xff]  ;;  %v3376_v37 = vpack.c.bf16 %v423_v28, %v417_v27  ;;  %v662_v19 = vld [vmem:[#allocation5 + $0xd38] sm:$0xff] }
  0xc9   : > { %v416_v36 = vld [vmem:[#allocation5 + $0x5a0] sm:$0xff]  ;;  %v668_v20 = vld [vmem:[#allocation5 + $0xd68] sm:$0xff]  ;;  %v661_v27 = vld [vmem:[#allocation5 + $0xd30] sm:$0xff] }
  0xca   : > { %3023 = vmatpush1.bf16.msra.mxu1 %v3022_v48  ;;  %v374_v48 = vld [vmem:[#allocation5 + $0x450] sm:$0xff]  ;;  %v667_v28 = vld [vmem:[#allocation5 + $0xd60] sm:$0xff] }
  0xcb   : > { %3343 = vmatpush1.bf16.msra.mxu0 %v3342_v49  ;;  %3025 = vmatprep.subr.bf16.mxu1 %v3024_v50  ;;  %v960_v49 = vld [vmem:[#allocation5 + $0x1688] sm:$0xff]  ;;  %v966_v50 = vld [vmem:[#allocation5 + $0x16b8] sm:$0xff] }
  0xcc   : > { %3345 = vmatprep.subr.bf16.mxu0 %v3344_v55  ;;  %v3362_v55 = vpack.c.bf16 %v374_v48, %v368_v45  ;;  %v3044_v56 = vpack.c.bf16 %v966_v50, %v960_v49  ;;  %v1456_v45 = vcombine.high %v4643_v44, %v4643_v44  ;;  %v625_v50 = vld [vmem:[#allocation5 + $0xc10] sm:$0xff] }
  0xcd   : > { %v3062_v44 = vpack.c.bf16 %v631_v51, %v625_v50  ;;  %v692_v50 = vld [vmem:[#allocation5 + $0xe28] sm:$0xff] }
  0xce   : > { %3027 = vmatpush1.bf16.msra.mxu1 %v3026_v61  ;;  %v386_v61 = vld [vmem:[#allocation5 + $0x4b0] sm:$0xff]  ;;  %v489_v51 = vld [vmem:[#allocation5 + $0x7e8] sm:$0xff] }
  0xcf   : > { %3347 = vmatpush1.bf16.msra.mxu0 %v3346_v63  ;;  %3029 = vmatprep.subr.bf16.mxu1 %v3028_v0  ;;  %v972_v63 = vld [vmem:[#allocation5 + $0x16e8] sm:$0xff]  ;;  %v978_v0 = vld [vmem:[#allocation5 + $0x1718] sm:$0xff] }
  0xd0   : > { %3349 = vmatprep.subr.bf16.mxu0 %v3348_v4  ;;  %v3366_v4 = vpack.c.bf16 %v386_v61, %v380_v59  ;;  %v3048_v5 = vpack.c.bf16 %v978_v0, %v972_v63  ;;  %v447_v59 = vld [vmem:[#allocation5 + $0x698] sm:$0xff]  ;;  %v637_v0 = vld [vmem:[#allocation5 + $0xc70] sm:$0xff] }
  0xd2   : > { %3031 = vmatpush1.bf16.msra.mxu1 %v3030_v10  ;;  %v398_v10 = vld [vmem:[#allocation5 + $0x510] sm:$0xff] }
  0xd3   : > { %3351 = vmatpush1.bf16.msra.mxu0 %v3350_v12  ;;  %3033 = vmatprep.subr.bf16.mxu1 %v3032_v13  ;;  %v984_v12 = vld [vmem:[#allocation5 + $0x1748] sm:$0xff]  ;;  %v990_v13 = vld [vmem:[#allocation5 + $0x1778] sm:$0xff] }
  0xd4   : > { %3353 = vmatprep.subr.bf16.mxu0 %v3352_v17  ;;  %v3370_v17 = vpack.c.bf16 %v398_v10, %v392_v8  ;;  %v3052_v18 = vpack.c.bf16 %v990_v13, %v984_v12  ;;  %v459_v8 = vld [vmem:[#allocation5 + $0x6f8] sm:$0xff]  ;;  %v3066_v10 = vpack.c.bf16 %v643_v1, %v637_v0  ;;  %v704_v0 = vld [vmem:[#allocation5 + $0xe88] sm:$0xff] }
  0xd5   : > { %v501_v1 = vld [vmem:[#allocation5 + $0x848] sm:$0xff] }
  0xd6   : > { %3035 = vmatpush1.bf16.msra.mxu1 %v3034_v23  ;;  %v410_v23 = vld [vmem:[#allocation5 + $0x570] sm:$0xff] }
  0xd7   : > { %3355 = vmatpush1.bf16.msra.mxu0 %v3354_v24  ;;  %3037 = vmatprep.subr.bf16.mxu1 %v3036_v26  ;;  %v996_v24 = vld [vmem:[#allocation5 + $0x17a8] sm:$0xff]  ;;  %v1002_v26 = vld [vmem:[#allocation5 + $0x17d8] sm:$0xff] }
  0xd8   : > { %3357 = vmatprep.subr.bf16.mxu0 %v3356_v30  ;;  %v3374_v30 = vpack.c.bf16 %v410_v23, %v404_v21  ;;  %v3056_v31 = vpack.c.bf16 %v1002_v26, %v996_v24  ;;  %v465_v21 = vld [vmem:[#allocation5 + $0x728] sm:$0xff]  ;;  %v3070_v23 = vpack.c.bf16 %v655_v15, %v649_v14  ;;  %v3072_v26 = vpack.c.bf16 %v668_v20, %v662_v19  ;;  %v709_v20 = vld [vmem:[#allocation5 + $0xeb0] sm:$0xff] }
  0xd9   : > { %v716_v14 = vld [vmem:[#allocation5 + $0xee8] sm:$0xff] }
  0xda   : > { %3039 = vmatpush1.bf16.msra.mxu1 %v3038_v38  ;;  %v422_v38 = vld [vmem:[#allocation5 + $0x5d0] sm:$0xff]  ;;  %v513_v15 = vld [vmem:[#allocation5 + $0x8a8] sm:$0xff] }
  0xdb   : > { %3359 = vmatpush1.bf16.msra.mxu0 %v3358_v39  ;;  %3041 = vmatprep.subr.bf16.mxu1 %v3040_v40  ;;  %v626_v39 = vld [vmem:[#allocation5 + $0xc18] sm:$0xff]  ;;  %v632_v40 = vld [vmem:[#allocation5 + $0xc48] sm:$0xff]  ;;  %v3378_v48 = vpack.c.bf16 %v422_v38, %v416_v36  ;;  %v3074_v38 = vpack.c.bf16 %v667_v28, %v661_v27 }
  0xdc   : > { %3361 = vmatprep.subr.bf16.mxu0 %v3360_v46  ;;  %v3058_v46 = vpack.c.bf16 %v1001_v35, %v995_v32  ;;  %v3060_v49 = vpack.c.bf16 %v632_v40, %v626_v39  ;;  %v674_v32 = vld [vmem:[#allocation5 + $0xd98] sm:$0xff]  ;;  %v680_v35 = vld [vmem:[#allocation5 + $0xdc8] sm:$0xff] }
  0xdd   : > { %v477_v36 = vld [vmem:[#allocation5 + $0x788] sm:$0xff]  ;;  %v3076_v40 = vpack.c.bf16 %v680_v35, %v674_v32  ;;  %v721_v35 = vld [vmem:[#allocation5 + $0xf10] sm:$0xff] }
  0xde   : > { %3043 = vmatpush1.bf16.msra.mxu1 %v3042_v53  ;;  %v3380_v53 = vpack.c.bf16 %v435_v43, %v429_v42  ;;  %v673_v42 = vld [vmem:[#allocation5 + $0xd90] sm:$0xff]  ;;  %v679_v43 = vld [vmem:[#allocation5 + $0xdc0] sm:$0xff]  ;;  %v728_v27 = vld [vmem:[#allocation5 + $0xf48] sm:$0xff] }
  0xdf   : > { %3363 = vmatpush1.bf16.msra.mxu0 %v3362_v55  ;;  %3045 = vmatprep.subr.bf16.mxu1 %v3044_v56  ;;  %v434_v55 = vld [vmem:[#allocation5 + $0x630] sm:$0xff]  ;;  %v638_v56 = vld [vmem:[#allocation5 + $0xc78] sm:$0xff]  ;;  %v525_v28 = vld [vmem:[#allocation5 + $0x908] sm:$0xff] }
  0xe0   : > { %3365 = vmatprep.subr.bf16.mxu0 %v3364_v60  ;;  %v4657_v60 = vrot.slane %v1456_v45, %v4620_v11  ;;  %v3382_v61 = vpack.c.bf16 %v434_v55, %v428_v52  ;;  %v3064_v63 = vpack.c.bf16 %v644_v57, %v638_v56  ;;  %v476_v45 = vld [vmem:[#allocation5 + $0x780] sm:$0xff]  ;;  %v495_v52 = vld [vmem:[#allocation5 + $0x818] sm:$0xff]  ;;  %v685_v57 = vld [vmem:[#allocation5 + $0xdf0] sm:$0xff] }
  0xe2   : > { %3047 = vmatpush1.bf16.msra.mxu1 %v3046_v3  ;;  %v3384_v3 = vpack.c.bf16 %v447_v59, %v441_v58  ;;  %v691_v58 = vld [vmem:[#allocation5 + $0xe20] sm:$0xff] }
  0xe3   : > { %3367 = vmatpush1.bf16.msra.mxu0 %v3366_v4  ;;  %3049 = vmatprep.subr.bf16.mxu1 %v3048_v5  ;;  %v446_v4 = vld [vmem:[#allocation5 + $0x690] sm:$0xff]  ;;  %v650_v5 = vld [vmem:[#allocation5 + $0xcd8] sm:$0xff]  ;;  %v488_v59 = vld [vmem:[#allocation5 + $0x7e0] sm:$0xff] }
  0xe4   : > { %3369 = vmatprep.subr.bf16.mxu0 %v3368_v9  ;;  %v4662_v9 = vcombine.high %v4657_v60, %v4657_v60  ;;  %v3386_v12 = vpack.c.bf16 %v446_v4, %v440_v2  ;;  %v3068_v13 = vpack.c.bf16 %v656_v6, %v650_v5  ;;  %v507_v2 = vld [vmem:[#allocation5 + $0x878] sm:$0xff]  ;;  %v697_v6 = vld [vmem:[#allocation5 + $0xe50] sm:$0xff] }
  0xe6   : > { %3051 = vmatpush1.bf16.msra.mxu1 %v3050_v16  ;;  %v452_v16 = vld [vmem:[#allocation5 + $0x6c0] sm:$0xff] }
  0xe7   : > { %3371 = vmatpush1.bf16.msra.mxu0 %v3370_v17  ;;  %3053 = vmatprep.subr.bf16.mxu1 %v3052_v18  ;;  %v3388_v17 = vpack.c.bf16 %v459_v8, %v453_v7  ;;  %v458_v18 = vld [vmem:[#allocation5 + $0x6f0] sm:$0xff]  ;;  %v703_v7 = vld [vmem:[#allocation5 + $0xe80] sm:$0xff] }
  0xe8   : > { %3373 = vmatprep.subr.bf16.mxu0 %v3372_v22  ;;  %v471_v22 = vld [vmem:[#allocation5 + $0x758] sm:$0xff]  ;;  %v3390_v24 = vpack.c.bf16 %v458_v18, %v452_v16  ;;  %v500_v8 = vld [vmem:[#allocation5 + $0x840] sm:$0xff] }
  0xe9   : > { %v519_v16 = vld [vmem:[#allocation5 + $0x8d8] sm:$0xff] }
  0xea   : > { %3055 = vmatpush1.bf16.msra.mxu1 %v3054_v29  ;;  %v464_v29 = vld [vmem:[#allocation5 + $0x720] sm:$0xff] }
  0xeb   : > { %3375 = vmatpush1.bf16.msra.mxu0 %v3374_v30  ;;  %3057 = vmatprep.subr.bf16.mxu1 %v3056_v31  ;;  %v3392_v30 = vpack.c.bf16 %v471_v22, %v465_v21  ;;  %v470_v31 = vld [vmem:[#allocation5 + $0x750] sm:$0xff]  ;;  %v715_v21 = vld [vmem:[#allocation5 + $0xee0] sm:$0xff] }
  0xec   : > { %3377 = vmatprep.subr.bf16.mxu0 %v3376_v37  ;;  %v483_v37 = vld [vmem:[#allocation5 + $0x7b8] sm:$0xff]  ;;  %v3394_v39 = vpack.c.bf16 %v470_v31, %v464_v29  ;;  %v512_v22 = vld [vmem:[#allocation5 + $0x8a0] sm:$0xff] }
  0xed   : > { %v531_v29 = vld [vmem:[#allocation5 + $0x938] sm:$0xff] }
  0xee   : > { %3059 = vmatpush1.bf16.msra.mxu1 %v3058_v46  ;;  %v3396_v46 = vpack.c.bf16 %v483_v37, %v477_v36  ;;  %v727_v36 = vld [vmem:[#allocation5 + $0xf40] sm:$0xff] }
  0xef   : > { %3379 = vmatpush1.bf16.msra.mxu0 %v3378_v48  ;;  %3061 = vmatprep.subr.bf16.mxu1 %v3060_v49  ;;  %v482_v48 = vld [vmem:[#allocation5 + $0x7b0] sm:$0xff]  ;;  %v686_v49 = vld [vmem:[#allocation5 + $0xdf8] sm:$0xff]  ;;  %v524_v37 = vld [vmem:[#allocation5 + $0x900] sm:$0xff] }
  0xf0   : > { %3381 = vmatprep.subr.bf16.mxu0 %v3380_v53  ;;  %v3078_v53 = vpack.c.bf16 %v679_v43, %v673_v42  ;;  %v3398_v55 = vpack.c.bf16 %v482_v48, %v476_v45  ;;  %v3080_v56 = vpack.c.bf16 %v692_v50, %v686_v49  ;;  %v740_v42 = vld [vmem:[#allocation5 + $0xfa8] sm:$0xff]  ;;  %v543_v45 = vld [vmem:[#allocation5 + $0x998] sm:$0xff]  ;;  %v733_v50 = vld [vmem:[#allocation5 + $0xf70] sm:$0xff] }
  0xf1   : > { %1165 = vmatmul.mubr.f32.vlgmr.msra.gmra.mrb[0].mxu1 %v4631_v34  ;;  %v537_v43 = vld [vmem:[#allocation5 + $0x968] sm:$0xff] }
  0xf2   : > { %3063 = vmatpush1.bf16.msra.mxu1 %v3062_v44  ;;  %1542 = vmatmul.mubr.f32.vlgmr.msra.gmra.mrb[2].mxu0 %v4647_v47  ;;  %v3400_v44 = vpack.c.bf16 %v495_v52, %v489_v51  ;;  %v739_v51 = vld [vmem:[#allocation5 + $0xfa0] sm:$0xff] }
  0xf3   : > { %3383 = vmatpush1.bf16.msra.mxu0 %v3382_v61  ;;  %3065 = vmatprep.subr.bf16.mxu1 %v3064_v63  ;;  %v494_v61 = vld [vmem:[#allocation5 + $0x810] sm:$0xff]  ;;  %v698_v63 = vld [vmem:[#allocation5 + $0xe58] sm:$0xff]  ;;  %v536_v52 = vld [vmem:[#allocation5 + $0x960] sm:$0xff] }
  0xf4   : > { %3385 = vmatprep.subr.bf16.mxu0 %v3384_v3  ;;  %1235 = vmatprep.mubr.f32.mxu1 %v4628_v33  ;;  %v3082_v3 = vpack.c.bf16 %v691_v58, %v685_v57  ;;  %v3402_v4 = vpack.c.bf16 %v494_v61, %v488_v59  ;;  %v3084_v5 = vpack.c.bf16 %v704_v0, %v698_v63  ;;  %v752_v57 = vld [vmem:[#allocation5 + $0x1008] sm:$0xff]  ;;  %v555_v59 = vld [vmem:[#allocation5 + $0x9f8] sm:$0xff]  ;;  %v745_v0 = vld [vmem:[#allocation5 + $0xfd0] sm:$0xff] }
  0xf5   : > { %1612 = vmatprep.mubr.f32.mxu0 %v4662_v9  ;;  %v549_v58 = vld [vmem:[#allocation5 + $0x9c8] sm:$0xff] }
  0xf6   : > { %3067 = vmatpush1.bf16.msra.mxu1 %v3066_v10  ;;  %v3404_v10 = vpack.c.bf16 %v507_v2, %v501_v1  ;;  %v751_v1 = vld [vmem:[#allocation5 + $0x1000] sm:$0xff] }
  0xf7   : > { %3387 = vmatpush1.bf16.msra.mxu0 %v3386_v12  ;;  %3069 = vmatprep.subr.bf16.mxu1 %v3068_v13  ;;  %v506_v12 = vld [vmem:[#allocation5 + $0x870] sm:$0xff]  ;;  %v710_v13 = vld [vmem:[#allocation5 + $0xeb8] sm:$0xff]  ;;  %v548_v2 = vld [vmem:[#allocation5 + $0x9c0] sm:$0xff] }
  0xf8   : > { %3389 = vmatprep.subr.bf16.mxu0 %v3388_v17  ;;  %v3086_v17 = vpack.c.bf16 %v703_v7, %v697_v6  ;;  %v3406_v18 = vpack.c.bf16 %v506_v12, %v500_v8  ;;  %v3088_v19 = vpack.c.bf16 %v716_v14, %v710_v13  ;;  %v764_v6 = vld [vmem:[#allocation5 + $0x1068] sm:$0xff]  ;;  %v567_v8 = vld [vmem:[#allocation5 + $0xa58] sm:$0xff]  ;;  %v757_v14 = vld [vmem:[#allocation5 + $0x1030] sm:$0xff] }
  0xf9   : > { %v561_v7 = vld [vmem:[#allocation5 + $0xa28] sm:$0xff] }
  0xfa   : > { %3071 = vmatpush1.bf16.msra.mxu1 %v3070_v23  ;;  %v3408_v23 = vpack.c.bf16 %v519_v16, %v513_v15  ;;  %v763_v15 = vld [vmem:[#allocation5 + $0x1060] sm:$0xff] }
  0xfb   : > { %3391 = vmatpush1.bf16.msra.mxu0 %v3390_v24  ;;  %3073 = vmatprep.subr.bf16.mxu1 %v3072_v26  ;;  %v518_v24 = vld [vmem:[#allocation5 + $0x8d0] sm:$0xff]  ;;  %v722_v26 = vld [vmem:[#allocation5 + $0xf18] sm:$0xff]  ;;  %v560_v16 = vld [vmem:[#allocation5 + $0xa20] sm:$0xff] }
  0xfc   : > { %3393 = vmatprep.subr.bf16.mxu0 %v3392_v30  ;;  %v3090_v30 = vpack.c.bf16 %v715_v21, %v709_v20  ;;  %v3410_v31 = vpack.c.bf16 %v518_v24, %v512_v22  ;;  %v3092_v32 = vpack.c.bf16 %v728_v27, %v722_v26  ;;  %v776_v20 = vld [vmem:[#allocation5 + $0x10c8] sm:$0xff]  ;;  %v579_v22 = vld [vmem:[#allocation5 + $0xab8] sm:$0xff]  ;;  %v769_v27 = vld [vmem:[#allocation5 + $0x1090] sm:$0xff] }
  0xfd   : > { %v573_v21 = vld [vmem:[#allocation5 + $0xa88] sm:$0xff] }
  0xfe   : > { %3075 = vmatpush1.bf16.msra.mxu1 %v3074_v38  ;;  %v3412_v38 = vpack.c.bf16 %v531_v29, %v525_v28  ;;  %v775_v28 = vld [vmem:[#allocation5 + $0x10c0] sm:$0xff] }
  0xff   : > { %3395 = vmatpush1.bf16.msra.mxu0 %v3394_v39  ;;  %3077 = vmatprep.subr.bf16.mxu1 %v3076_v40  ;;  %v530_v39 = vld [vmem:[#allocation5 + $0x930] sm:$0xff]  ;;  %v734_v40 = vld [vmem:[#allocation5 + $0xf78] sm:$0xff]  ;;  %v572_v29 = vld [vmem:[#allocation5 + $0xa80] sm:$0xff] }
 0x100   : > { %3397 = vmatprep.subr.bf16.mxu0 %v3396_v46  ;;  %v3094_v46 = vpack.c.bf16 %v727_v36, %v721_v35  ;;  %v3414_v48 = vpack.c.bf16 %v530_v39, %v524_v37  ;;  %v3096_v49 = vpack.c.bf16 %v740_v42, %v734_v40  ;;  %v788_v35 = vld [vmem:[#allocation5 + $0x1128] sm:$0xff]  ;;  %v591_v37 = vld [vmem:[#allocation5 + $0xb18] sm:$0xff]  ;;  %v781_v42 = vld [vmem:[#allocation5 + $0x10f0] sm:$0xff] }
 0x101   : > { %v585_v36 = vld [vmem:[#allocation5 + $0xae8] sm:$0xff] }
 0x102   : > { %3079 = vmatpush1.bf16.msra.mxu1 %v3078_v53  ;;  %v3416_v53 = vpack.c.bf16 %v543_v45, %v537_v43  ;;  %v787_v43 = vld [vmem:[#allocation5 + $0x1120] sm:$0xff] }
 0x103   : > { %3399 = vmatpush1.bf16.msra.mxu0 %v3398_v55  ;;  %3081 = vmatprep.subr.bf16.mxu1 %v3080_v56  ;;  %v542_v55 = vld [vmem:[#allocation5 + $0x990] sm:$0xff]  ;;  %v746_v56 = vld [vmem:[#allocation5 + $0xfd8] sm:$0xff]  ;;  %v584_v45 = vld [vmem:[#allocation5 + $0xae0] sm:$0xff] }
 0x104   : > { %3401 = vmatprep.subr.bf16.mxu0 %v3400_v44  ;;  %v3098_v44 = vpack.c.bf16 %v739_v51, %v733_v50  ;;  %v3418_v61 = vpack.c.bf16 %v542_v55, %v536_v52  ;;  %v3100_v63 = vpack.c.bf16 %v752_v57, %v746_v56  ;;  %v800_v50 = vld [vmem:[#allocation5 + $0x1188] sm:$0xff]  ;;  %v603_v52 = vld [vmem:[#allocation5 + $0xb78] sm:$0xff]  ;;  %v793_v57 = vld [vmem:[#allocation5 + $0x1150] sm:$0xff] }
 0x105   : > { %v597_v51 = vld [vmem:[#allocation5 + $0xb48] sm:$0xff] }
 0x106   : > { %3083 = vmatpush1.bf16.msra.mxu1 %v3082_v3  ;;  %v3420_v3 = vpack.c.bf16 %v555_v59, %v549_v58  ;;  %v799_v58 = vld [vmem:[#allocation5 + $0x1180] sm:$0xff] }
 0x107   : > { %3403 = vmatpush1.bf16.msra.mxu0 %v3402_v4  ;;  %3085 = vmatprep.subr.bf16.mxu1 %v3084_v5  ;;  %v554_v4 = vld [vmem:[#allocation5 + $0x9f0] sm:$0xff]  ;;  %v758_v5 = vld [vmem:[#allocation5 + $0x1038] sm:$0xff]  ;;  %v596_v59 = vld [vmem:[#allocation5 + $0xb40] sm:$0xff] }
 0x108   : > { %3405 = vmatprep.subr.bf16.mxu0 %v3404_v10  ;;  %v3102_v10 = vpack.c.bf16 %v751_v1, %v745_v0  ;;  %v3422_v12 = vpack.c.bf16 %v554_v4, %v548_v2  ;;  %v3104_v13 = vpack.c.bf16 %v764_v6, %v758_v5  ;;  %v812_v0 = vld [vmem:[#allocation5 + $0x11e8] sm:$0xff]  ;;  %v615_v2 = vld [vmem:[#allocation5 + $0xbd8] sm:$0xff]  ;;  %v805_v6 = vld [vmem:[#allocation5 + $0x11b0] sm:$0xff] }
 0x109   : > { %v609_v1 = vld [vmem:[#allocation5 + $0xba8] sm:$0xff] }
 0x10a   : > { %3087 = vmatpush1.bf16.msra.mxu1 %v3086_v17  ;;  %v3424_v17 = vpack.c.bf16 %v567_v8, %v561_v7  ;;  %v811_v7 = vld [vmem:[#allocation5 + $0x11e0] sm:$0xff] }
 0x10b   : > { %3407 = vmatpush1.bf16.msra.mxu0 %v3406_v18  ;;  %3089 = vmatprep.subr.bf16.mxu1 %v3088_v19  ;;  %v566_v18 = vld [vmem:[#allocation5 + $0xa50] sm:$0xff]  ;;  %v770_v19 = vld [vmem:[#allocation5 + $0x1098] sm:$0xff]  ;;  %v608_v8 = vld [vmem:[#allocation5 + $0xba0] sm:$0xff] }
 0x10c   : > { %3409 = vmatprep.subr.bf16.mxu0 %v3408_v23  ;;  %v3106_v23 = vpack.c.bf16 %v763_v15, %v757_v14  ;;  %v3426_v24 = vpack.c.bf16 %v566_v18, %v560_v16  ;;  %v3108_v26 = vpack.c.bf16 %v776_v20, %v770_v19  ;;  %v824_v14 = vld [vmem:[#allocation5 + $0x1248] sm:$0xff]  ;;  %v247_v16 = vld [vmem:[#allocation5 + $0x58] sm:$0xff]  ;;  %v817_v20 = vld [vmem:[#allocation5 + $0x1210] sm:$0xff] }
 0x10d   : > { %v241_v15 = vld [vmem:[#allocation5 + $0x28] sm:$0xff] }
 0x10e   : > { %3091 = vmatpush1.bf16.msra.mxu1 %v3090_v30  ;;  %v3428_v30 = vpack.c.bf16 %v579_v22, %v573_v21  ;;  %v823_v21 = vld [vmem:[#allocation5 + $0x1240] sm:$0xff] }
 0x10f   : > { %3411 = vmatpush1.bf16.msra.mxu0 %v3410_v31  ;;  %3093 = vmatprep.subr.bf16.mxu1 %v3092_v32  ;;  %v578_v31 = vld [vmem:[#allocation5 + $0xab0] sm:$0xff]  ;;  %v782_v32 = vld [vmem:[#allocation5 + $0x10f8] sm:$0xff]  ;;  %v240_v22 = vld [vmem:[#allocation5 + $0x20] sm:$0xff] }
 0x110   : > { %3413 = vmatprep.subr.bf16.mxu0 %v3412_v38  ;;  %v3110_v38 = vpack.c.bf16 %v775_v28, %v769_v27  ;;  %v3430_v39 = vpack.c.bf16 %v578_v31, %v572_v29  ;;  %v3112_v40 = vpack.c.bf16 %v788_v35, %v782_v32  ;;  %v836_v27 = vld [vmem:[#allocation5 + $0x12a8] sm:$0xff]  ;;  %v259_v29 = vld [vmem:[#allocation5 + $0xb8] sm:$0xff]  ;;  %v829_v35 = vld [vmem:[#allocation5 + $0x1270] sm:$0xff] }
 0x111   : > { %v253_v28 = vld [vmem:[#allocation5 + $0x88] sm:$0xff] }
 0x112   : > { %3095 = vmatpush1.bf16.msra.mxu1 %v3094_v46  ;;  %v3432_v46 = vpack.c.bf16 %v591_v37, %v585_v36  ;;  %v835_v36 = vld [vmem:[#allocation5 + $0x12a0] sm:$0xff] }
 0x113   : > { %3415 = vmatpush1.bf16.msra.mxu0 %v3414_v48  ;;  %3097 = vmatprep.subr.bf16.mxu1 %v3096_v49  ;;  %v590_v48 = vld [vmem:[#allocation5 + $0xb10] sm:$0xff]  ;;  %v794_v49 = vld [vmem:[#allocation5 + $0x1158] sm:$0xff]  ;;  %v252_v37 = vld [vmem:[#allocation5 + $0x80] sm:$0xff] }
 0x114   : > { %3417 = vmatprep.subr.bf16.mxu0 %v3416_v53  ;;  %v3114_v53 = vpack.c.bf16 %v787_v43, %v781_v42  ;;  %v3434_v55 = vpack.c.bf16 %v590_v48, %v584_v45  ;;  %v3116_v56 = vpack.c.bf16 %v800_v50, %v794_v49  ;;  %v848_v42 = vld [vmem:[#allocation5 + $0x1308] sm:$0xff]  ;;  %v271_v45 = vld [vmem:[#allocation5 + $0x118] sm:$0xff]  ;;  %v841_v50 = vld [vmem:[#allocation5 + $0x12d0] sm:$0xff] }
 0x115   : > { %v265_v43 = vld [vmem:[#allocation5 + $0xe8] sm:$0xff] }
 0x116   : > { %3099 = vmatpush1.bf16.msra.mxu1 %v3098_v44  ;;  %v3436_v44 = vpack.c.bf16 %v603_v52, %v597_v51  ;;  %v847_v51 = vld [vmem:[#allocation5 + $0x1300] sm:$0xff] }
 0x117   : > { %3419 = vmatpush1.bf16.msra.mxu0 %v3418_v61  ;;  %3101 = vmatprep.subr.bf16.mxu1 %v3100_v63  ;;  %v602_v61 = vld [vmem:[#allocation5 + $0xb70] sm:$0xff]  ;;  %v806_v63 = vld [vmem:[#allocation5 + $0x11b8] sm:$0xff]  ;;  %v264_v52 = vld [vmem:[#allocation5 + $0xe0] sm:$0xff] }
 0x118   : > { %3421 = vmatprep.subr.bf16.mxu0 %v3420_v3  ;;  %v3118_v3 = vpack.c.bf16 %v799_v58, %v793_v57  ;;  %v3438_v4 = vpack.c.bf16 %v602_v61, %v596_v59  ;;  %v3120_v5 = vpack.c.bf16 %v812_v0, %v806_v63  ;;  %v860_v57 = vld [vmem:[#allocation5 + $0x1368] sm:$0xff]  ;;  %v283_v59 = vld [vmem:[#allocation5 + $0x178] sm:$0xff]  ;;  %v853_v0 = vld [vmem:[#allocation5 + $0x1330] sm:$0xff] }
 0x119   : > { %v277_v58 = vld [vmem:[#allocation5 + $0x148] sm:$0xff] }
 0x11a   : > { %3103 = vmatpush1.bf16.msra.mxu1 %v3102_v10  ;;  %v3440_v10 = vpack.c.bf16 %v615_v2, %v609_v1  ;;  %v859_v1 = vld [vmem:[#allocation5 + $0x1360] sm:$0xff] }
 0x11b   : > { %3423 = vmatpush1.bf16.msra.mxu0 %v3422_v12  ;;  %3105 = vmatprep.subr.bf16.mxu1 %v3104_v13  ;;  %v614_v12 = vld [vmem:[#allocation5 + $0xbd0] sm:$0xff]  ;;  %v818_v13 = vld [vmem:[#allocation5 + $0x1218] sm:$0xff]  ;;  %v276_v2 = vld [vmem:[#allocation5 + $0x140] sm:$0xff] }
 0x11c   : > { %3425 = vmatprep.subr.bf16.mxu0 %v3424_v17  ;;  %v3122_v17 = vpack.c.bf16 %v811_v7, %v805_v6  ;;  %v3442_v18 = vpack.c.bf16 %v614_v12, %v608_v8  ;;  %v3124_v19 = vpack.c.bf16 %v824_v14, %v818_v13  ;;  %v872_v6 = vld [vmem:[#allocation5 + $0x13c8] sm:$0xff]  ;;  %v3138_v8 = vpack.c.bf16 %v859_v1, %v853_v0  ;;  %v865_v13 = vld [vmem:[#allocation5 + $0x1390] sm:$0xff]  ;;  %v871_v14 = vld [vmem:[#allocation5 + $0x13c0] sm:$0xff] }
 0x11d   : > { %v289_v7 = vld [vmem:[#allocation5 + $0x1a8] sm:$0xff]  ;;  %v343_v1 = vld [vmem:[#allocation5 + $0x358] sm:$0xff] }
 0x11e   : > { %3107 = vmatpush1.bf16.msra.mxu1 %v3106_v23  ;;  %v3572_v23 = vpack.c.bf16 %v247_v16, %v241_v15  ;;  %v288_v15 = vld [vmem:[#allocation5 + $0x1a0] sm:$0xff]  ;;  %v337_v0 = vld [vmem:[#allocation5 + $0x328] sm:$0xff] }
 0x11f   : > { %3427 = vmatpush1.bf16.msra.mxu0 %v3426_v24  ;;  %3109 = vmatprep.subr.bf16.mxu1 %v3108_v26  ;;  %v246_v24 = vld [vmem:[#allocation5 + $0x50] sm:$0xff]  ;;  %v830_v26 = vld [vmem:[#allocation5 + $0x1278] sm:$0xff] }
 0x120   : > { %3429 = vmatprep.subr.bf16.mxu0 %v3428_v30  ;;  %v3126_v30 = vpack.c.bf16 %v823_v21, %v817_v20  ;;  %v3574_v31 = vpack.c.bf16 %v246_v24, %v240_v22  ;;  %v3128_v32 = vpack.c.bf16 %v836_v27, %v830_v26  ;;  %v301_v20 = vld [vmem:[#allocation5 + $0x208] sm:$0xff]  ;;  %v307_v21 = vld [vmem:[#allocation5 + $0x238] sm:$0xff]  ;;  %v3142_v22 = vpack.c.bf16 %v871_v14, %v865_v13  ;;  %v877_v26 = vld [vmem:[#allocation5 + $0x13f0] sm:$0xff] }
 0x121   : > { %v883_v27 = vld [vmem:[#allocation5 + $0x1420] sm:$0xff]  ;;  %v349_v13 = vld [vmem:[#allocation5 + $0x388] sm:$0xff]  ;;  %v355_v14 = vld [vmem:[#allocation5 + $0x3b8] sm:$0xff] }
 0x122   : > { %3111 = vmatpush1.bf16.msra.mxu1 %v3110_v38  ;;  %v3576_v38 = vpack.c.bf16 %v259_v29, %v253_v28  ;;  %v300_v28 = vld [vmem:[#allocation5 + $0x200] sm:$0xff]  ;;  %v3592_v29 = vpack.c.bf16 %v307_v21, %v301_v20  ;;  %v3608_v21 = vpack.c.bf16 %v355_v14, %v349_v13 }
 0x123   : > { %3431 = vmatpush1.bf16.msra.mxu0 %v3430_v39  ;;  %3113 = vmatprep.subr.bf16.mxu1 %v3112_v40  ;;  %v258_v39 = vld [vmem:[#allocation5 + $0xb0] sm:$0xff]  ;;  %v842_v40 = vld [vmem:[#allocation5 + $0x12d8] sm:$0xff]  ;;  %v348_v20 = vld [vmem:[#allocation5 + $0x380] sm:$0xff] }
 0x124   : > { %3433 = vmatprep.subr.bf16.mxu0 %v3432_v46  ;;  %v3130_v46 = vpack.c.bf16 %v835_v36, %v829_v35  ;;  %v3578_v48 = vpack.c.bf16 %v258_v39, %v252_v37  ;;  %v3132_v49 = vpack.c.bf16 %v848_v42, %v842_v40  ;;  %v313_v35 = vld [vmem:[#allocation5 + $0x268] sm:$0xff]  ;;  %v319_v36 = vld [vmem:[#allocation5 + $0x298] sm:$0xff]  ;;  %v3146_v37 = vpack.c.bf16 %v883_v27, %v877_v26  ;;  %v889_v40 = vld [vmem:[#allocation5 + $0x1450] sm:$0xff] }
 0x125   : > { %v895_v42 = vld [vmem:[#allocation5 + $0x1480] sm:$0xff]  ;;  %v361_v26 = vld [vmem:[#allocation5 + $0x3e8] sm:$0xff]  ;;  %v367_v27 = vld [vmem:[#allocation5 + $0x418] sm:$0xff] }
 0x126   : > { %3115 = vmatpush1.bf16.msra.mxu1 %v3114_v53  ;;  %v3580_v53 = vpack.c.bf16 %v271_v45, %v265_v43  ;;  %v312_v43 = vld [vmem:[#allocation5 + $0x260] sm:$0xff]  ;;  %v3596_v45 = vpack.c.bf16 %v319_v36, %v313_v35  ;;  %v3612_v36 = vpack.c.bf16 %v367_v27, %v361_v26 }
 0x127   : > { %3435 = vmatpush1.bf16.msra.mxu0 %v3434_v55  ;;  %3117 = vmatprep.subr.bf16.mxu1 %v3116_v56  ;;  %v270_v55 = vld [vmem:[#allocation5 + $0x110] sm:$0xff]  ;;  %v854_v56 = vld [vmem:[#allocation5 + $0x1338] sm:$0xff]  ;;  %v360_v35 = vld [vmem:[#allocation5 + $0x3e0] sm:$0xff] }
 0x128   : > { %3437 = vmatprep.subr.bf16.mxu0 %v3436_v44  ;;  %v3134_v44 = vpack.c.bf16 %v847_v51, %v841_v50  ;;  %v3582_v61 = vpack.c.bf16 %v270_v55, %v264_v52  ;;  %v3136_v63 = vpack.c.bf16 %v860_v57, %v854_v56  ;;  %v325_v50 = vld [vmem:[#allocation5 + $0x2c8] sm:$0xff]  ;;  %v331_v51 = vld [vmem:[#allocation5 + $0x2f8] sm:$0xff]  ;;  %v3150_v52 = vpack.c.bf16 %v895_v42, %v889_v40  ;;  %v901_v56 = vld [vmem:[#allocation5 + $0x14b0] sm:$0xff] }
 0x129   : > { %v907_v57 = vld [vmem:[#allocation5 + $0x14e0] sm:$0xff]  ;;  %v373_v40 = vld [vmem:[#allocation5 + $0x448] sm:$0xff]  ;;  %v379_v42 = vld [vmem:[#allocation5 + $0x478] sm:$0xff] }
 0x12a   : > { %3119 = vmatpush1.bf16.msra.mxu1 %v3118_v3  ;;  %v3584_v3 = vpack.c.bf16 %v283_v59, %v277_v58  ;;  %v324_v58 = vld [vmem:[#allocation5 + $0x2c0] sm:$0xff]  ;;  %v3600_v59 = vpack.c.bf16 %v331_v51, %v325_v50  ;;  %v3616_v51 = vpack.c.bf16 %v379_v42, %v373_v40 }
 0x12b   : > { %3439 = vmatpush1.bf16.msra.mxu0 %v3438_v4  ;;  %3121 = vmatprep.subr.bf16.mxu1 %v3120_v5  ;;  %v282_v4 = vld [vmem:[#allocation5 + $0x170] sm:$0xff]  ;;  %v866_v5 = vld [vmem:[#allocation5 + $0x1398] sm:$0xff]  ;;  %v372_v50 = vld [vmem:[#allocation5 + $0x440] sm:$0xff] }
 0x12c   : > { %3441 = vmatprep.subr.bf16.mxu0 %v3440_v10  ;;  %v3586_v10 = vpack.c.bf16 %v282_v4, %v276_v2  ;;  %v3140_v12 = vpack.c.bf16 %v872_v6, %v866_v5  ;;  %v3154_v2 = vpack.c.bf16 %v907_v57, %v901_v56  ;;  %v913_v5 = vld [vmem:[#allocation5 + $0x1510] sm:$0xff]  ;;  %v919_v6 = vld [vmem:[#allocation5 + $0x1540] sm:$0xff]  ;;  %v385_v56 = vld [vmem:[#allocation5 + $0x4a8] sm:$0xff] }
 0x12d   : > { %v391_v57 = vld [vmem:[#allocation5 + $0x4d8] sm:$0xff]  ;;  %v396_v13 = vld [vmem:[#allocation5 + $0x500] sm:$0xff] }
 0x12e   : > { %3123 = vmatpush1.bf16.msra.mxu1 %v3122_v17  ;;  %v294_v17 = vld [vmem:[#allocation5 + $0x1d0] sm:$0xff]  ;;  %v408_v26 = vld [vmem:[#allocation5 + $0x560] sm:$0xff] }
 0x12f   : > { %3443 = vmatpush1.bf16.msra.mxu0 %v3442_v18  ;;  %3125 = vmatprep.subr.bf16.mxu1 %v3124_v19  ;;  %v878_v18 = vld [vmem:[#allocation5 + $0x13f8] sm:$0xff]  ;;  %v884_v19 = vld [vmem:[#allocation5 + $0x1428] sm:$0xff]  ;;  %v420_v40 = vld [vmem:[#allocation5 + $0x5c0] sm:$0xff] }
 0x130   : > { %3573 = vmatprep.subr.bf16.mxu0 %v3572_v23  ;;  %v3590_v23 = vpack.c.bf16 %v294_v17, %v288_v15  ;;  %v3144_v24 = vpack.c.bf16 %v884_v19, %v878_v18  ;;  %v3158_v15 = vpack.c.bf16 %v919_v6, %v913_v5  ;;  %v925_v18 = vld [vmem:[#allocation5 + $0x1570] sm:$0xff]  ;;  %v931_v19 = vld [vmem:[#allocation5 + $0x15a0] sm:$0xff]  ;;  %v397_v5 = vld [vmem:[#allocation5 + $0x508] sm:$0xff] }
 0x131   : > { %1236 = vmatmul.mubr.f32.vlgmr.msra.gmra.mrb[2].mxu1 %v4624_v25  ;;  %v403_v6 = vld [vmem:[#allocation5 + $0x538] sm:$0xff] }
 0x132   : > { %3127 = vmatpush1.bf16.msra.mxu1 %v3126_v30  ;;  %1613 = vmatmul.mubr.f32.vlgmr.msra.gmra.mrb[2].mxu0 %v4657_v60  ;;  %v306_v30 = vld [vmem:[#allocation5 + $0x230] sm:$0xff]  ;;  %v3624_v14 = vpack.c.bf16 %v403_v6, %v397_v5  ;;  %v444_v5 = vld [vmem:[#allocation5 + $0x680] sm:$0xff] }
 0x133   : > { %3575 = vmatpush1.bf16.msra.mxu0 %v3574_v31  ;;  %3129 = vmatprep.subr.bf16.mxu1 %v3128_v32  ;;  %v890_v31 = vld [vmem:[#allocation5 + $0x1458] sm:$0xff]  ;;  %v896_v32 = vld [vmem:[#allocation5 + $0x1488] sm:$0xff] }
 0x134   : > { %3577 = vmatprep.subr.bf16.mxu0 %v3576_v38  ;;  %1306 = vmatprep.mubr.f32.mxu1 %v4636_v41  ;;  %v295_v41 = vld [vmem:[#allocation5 + $0x1d8] sm:$0xff]  ;;  %v3594_v38 = vpack.c.bf16 %v306_v30, %v300_v28  ;;  %v3148_v39 = vpack.c.bf16 %v896_v32, %v890_v31  ;;  %v3162_v28 = vpack.c.bf16 %v931_v19, %v925_v18  ;;  %v937_v31 = vld [vmem:[#allocation5 + $0x15d0] sm:$0xff]  ;;  %v943_v32 = vld [vmem:[#allocation5 + $0x1600] sm:$0xff] }
 0x135   : > { %1825 = vmatprep.mubr.f32.mxu0 %v4651_v54  ;;  %v3588_v16 = vpack.c.bf16 %v295_v41, %v289_v7  ;;  %v336_v7 = vld [vmem:[#allocation5 + $0x320] sm:$0xff]  ;;  %v3604_v41 = vpack.c.bf16 %v343_v1, %v337_v0  ;;  %v3620_v1 = vpack.c.bf16 %v391_v57, %v385_v56  ;;  %v409_v18 = vld [vmem:[#allocation5 + $0x568] sm:$0xff]  ;;  %v415_v19 = vld [vmem:[#allocation5 + $0x598] sm:$0xff] }
 0x136   : > { %3131 = vmatpush1.bf16.msra.mxu1 %v3130_v46  ;;  %v318_v46 = vld [vmem:[#allocation5 + $0x290] sm:$0xff]  ;;  %v384_v0 = vld [vmem:[#allocation5 + $0x4a0] sm:$0xff]  ;;  %v3628_v27 = vpack.c.bf16 %v415_v19, %v409_v18 }
 0x137   : > { %3579 = vmatpush1.bf16.msra.mxu0 %v3578_v48  ;;  %3133 = vmatprep.subr.bf16.mxu1 %v3132_v49  ;;  %v902_v48 = vld [vmem:[#allocation5 + $0x14b8] sm:$0xff]  ;;  %v908_v49 = vld [vmem:[#allocation5 + $0x14e8] sm:$0xff]  ;;  %v432_v56 = vld [vmem:[#allocation5 + $0x620] sm:$0xff] }
 0x138   : > { %3581 = vmatprep.subr.bf16.mxu0 %v3580_v53  ;;  %v3598_v53 = vpack.c.bf16 %v318_v46, %v312_v43  ;;  %v3152_v55 = vpack.c.bf16 %v908_v49, %v902_v48  ;;  %v3166_v43 = vpack.c.bf16 %v943_v32, %v937_v31  ;;  %v949_v48 = vld [vmem:[#allocation5 + $0x1630] sm:$0xff]  ;;  %v955_v49 = vld [vmem:[#allocation5 + $0x1660] sm:$0xff]  ;;  %v421_v31 = vld [vmem:[#allocation5 + $0x5c8] sm:$0xff] }
 0x139   : > { %v427_v32 = vld [vmem:[#allocation5 + $0x5f8] sm:$0xff]  ;;  %v456_v18 = vld [vmem:[#allocation5 + $0x6e0] sm:$0xff] }
 0x13a   : > { %3135 = vmatpush1.bf16.msra.mxu1 %v3134_v44  ;;  %v330_v44 = vld [vmem:[#allocation5 + $0x2f0] sm:$0xff]  ;;  %v3632_v42 = vpack.c.bf16 %v427_v32, %v421_v31 }
 0x13b   : > { %3583 = vmatpush1.bf16.msra.mxu0 %v3582_v61  ;;  %3137 = vmatprep.subr.bf16.mxu1 %v3136_v63  ;;  %v914_v61 = vld [vmem:[#allocation5 + $0x1518] sm:$0xff]  ;;  %v920_v63 = vld [vmem:[#allocation5 + $0x1548] sm:$0xff]  ;;  %v474_v32 = vld [vmem:[#allocation5 + $0x770] sm:$0xff] }
 0x13c   : > { %3585 = vmatprep.subr.bf16.mxu0 %v3584_v3  ;;  %v3602_v3 = vpack.c.bf16 %v330_v44, %v324_v58  ;;  %v3156_v4 = vpack.c.bf16 %v920_v63, %v914_v61  ;;  %v3170_v58 = vpack.c.bf16 %v955_v49, %v949_v48  ;;  %v961_v61 = vld [vmem:[#allocation5 + $0x1690] sm:$0xff]  ;;  %v967_v63 = vld [vmem:[#allocation5 + $0x16c0] sm:$0xff]  ;;  %v433_v48 = vld [vmem:[#allocation5 + $0x628] sm:$0xff] }
 0x13d   : > { %v439_v49 = vld [vmem:[#allocation5 + $0x658] sm:$0xff] }
 0x13e   : > { %3139 = vmatpush1.bf16.msra.mxu1 %v3138_v8  ;;  %v342_v8 = vld [vmem:[#allocation5 + $0x350] sm:$0xff]  ;;  %v3636_v57 = vpack.c.bf16 %v439_v49, %v433_v48  ;;  %v688_v49 = vld [vmem:[#allocation5 + $0xe08] sm:$0xff] }
 0x13f   : > { %3587 = vmatpush1.bf16.msra.mxu0 %v3586_v10  ;;  %3141 = vmatprep.subr.bf16.mxu1 %v3140_v12  ;;  %v926_v10 = vld [vmem:[#allocation5 + $0x1578] sm:$0xff]  ;;  %v932_v12 = vld [vmem:[#allocation5 + $0x15a8] sm:$0xff]  ;;  %v486_v48 = vld [vmem:[#allocation5 + $0x7d0] sm:$0xff] }
 0x140   : > { %3589 = vmatprep.subr.bf16.mxu0 %v3588_v16  ;;  %v3606_v16 = vpack.c.bf16 %v342_v8, %v336_v7  ;;  %v3160_v17 = vpack.c.bf16 %v932_v12, %v926_v10  ;;  %v3174_v7 = vpack.c.bf16 %v967_v63, %v961_v61  ;;  %v973_v10 = vld [vmem:[#allocation5 + $0x16f0] sm:$0xff]  ;;  %v979_v12 = vld [vmem:[#allocation5 + $0x1720] sm:$0xff]  ;;  %v445_v61 = vld [vmem:[#allocation5 + $0x688] sm:$0xff] }
 0x141   : > { %v451_v63 = vld [vmem:[#allocation5 + $0x6b8] sm:$0xff] }
 0x142   : > { %3143 = vmatpush1.bf16.msra.mxu1 %v3142_v22  ;;  %v354_v22 = vld [vmem:[#allocation5 + $0x3b0] sm:$0xff]  ;;  %v3640_v6 = vpack.c.bf16 %v451_v63, %v445_v61  ;;  %v700_v63 = vld [vmem:[#allocation5 + $0xe68] sm:$0xff] }
 0x143   : > { %3591 = vmatpush1.bf16.msra.mxu0 %v3590_v23  ;;  %3145 = vmatprep.subr.bf16.mxu1 %v3144_v24  ;;  %v938_v23 = vld [vmem:[#allocation5 + $0x15d8] sm:$0xff]  ;;  %v944_v24 = vld [vmem:[#allocation5 + $0x1608] sm:$0xff]  ;;  %v498_v61 = vld [vmem:[#allocation5 + $0x830] sm:$0xff] }
 0x144   : > { %3593 = vmatprep.subr.bf16.mxu0 %v3592_v29  ;;  %v3610_v29 = vpack.c.bf16 %v354_v22, %v348_v20  ;;  %v3164_v30 = vpack.c.bf16 %v944_v24, %v938_v23  ;;  %v3178_v20 = vpack.c.bf16 %v979_v12, %v973_v10  ;;  %v985_v23 = vld [vmem:[#allocation5 + $0x1750] sm:$0xff]  ;;  %v991_v24 = vld [vmem:[#allocation5 + $0x1780] sm:$0xff]  ;;  %v457_v10 = vld [vmem:[#allocation5 + $0x6e8] sm:$0xff] }
 0x145   : > { %v463_v12 = vld [vmem:[#allocation5 + $0x718] sm:$0xff] }
 0x146   : > { %3147 = vmatpush1.bf16.msra.mxu1 %v3146_v37  ;;  %v366_v37 = vld [vmem:[#allocation5 + $0x410] sm:$0xff]  ;;  %v3644_v19 = vpack.c.bf16 %v463_v12, %v457_v10  ;;  %v712_v12 = vld [vmem:[#allocation5 + $0xec8] sm:$0xff] }
 0x147   : > { %3595 = vmatpush1.bf16.msra.mxu0 %v3594_v38  ;;  %3149 = vmatprep.subr.bf16.mxu1 %v3148_v39  ;;  %v950_v38 = vld [vmem:[#allocation5 + $0x1638] sm:$0xff]  ;;  %v956_v39 = vld [vmem:[#allocation5 + $0x1668] sm:$0xff]  ;;  %v510_v10 = vld [vmem:[#allocation5 + $0x890] sm:$0xff] }
 0x148   : > { %3597 = vmatprep.subr.bf16.mxu0 %v3596_v45  ;;  %v3614_v45 = vpack.c.bf16 %v366_v37, %v360_v35  ;;  %v3168_v46 = vpack.c.bf16 %v956_v39, %v950_v38  ;;  %v3182_v35 = vpack.c.bf16 %v991_v24, %v985_v23  ;;  %v997_v38 = vld [vmem:[#allocation5 + $0x17b0] sm:$0xff]  ;;  %v1003_v39 = vld [vmem:[#allocation5 + $0x17e0] sm:$0xff]  ;;  %v475_v23 = vld [vmem:[#allocation5 + $0x778] sm:$0xff] }
 0x14a   : > { %3151 = vmatpush1.bf16.msra.mxu1 %v3150_v52  ;;  %v378_v52 = vld [vmem:[#allocation5 + $0x470] sm:$0xff] }
 0x14b   : > { %3599 = vmatpush1.bf16.msra.mxu0 %v3598_v53  ;;  %3153 = vmatprep.subr.bf16.mxu1 %v3152_v55  ;;  %v962_v53 = vld [vmem:[#allocation5 + $0x1698] sm:$0xff]  ;;  %v968_v55 = vld [vmem:[#allocation5 + $0x16c8] sm:$0xff] }
 0x14c   : > { %3601 = vmatprep.subr.bf16.mxu0 %v3600_v59  ;;  %v3618_v59 = vpack.c.bf16 %v378_v52, %v372_v50  ;;  %v3172_v44 = vpack.c.bf16 %v968_v55, %v962_v53  ;;  %v3186_v50 = vpack.c.bf16 %v1003_v39, %v997_v38  ;;  %v627_v53 = vld [vmem:[#allocation5 + $0xc20] sm:$0xff]  ;;  %v633_v55 = vld [vmem:[#allocation5 + $0xc50] sm:$0xff] }
 0x14e   : > { %3155 = vmatpush1.bf16.msra.mxu1 %v3154_v2  ;;  %v390_v2 = vld [vmem:[#allocation5 + $0x4d0] sm:$0xff] }
 0x14f   : > { %3603 = vmatpush1.bf16.msra.mxu0 %v3602_v3  ;;  %3157 = vmatprep.subr.bf16.mxu1 %v3156_v4  ;;  %v974_v3 = vld [vmem:[#allocation5 + $0x16f8] sm:$0xff]  ;;  %v980_v4 = vld [vmem:[#allocation5 + $0x1728] sm:$0xff] }
 0x150   : > { %3605 = vmatprep.subr.bf16.mxu0 %v3604_v41  ;;  %v3622_v41 = vpack.c.bf16 %v390_v2, %v384_v0  ;;  %v3176_v8 = vpack.c.bf16 %v980_v4, %v974_v3  ;;  %v3190_v0 = vpack.c.bf16 %v633_v55, %v627_v53  ;;  %v639_v3 = vld [vmem:[#allocation5 + $0xc80] sm:$0xff]  ;;  %v645_v4 = vld [vmem:[#allocation5 + $0xcb0] sm:$0xff] }
 0x152   : > { %3159 = vmatpush1.bf16.msra.mxu1 %v3158_v15  ;;  %v402_v15 = vld [vmem:[#allocation5 + $0x530] sm:$0xff] }
 0x153   : > { %3607 = vmatpush1.bf16.msra.mxu0 %v3606_v16  ;;  %3161 = vmatprep.subr.bf16.mxu1 %v3160_v17  ;;  %v986_v16 = vld [vmem:[#allocation5 + $0x1758] sm:$0xff]  ;;  %v992_v17 = vld [vmem:[#allocation5 + $0x1788] sm:$0xff] }
 0x154   : > { %3609 = vmatprep.subr.bf16.mxu0 %v3608_v21  ;;  %v3626_v21 = vpack.c.bf16 %v402_v15, %v396_v13  ;;  %v3180_v22 = vpack.c.bf16 %v992_v17, %v986_v16  ;;  %v3194_v13 = vpack.c.bf16 %v645_v4, %v639_v3  ;;  %v651_v16 = vld [vmem:[#allocation5 + $0xce0] sm:$0xff]  ;;  %v657_v17 = vld [vmem:[#allocation5 + $0xd10] sm:$0xff] }
 0x155   : > { %v3198_v24 = vpack.c.bf16 %v657_v17, %v651_v16 }
 0x156   : > { %3163 = vmatpush1.bf16.msra.mxu1 %v3162_v28  ;;  %v414_v28 = vld [vmem:[#allocation5 + $0x590] sm:$0xff] }
 0x157   : > { %3611 = vmatpush1.bf16.msra.mxu0 %v3610_v29  ;;  %3165 = vmatprep.subr.bf16.mxu1 %v3164_v30  ;;  %v998_v29 = vld [vmem:[#allocation5 + $0x17b8] sm:$0xff]  ;;  %v1004_v30 = vld [vmem:[#allocation5 + $0x17e8] sm:$0xff] }
 0x158   : > { %3613 = vmatprep.subr.bf16.mxu0 %v3612_v36  ;;  %v3630_v36 = vpack.c.bf16 %v414_v28, %v408_v26  ;;  %v3184_v37 = vpack.c.bf16 %v1004_v30, %v998_v29  ;;  %v663_v28 = vld [vmem:[#allocation5 + $0xd40] sm:$0xff]  ;;  %v669_v29 = vld [vmem:[#allocation5 + $0xd70] sm:$0xff] }
 0x159   : > { %v468_v30 = vld [vmem:[#allocation5 + $0x740] sm:$0xff]  ;;  %v3202_v38 = vpack.c.bf16 %v669_v29, %v663_v28 }
 0x15a   : > { %3167 = vmatpush1.bf16.msra.mxu1 %v3166_v43  ;;  %v426_v43 = vld [vmem:[#allocation5 + $0x5f0] sm:$0xff]  ;;  %v3650_v39 = vpack.c.bf16 %v474_v32, %v468_v30 }
 0x15b   : > { %3615 = vmatpush1.bf16.msra.mxu0 %v3614_v45  ;;  %3169 = vmatprep.subr.bf16.mxu1 %v3168_v46  ;;  %v628_v45 = vld [vmem:[#allocation5 + $0xc28] sm:$0xff]  ;;  %v634_v46 = vld [vmem:[#allocation5 + $0xc58] sm:$0xff]  ;;  %v729_v32 = vld [vmem:[#allocation5 + $0xf50] sm:$0xff] }
 0x15c   : > { %3617 = vmatprep.subr.bf16.mxu0 %v3616_v51  ;;  %v3634_v51 = vpack.c.bf16 %v426_v43, %v420_v40  ;;  %v3188_v52 = vpack.c.bf16 %v634_v46, %v628_v45  ;;  %v681_v43 = vld [vmem:[#allocation5 + $0xdd0] sm:$0xff]  ;;  %v480_v45 = vld [vmem:[#allocation5 + $0x7a0] sm:$0xff] }
 0x15d   : > { %v3654_v55 = vpack.c.bf16 %v486_v48, %v480_v45  ;;  %v741_v48 = vld [vmem:[#allocation5 + $0xfb0] sm:$0xff] }
 0x15e   : > { %3171 = vmatpush1.bf16.msra.mxu1 %v3170_v58  ;;  %v438_v58 = vld [vmem:[#allocation5 + $0x650] sm:$0xff] }
 0x15f   : > { %3619 = vmatpush1.bf16.msra.mxu0 %v3618_v59  ;;  %3173 = vmatprep.subr.bf16.mxu1 %v3172_v44  ;;  %v640_v59 = vld [vmem:[#allocation5 + $0xc88] sm:$0xff]  ;;  %v646_v44 = vld [vmem:[#allocation5 + $0xcb8] sm:$0xff] }
 0x160   : > { %3621 = vmatprep.subr.bf16.mxu0 %v3620_v1  ;;  %v3638_v1 = vpack.c.bf16 %v438_v58, %v432_v56  ;;  %v3192_v2 = vpack.c.bf16 %v646_v44, %v640_v59  ;;  %v693_v58 = vld [vmem:[#allocation5 + $0xe30] sm:$0xff]  ;;  %v492_v59 = vld [vmem:[#allocation5 + $0x800] sm:$0xff] }
 0x161   : > { %v3658_v4 = vpack.c.bf16 %v498_v61, %v492_v59  ;;  %v753_v61 = vld [vmem:[#allocation5 + $0x1010] sm:$0xff] }
 0x162   : > { %3175 = vmatpush1.bf16.msra.mxu1 %v3174_v7  ;;  %v450_v7 = vld [vmem:[#allocation5 + $0x6b0] sm:$0xff] }
 0x163   : > { %3623 = vmatpush1.bf16.msra.mxu0 %v3622_v41  ;;  %3177 = vmatprep.subr.bf16.mxu1 %v3176_v8  ;;  %v652_v41 = vld [vmem:[#allocation5 + $0xce8] sm:$0xff]  ;;  %v658_v8 = vld [vmem:[#allocation5 + $0xd18] sm:$0xff] }
 0x164   : > { %3625 = vmatprep.subr.bf16.mxu0 %v3624_v14  ;;  %v3642_v14 = vpack.c.bf16 %v450_v7, %v444_v5  ;;  %v3196_v15 = vpack.c.bf16 %v658_v8, %v652_v41  ;;  %v705_v7 = vld [vmem:[#allocation5 + $0xe90] sm:$0xff]  ;;  %v504_v41 = vld [vmem:[#allocation5 + $0x860] sm:$0xff] }
 0x165   : > { %v3662_v17 = vpack.c.bf16 %v510_v10, %v504_v41  ;;  %v765_v10 = vld [vmem:[#allocation5 + $0x1070] sm:$0xff] }
 0x166   : > { %3179 = vmatpush1.bf16.msra.mxu1 %v3178_v20  ;;  %v462_v20 = vld [vmem:[#allocation5 + $0x710] sm:$0xff] }
 0x167   : > { %3627 = vmatpush1.bf16.msra.mxu0 %v3626_v21  ;;  %3181 = vmatprep.subr.bf16.mxu1 %v3180_v22  ;;  %v664_v21 = vld [vmem:[#allocation5 + $0xd48] sm:$0xff]  ;;  %v670_v22 = vld [vmem:[#allocation5 + $0xd78] sm:$0xff]  ;;  %v3646_v26 = vpack.c.bf16 %v462_v20, %v456_v18  ;;  %v717_v20 = vld [vmem:[#allocation5 + $0xef0] sm:$0xff] }
 0x168   : > { %3629 = vmatprep.subr.bf16.mxu0 %v3628_v27  ;;  %v3200_v27 = vpack.c.bf16 %v670_v22, %v664_v21  ;;  %v516_v21 = vld [vmem:[#allocation5 + $0x8c0] sm:$0xff] }
 0x16a   : > { %3183 = vmatpush1.bf16.msra.mxu1 %v3182_v35  ;;  %v676_v35 = vld [vmem:[#allocation5 + $0xda8] sm:$0xff] }
 0x16b   : > { %3631 = vmatpush1.bf16.msra.mxu0 %v3630_v36  ;;  %3185 = vmatprep.subr.bf16.mxu1 %v3184_v37  ;;  %v682_v36 = vld [vmem:[#allocation5 + $0xdd8] sm:$0xff]  ;;  %v481_v37 = vld [vmem:[#allocation5 + $0x7a8] sm:$0xff] }
 0x16c   : > { %3633 = vmatprep.subr.bf16.mxu0 %v3632_v42  ;;  %v3204_v40 = vpack.c.bf16 %v682_v36, %v676_v35  ;;  %v675_v42 = vld [vmem:[#allocation5 + $0xda0] sm:$0xff] }
 0x16d   : > { %v3206_v53 = vpack.c.bf16 %v681_v43, %v675_v42  ;;  %v528_v35 = vld [vmem:[#allocation5 + $0x920] sm:$0xff] }
 0x16e   : > { %3187 = vmatpush1.bf16.msra.mxu1 %v3186_v50  ;;  %v694_v50 = vld [vmem:[#allocation5 + $0xe38] sm:$0xff] }
 0x16f   : > { %3635 = vmatpush1.bf16.msra.mxu0 %v3634_v51  ;;  %3189 = vmatprep.subr.bf16.mxu1 %v3188_v52  ;;  %v493_v51 = vld [vmem:[#allocation5 + $0x808] sm:$0xff]  ;;  %v499_v52 = vld [vmem:[#allocation5 + $0x838] sm:$0xff]  ;;  %v3208_v56 = vpack.c.bf16 %v694_v50, %v688_v49  ;;  %v540_v49 = vld [vmem:[#allocation5 + $0x980] sm:$0xff] }
 0x170   : > { %3637 = vmatprep.subr.bf16.mxu0 %v3636_v57  ;;  %v687_v57 = vld [vmem:[#allocation5 + $0xe00] sm:$0xff]  ;;  %v3656_v44 = vpack.c.bf16 %v499_v52, %v493_v51  ;;  %v546_v51 = vld [vmem:[#allocation5 + $0x9b0] sm:$0xff]  ;;  %v748_v52 = vld [vmem:[#allocation5 + $0xfe8] sm:$0xff] }
 0x171   : > { %1307 = vmatmul.mubr.f32.vlgmr.msra.gmra.mrb[2].mxu1 %v4631_v34  ;;  %v469_v34 = vld [vmem:[#allocation5 + $0x748] sm:$0xff]  ;;  %v3210_v3 = vpack.c.bf16 %v693_v58, %v687_v57  ;;  %v3674_v58 = vpack.c.bf16 %v546_v51, %v540_v49  ;;  %v801_v51 = vld [vmem:[#allocation5 + $0x1190] sm:$0xff] }
 0x172   : > { %3191 = vmatpush1.bf16.msra.mxu1 %v3190_v0  ;;  %1826 = vmatmul.mubr.f32.vlgmr.msra.gmra.mrb[0].mxu0 %v4647_v47  ;;  %v3648_v31 = vpack.c.bf16 %v475_v23, %v469_v34  ;;  %v706_v0 = vld [vmem:[#allocation5 + $0xe98] sm:$0xff]  ;;  %v522_v34 = vld [vmem:[#allocation5 + $0x8f0] sm:$0xff]  ;;  %v724_v23 = vld [vmem:[#allocation5 + $0xf28] sm:$0xff] }
 0x173   : > { %3639 = vmatpush1.bf16.msra.mxu0 %v3638_v1  ;;  %3193 = vmatprep.subr.bf16.mxu1 %v3192_v2  ;;  %v505_v1 = vld [vmem:[#allocation5 + $0x868] sm:$0xff]  ;;  %v511_v2 = vld [vmem:[#allocation5 + $0x898] sm:$0xff]  ;;  %v3212_v5 = vpack.c.bf16 %v706_v0, %v700_v63  ;;  %v3666_v29 = vpack.c.bf16 %v522_v34, %v516_v21  ;;  %v552_v63 = vld [vmem:[#allocation5 + $0x9e0] sm:$0xff] }
 0x174   : > { %3641 = vmatprep.subr.bf16.mxu0 %v3640_v6  ;;  %1377 = vmatprep.mubr.f32.mxu1 %v4628_v33  ;;  %v487_v33 = vld [vmem:[#allocation5 + $0x7d8] sm:$0xff]  ;;  %v699_v6 = vld [vmem:[#allocation5 + $0xe60] sm:$0xff]  ;;  %v3660_v8 = vpack.c.bf16 %v511_v2, %v505_v1  ;;  %v558_v1 = vld [vmem:[#allocation5 + $0xa10] sm:$0xff] }
 0x175   : > { %1896 = vmatprep.mubr.f32.mxu0 %v4662_v9  ;;  %v3652_v46 = vpack.c.bf16 %v487_v33, %v481_v37  ;;  %v3214_v16 = vpack.c.bf16 %v705_v7, %v699_v6  ;;  %v534_v37 = vld [vmem:[#allocation5 + $0x950] sm:$0xff]  ;;  %v736_v33 = vld [vmem:[#allocation5 + $0xf88] sm:$0xff]  ;;  %v3678_v7 = vpack.c.bf16 %v558_v1, %v552_v63 }
 0x176   : > { %3195 = vmatpush1.bf16.msra.mxu1 %v3194_v13  ;;  %v718_v13 = vld [vmem:[#allocation5 + $0xef8] sm:$0xff]  ;;  %v3670_v43 = vpack.c.bf16 %v534_v37, %v528_v35  ;;  %v760_v2 = vld [vmem:[#allocation5 + $0x1048] sm:$0xff]  ;;  %v777_v34 = vld [vmem:[#allocation5 + $0x10d0] sm:$0xff] }
 0x177   : > { %3643 = vmatpush1.bf16.msra.mxu0 %v3642_v14  ;;  %3197 = vmatprep.subr.bf16.mxu1 %v3196_v15  ;;  %v517_v14 = vld [vmem:[#allocation5 + $0x8c8] sm:$0xff]  ;;  %v523_v15 = vld [vmem:[#allocation5 + $0x8f8] sm:$0xff]  ;;  %v3216_v18 = vpack.c.bf16 %v718_v13, %v712_v12  ;;  %v564_v12 = vld [vmem:[#allocation5 + $0xa40] sm:$0xff] }
 0x178   : > { %3645 = vmatprep.subr.bf16.mxu0 %v3644_v19  ;;  %v711_v19 = vld [vmem:[#allocation5 + $0xec0] sm:$0xff]  ;;  %v3664_v22 = vpack.c.bf16 %v523_v15, %v517_v14  ;;  %v570_v14 = vld [vmem:[#allocation5 + $0xa70] sm:$0xff]  ;;  %v772_v15 = vld [vmem:[#allocation5 + $0x10a8] sm:$0xff] }
 0x179   : > { %v3218_v28 = vpack.c.bf16 %v717_v20, %v711_v19  ;;  %v3682_v20 = vpack.c.bf16 %v570_v14, %v564_v12  ;;  %v789_v37 = vld [vmem:[#allocation5 + $0x1130] sm:$0xff] }
 0x17a   : > { %3199 = vmatpush1.bf16.msra.mxu1 %v3198_v24  ;;  %v730_v24 = vld [vmem:[#allocation5 + $0xf58] sm:$0xff]  ;;  %v813_v1 = vld [vmem:[#allocation5 + $0x11f0] sm:$0xff] }
 0x17b   : > { %3647 = vmatpush1.bf16.msra.mxu0 %v3646_v26  ;;  %3201 = vmatprep.subr.bf16.mxu1 %v3200_v27  ;;  %v529_v26 = vld [vmem:[#allocation5 + $0x928] sm:$0xff]  ;;  %v535_v27 = vld [vmem:[#allocation5 + $0x958] sm:$0xff]  ;;  %v3220_v30 = vpack.c.bf16 %v730_v24, %v724_v23  ;;  %v576_v23 = vld [vmem:[#allocation5 + $0xaa0] sm:$0xff] }
 0x17c   : > { %3649 = vmatprep.subr.bf16.mxu0 %v3648_v31  ;;  %v723_v31 = vld [vmem:[#allocation5 + $0xf20] sm:$0xff]  ;;  %v3668_v36 = vpack.c.bf16 %v535_v27, %v529_v26  ;;  %v582_v26 = vld [vmem:[#allocation5 + $0xad0] sm:$0xff]  ;;  %v784_v27 = vld [vmem:[#allocation5 + $0x1108] sm:$0xff] }
 0x17d   : > { %v3222_v42 = vpack.c.bf16 %v729_v32, %v723_v31  ;;  %v3686_v32 = vpack.c.bf16 %v582_v26, %v576_v23  ;;  %v238_v14 = vld [vmem:[#allocation5 + $0x10] sm:$0xff] }
 0x17e   : > { %3203 = vmatpush1.bf16.msra.mxu1 %v3202_v38  ;;  %v742_v38 = vld [vmem:[#allocation5 + $0xfb8] sm:$0xff] }
 0x17f   : > { %3651 = vmatpush1.bf16.msra.mxu0 %v3650_v39  ;;  %3205 = vmatprep.subr.bf16.mxu1 %v3204_v40  ;;  %v541_v39 = vld [vmem:[#allocation5 + $0x988] sm:$0xff]  ;;  %v547_v40 = vld [vmem:[#allocation5 + $0x9b8] sm:$0xff]  ;;  %v3224_v45 = vpack.c.bf16 %v742_v38, %v736_v33  ;;  %v588_v33 = vld [vmem:[#allocation5 + $0xb00] sm:$0xff] }
 0x180   : > { %3653 = vmatprep.subr.bf16.mxu0 %v3652_v46  ;;  %v735_v46 = vld [vmem:[#allocation5 + $0xf80] sm:$0xff]  ;;  %v3672_v50 = vpack.c.bf16 %v547_v40, %v541_v39  ;;  %v594_v39 = vld [vmem:[#allocation5 + $0xb30] sm:$0xff]  ;;  %v796_v40 = vld [vmem:[#allocation5 + $0x1168] sm:$0xff] }
 0x181   : > { %v3226_v57 = vpack.c.bf16 %v741_v48, %v735_v46  ;;  %v3690_v48 = vpack.c.bf16 %v594_v39, %v588_v33 }
 0x182   : > { %3207 = vmatpush1.bf16.msra.mxu1 %v3206_v53  ;;  %v754_v53 = vld [vmem:[#allocation5 + $0x1018] sm:$0xff] }
 0x183   : > { %3655 = vmatpush1.bf16.msra.mxu0 %v3654_v55  ;;  %3209 = vmatprep.subr.bf16.mxu1 %v3208_v56  ;;  %v553_v55 = vld [vmem:[#allocation5 + $0x9e8] sm:$0xff]  ;;  %v559_v56 = vld [vmem:[#allocation5 + $0xa18] sm:$0xff]  ;;  %v3228_v59 = vpack.c.bf16 %v754_v53, %v748_v52  ;;  %v600_v52 = vld [vmem:[#allocation5 + $0xb60] sm:$0xff] }
 0x184   : > { %3657 = vmatprep.subr.bf16.mxu0 %v3656_v44  ;;  %v747_v44 = vld [vmem:[#allocation5 + $0xfe0] sm:$0xff]  ;;  %v3676_v0 = vpack.c.bf16 %v559_v56, %v553_v55  ;;  %v606_v55 = vld [vmem:[#allocation5 + $0xb90] sm:$0xff]  ;;  %v808_v56 = vld [vmem:[#allocation5 + $0x11c8] sm:$0xff] }
 0x185   : > { %v3230_v6 = vpack.c.bf16 %v753_v61, %v747_v44  ;;  %v3694_v61 = vpack.c.bf16 %v606_v55, %v600_v52 }
 0x186   : > { %3211 = vmatpush1.bf16.msra.mxu1 %v3210_v3  ;;  %v766_v3 = vld [vmem:[#allocation5 + $0x1078] sm:$0xff] }
 0x187   : > { %3659 = vmatpush1.bf16.msra.mxu0 %v3658_v4  ;;  %3213 = vmatprep.subr.bf16.mxu1 %v3212_v5  ;;  %v565_v4 = vld [vmem:[#allocation5 + $0xa48] sm:$0xff]  ;;  %v571_v5 = vld [vmem:[#allocation5 + $0xa78] sm:$0xff]  ;;  %v3232_v41 = vpack.c.bf16 %v766_v3, %v760_v2  ;;  %v612_v2 = vld [vmem:[#allocation5 + $0xbc0] sm:$0xff] }
 0x188   : > { %3661 = vmatprep.subr.bf16.mxu0 %v3660_v8  ;;  %v759_v8 = vld [vmem:[#allocation5 + $0x1040] sm:$0xff]  ;;  %v3680_v13 = vpack.c.bf16 %v571_v5, %v565_v4  ;;  %v618_v4 = vld [vmem:[#allocation5 + $0xbf0] sm:$0xff]  ;;  %v239_v5 = vld [vmem:[#allocation5 + $0x18] sm:$0xff] }
 0x189   : > { %v3234_v19 = vpack.c.bf16 %v765_v10, %v759_v8  ;;  %v4676_v10 = vld [vmem:[%s4607_s4 + $0x10] sm:$0xff]  ;;  %v3698_v12 = vpack.c.bf16 %v618_v4, %v612_v2  ;;  %v286_v4 = vld [vmem:[#allocation5 + $0x190] sm:$0xff] }
 0x18a   : > { %3215 = vmatpush1.bf16.msra.mxu1 %v3214_v16  ;;  %v778_v16 = vld [vmem:[#allocation5 + $0x10d8] sm:$0xff] }
 0x18b   : > { %3663 = vmatpush1.bf16.msra.mxu0 %v3662_v17  ;;  %3217 = vmatprep.subr.bf16.mxu1 %v3216_v18  ;;  %v577_v17 = vld [vmem:[#allocation5 + $0xaa8] sm:$0xff]  ;;  %v583_v18 = vld [vmem:[#allocation5 + $0xad8] sm:$0xff]  ;;  %v3236_v21 = vpack.c.bf16 %v778_v16, %v772_v15  ;;  %v244_v15 = vld [vmem:[#allocation5 + $0x40] sm:$0xff] }
 0x18c   : > { %3665 = vmatprep.subr.bf16.mxu0 %v3664_v22  ;;  %v771_v22 = vld [vmem:[#allocation5 + $0x10a0] sm:$0xff]  ;;  %v3684_v24 = vpack.c.bf16 %v583_v18, %v577_v17  ;;  %v1912_v18 = vld [vmem:[#allocation5 + $0x1830] sm:$0xff]  ;;  %v3446_v23 = vpack.c.bf16 %v244_v15, %v238_v14  ;;  %v1973_v14 = vld [vmem:[#allocation5 + $0x1a18] sm:$0xff] }
 0x18d   : > { %v3238_v31 = vpack.c.bf16 %v777_v34, %v771_v22  ;;  %v1906_v16 = vld [vmem:[#allocation5 + $0x1800] sm:$0xff]  ;;  %v1925_v22 = vld [vmem:[#allocation5 + $0x1898] sm:$0xff]  ;;  %v4680_v34 = vrot.slane %v4676_v10, %v4620_v11 }
 0x18e   : > { %3219 = vmatpush1.bf16.msra.mxu1 %v3218_v28  ;;  %v790_v28 = vld [vmem:[#allocation5 + $0x1138] sm:$0xff] }
 0x18f   : > { %3667 = vmatpush1.bf16.msra.mxu0 %v3666_v29  ;;  %3221 = vmatprep.subr.bf16.mxu1 %v3220_v30  ;;  %v589_v29 = vld [vmem:[#allocation5 + $0xb08] sm:$0xff]  ;;  %v595_v30 = vld [vmem:[#allocation5 + $0xb38] sm:$0xff]  ;;  %v3240_v35 = vpack.c.bf16 %v790_v28, %v784_v27  ;;  %v250_v27 = vld [vmem:[#allocation5 + $0x70] sm:$0xff]  ;;  %v4685_v33 = vcombine.high %v4680_v34, %v4680_v34 }
 0x190   : > { %3669 = vmatprep.subr.bf16.mxu0 %v3668_v36  ;;  %v783_v36 = vld [vmem:[#allocation5 + $0x1100] sm:$0xff]  ;;  %v3688_v38 = vpack.c.bf16 %v595_v30, %v589_v29 }
 0x191   : > { %v3242_v46 = vpack.c.bf16 %v789_v37, %v783_v36  ;;  %v256_v28 = vld [vmem:[#allocation5 + $0xa0] sm:$0xff]  ;;  %v1931_v36 = vld [vmem:[#allocation5 + $0x18c8] sm:$0xff]  ;;  %v1937_v37 = vld [vmem:[#allocation5 + $0x18f8] sm:$0xff] }
 0x192   : > { %3223 = vmatpush1.bf16.msra.mxu1 %v3222_v42  ;;  %v802_v42 = vld [vmem:[#allocation5 + $0x1198] sm:$0xff]  ;;  %v1918_v29 = vld [vmem:[#allocation5 + $0x1860] sm:$0xff] }
 0x193   : > { %3671 = vmatpush1.bf16.msra.mxu0 %v3670_v43  ;;  %3225 = vmatprep.subr.bf16.mxu1 %v3224_v45  ;;  %v601_v43 = vld [vmem:[#allocation5 + $0xb68] sm:$0xff]  ;;  %v607_v45 = vld [vmem:[#allocation5 + $0xb98] sm:$0xff]  ;;  %v3244_v49 = vpack.c.bf16 %v802_v42, %v796_v40  ;;  %v262_v42 = vld [vmem:[#allocation5 + $0xd0] sm:$0xff] }
 0x194   : > { %3673 = vmatprep.subr.bf16.mxu0 %v3672_v50  ;;  %v795_v50 = vld [vmem:[#allocation5 + $0x1160] sm:$0xff]  ;;  %v3692_v53 = vpack.c.bf16 %v607_v45, %v601_v43 }
 0x195   : > { %v3246_v44 = vpack.c.bf16 %v801_v51, %v795_v50  ;;  %v268_v43 = vld [vmem:[#allocation5 + $0x100] sm:$0xff]  ;;  %v1943_v50 = vld [vmem:[#allocation5 + $0x1928] sm:$0xff]  ;;  %v1949_v51 = vld [vmem:[#allocation5 + $0x1958] sm:$0xff] }
 0x196   : > { %3227 = vmatpush1.bf16.msra.mxu1 %v3226_v57  ;;  %v814_v57 = vld [vmem:[#allocation5 + $0x11f8] sm:$0xff]  ;;  %v1930_v45 = vld [vmem:[#allocation5 + $0x18c0] sm:$0xff]  ;;  %v3454_v52 = vpack.c.bf16 %v268_v43, %v262_v42  ;;  %v1991_v43 = vld [vmem:[#allocation5 + $0x1aa8] sm:$0xff] }
 0x197   : > { %3675 = vmatpush1.bf16.msra.mxu0 %v3674_v58  ;;  %3229 = vmatprep.subr.bf16.mxu1 %v3228_v59  ;;  %v613_v58 = vld [vmem:[#allocation5 + $0xbc8] sm:$0xff]  ;;  %v619_v59 = vld [vmem:[#allocation5 + $0xbf8] sm:$0xff]  ;;  %v3248_v63 = vpack.c.bf16 %v814_v57, %v808_v56  ;;  %v274_v56 = vld [vmem:[#allocation5 + $0x130] sm:$0xff] }
 0x198   : > { %3677 = vmatprep.subr.bf16.mxu0 %v3676_v0  ;;  %v807_v0 = vld [vmem:[#allocation5 + $0x11c0] sm:$0xff]  ;;  %v3696_v3 = vpack.c.bf16 %v619_v59, %v613_v58  ;;  %v3712_v59 = vpack.c.bf16 %v1949_v51, %v1943_v50 }
 0x199   : > { %v3250_v8 = vpack.c.bf16 %v813_v1, %v807_v0  ;;  %v280_v57 = vld [vmem:[#allocation5 + $0x160] sm:$0xff]  ;;  %v1955_v0 = vld [vmem:[#allocation5 + $0x1988] sm:$0xff] }
 0x19a   : > { %3231 = vmatpush1.bf16.msra.mxu1 %v3230_v6  ;;  %v245_v6 = vld [vmem:[#allocation5 + $0x48] sm:$0xff]  ;;  %v1942_v58 = vld [vmem:[#allocation5 + $0x1920] sm:$0xff]  ;;  %v3458_v1 = vpack.c.bf16 %v280_v57, %v274_v56 }
 0x19b   : > { %3679 = vmatpush1.bf16.msra.mxu0 %v3678_v7  ;;  %3233 = vmatprep.subr.bf16.mxu1 %v3232_v41  ;;  %v1907_v7 = vld [vmem:[#allocation5 + $0x1808] sm:$0xff]  ;;  %v1913_v41 = vld [vmem:[#allocation5 + $0x1838] sm:$0xff]  ;;  %v328_v50 = vld [vmem:[#allocation5 + $0x2e0] sm:$0xff] }
 0x19c   : > { %3681 = vmatprep.subr.bf16.mxu0 %v3680_v13  ;;  %v3444_v13 = vpack.c.bf16 %v245_v6, %v239_v5  ;;  %v3700_v17 = vpack.c.bf16 %v1913_v41, %v1907_v7  ;;  %v292_v5 = vld [vmem:[#allocation5 + $0x1c0] sm:$0xff]  ;;  %v1960_v41 = vld [vmem:[#allocation5 + $0x19b0] sm:$0xff]  ;;  %v341_v56 = vld [vmem:[#allocation5 + $0x348] sm:$0xff] }
 0x19d   : > { %v1954_v6 = vld [vmem:[#allocation5 + $0x1980] sm:$0xff]  ;;  %v3462_v15 = vpack.c.bf16 %v292_v5, %v286_v4  ;;  %v2003_v57 = vld [vmem:[#allocation5 + $0x1b08] sm:$0xff] }
 0x19e   : > { %3235 = vmatpush1.bf16.msra.mxu1 %v3234_v19  ;;  %v251_v19 = vld [vmem:[#allocation5 + $0x78] sm:$0xff]  ;;  %v1990_v51 = vld [vmem:[#allocation5 + $0x1aa0] sm:$0xff]  ;;  %v353_v4 = vld [vmem:[#allocation5 + $0x3a8] sm:$0xff] }
 0x19f   : > { %3683 = vmatpush1.bf16.msra.mxu0 %v3682_v20  ;;  %3237 = vmatprep.subr.bf16.mxu1 %v3236_v21  ;;  %v257_v20 = vld [vmem:[#allocation5 + $0xa8] sm:$0xff] }
 0x1a0   : > { %3685 = vmatprep.subr.bf16.mxu0 %v3684_v24  ;;  %v1919_v21 = vld [vmem:[#allocation5 + $0x1868] sm:$0xff]  ;;  %v3702_v24 = vpack.c.bf16 %v1912_v18, %v1906_v16  ;;  %v3448_v26 = vpack.c.bf16 %v257_v20, %v251_v19  ;;  %v3718_v16 = vpack.c.bf16 %v1960_v41, %v1954_v6  ;;  %v298_v18 = vld [vmem:[#allocation5 + $0x1f0] sm:$0xff]  ;;  %v304_v19 = vld [vmem:[#allocation5 + $0x220] sm:$0xff] }
 0x1a1   : > { %v3704_v30 = vpack.c.bf16 %v1925_v22, %v1919_v21  ;;  %v1966_v20 = vld [vmem:[#allocation5 + $0x19e0] sm:$0xff]  ;;  %v1972_v22 = vld [vmem:[#allocation5 + $0x1a10] sm:$0xff]  ;;  %v2015_v5 = vld [vmem:[#allocation5 + $0x1b68] sm:$0xff] }
 0x1a2   : > { %3239 = vmatpush1.bf16.msra.mxu1 %v3238_v31  ;;  %v1924_v31 = vld [vmem:[#allocation5 + $0x1890] sm:$0xff]  ;;  %v2021_v6 = vld [vmem:[#allocation5 + $0x1b98] sm:$0xff] }
 0x1a3   : > { %3687 = vmatpush1.bf16.msra.mxu0 %v3686_v32  ;;  %3241 = vmatprep.subr.bf16.mxu1 %v3240_v35  ;;  %v263_v32 = vld [vmem:[#allocation5 + $0xd8] sm:$0xff]  ;;  %v269_v35 = vld [vmem:[#allocation5 + $0x108] sm:$0xff]  ;;  %v3706_v39 = vpack.c.bf16 %v1924_v31, %v1918_v29  ;;  %v3722_v29 = vpack.c.bf16 %v1972_v22, %v1966_v20  ;;  %v310_v31 = vld [vmem:[#allocation5 + $0x250] sm:$0xff] }
 0x1a4   : > { %3689 = vmatprep.subr.bf16.mxu0 %v3688_v38  ;;  %v3450_v38 = vpack.c.bf16 %v256_v28, %v250_v27  ;;  %v3452_v40 = vpack.c.bf16 %v269_v35, %v263_v32  ;;  %v1985_v27 = vld [vmem:[#allocation5 + $0x1a78] sm:$0xff]  ;;  %v3466_v28 = vpack.c.bf16 %v304_v19, %v298_v18  ;;  %v316_v32 = vld [vmem:[#allocation5 + $0x280] sm:$0xff]  ;;  %v365_v18 = vld [vmem:[#allocation5 + $0x408] sm:$0xff] }
 0x1a5   : > { %v1978_v35 = vld [vmem:[#allocation5 + $0x1a40] sm:$0xff]  ;;  %v2027_v19 = vld [vmem:[#allocation5 + $0x1bc8] sm:$0xff]  ;;  %v2033_v20 = vld [vmem:[#allocation5 + $0x1bf8] sm:$0xff] }
 0x1a6   : > { %3243 = vmatpush1.bf16.msra.mxu1 %v3242_v46  ;;  %v3708_v46 = vpack.c.bf16 %v1937_v37, %v1931_v36 }
 0x1a7   : > { %3691 = vmatpush1.bf16.msra.mxu0 %v3690_v48  ;;  %3245 = vmatprep.subr.bf16.mxu1 %v3244_v49  ;;  %v275_v48 = vld [vmem:[#allocation5 + $0x138] sm:$0xff]  ;;  %v281_v49 = vld [vmem:[#allocation5 + $0x168] sm:$0xff] }
 0x1a8   : > { %3693 = vmatprep.subr.bf16.mxu0 %v3692_v53  ;;  %v3456_v55 = vpack.c.bf16 %v281_v49, %v275_v48  ;;  %v322_v49 = vld [vmem:[#allocation5 + $0x2b0] sm:$0xff] }
 0x1aa   : > { %3247 = vmatpush1.bf16.msra.mxu1 %v3246_v44  ;;  %v1948_v44 = vld [vmem:[#allocation5 + $0x1950] sm:$0xff] }
 0x1ab   : > { %3695 = vmatpush1.bf16.msra.mxu0 %v3694_v61  ;;  %3249 = vmatprep.subr.bf16.mxu1 %v3248_v63  ;;  %v287_v61 = vld [vmem:[#allocation5 + $0x198] sm:$0xff]  ;;  %v293_v63 = vld [vmem:[#allocation5 + $0x1c8] sm:$0xff]  ;;  %v3714_v2 = vpack.c.bf16 %v1948_v44, %v1942_v58 }
 0x1ac   : > { %3697 = vmatprep.subr.bf16.mxu0 %v3696_v3  ;;  %v3460_v3 = vpack.c.bf16 %v293_v63, %v287_v61  ;;  %v2009_v58 = vld [vmem:[#allocation5 + $0x1b38] sm:$0xff]  ;;  %v334_v63 = vld [vmem:[#allocation5 + $0x310] sm:$0xff] }
 0x1ae   : > { %3251 = vmatpush1.bf16.msra.mxu1 %v3250_v8  ;;  %v299_v8 = vld [vmem:[#allocation5 + $0x1f8] sm:$0xff] }
 0x1af   : > { %3699 = vmatpush1.bf16.msra.mxu0 %v3698_v12  ;;  %3445 = vmatprep.subr.bf16.mxu1 %v3444_v13  ;;  %v305_v12 = vld [vmem:[#allocation5 + $0x228] sm:$0xff] }
 0x1b0   : > { %3701 = vmatprep.subr.bf16.mxu0 %v3700_v17  ;;  %v1967_v13 = vld [vmem:[#allocation5 + $0x19e8] sm:$0xff]  ;;  %v3464_v17 = vpack.c.bf16 %v305_v12, %v299_v8  ;;  %v346_v12 = vld [vmem:[#allocation5 + $0x370] sm:$0xff] }
 0x1b1   : > { %1378 = vmatmul.mubr.f32.vlgmr.msra.gmra.mrb[4].mxu1 %v4624_v25  ;;  %v1936_v25 = vld [vmem:[#allocation5 + $0x18f0] sm:$0xff]  ;;  %v3720_v21 = vpack.c.bf16 %v1973_v14, %v1967_v13  ;;  %v352_v13 = vld [vmem:[#allocation5 + $0x3a0] sm:$0xff] }
 0x1b2   : > { %3447 = vmatpush1.bf16.msra.mxu1 %v3446_v23  ;;  %1897 = vmatmul.mubr.f32.vlgmr.msra.gmra.mrb[0].mxu0 %v4657_v60  ;;  %v3710_v53 = vpack.c.bf16 %v1936_v25, %v1930_v45  ;;  %v311_v23 = vld [vmem:[#allocation5 + $0x258] sm:$0xff]  ;;  %v2014_v14 = vld [vmem:[#allocation5 + $0x1b60] sm:$0xff] }
 0x1b3   : > { %3703 = vmatpush1.bf16.msra.mxu0 %v3702_v24  ;;  %3449 = vmatprep.subr.bf16.mxu1 %v3448_v26  ;;  %v317_v24 = vld [vmem:[#allocation5 + $0x288] sm:$0xff]  ;;  %v1997_v45 = vld [vmem:[#allocation5 + $0x1ad8] sm:$0xff] }
 0x1b4   : > { %3705 = vmatprep.subr.bf16.mxu0 %v3704_v30  ;;  %1683 = vmatprep.mubr.f32.mxu1 %v4651_v54  ;;  %v1961_v54 = vld [vmem:[#allocation5 + $0x19b8] sm:$0xff]  ;;  %v1979_v26 = vld [vmem:[#allocation5 + $0x1a48] sm:$0xff]  ;;  %v3468_v30 = vpack.c.bf16 %v317_v24, %v311_v23  ;;  %v358_v24 = vld [vmem:[#allocation5 + $0x3d0] sm:$0xff] }
 0x1b5   : > { %2376 = vmatprep.mubr.f32.mxu0 %v4685_v33  ;;  %v3716_v7 = vpack.c.bf16 %v1961_v54, %v1955_v0  ;;  %v3724_v37 = vpack.c.bf16 %v1985_v27, %v1979_v26  ;;  %v340_v0 = vld [vmem:[#allocation5 + $0x340] sm:$0xff] }
 0x1b6   : > { %3451 = vmatpush1.bf16.msra.mxu1 %v3450_v38  ;;  %v1984_v38 = vld [vmem:[#allocation5 + $0x1a70] sm:$0xff]  ;;  %v2002_v54 = vld [vmem:[#allocation5 + $0x1b00] sm:$0xff] }
 0x1b7   : > { %3707 = vmatpush1.bf16.msra.mxu0 %v3706_v39  ;;  %3453 = vmatprep.subr.bf16.mxu1 %v3452_v40  ;;  %v323_v39 = vld [vmem:[#allocation5 + $0x2b8] sm:$0xff]  ;;  %v329_v40 = vld [vmem:[#allocation5 + $0x2e8] sm:$0xff]  ;;  %v3726_v25 = vpack.c.bf16 %v1984_v38, %v1978_v35  ;;  %v364_v26 = vld [vmem:[#allocation5 + $0x400] sm:$0xff] }
 0x1b8   : > { %3709 = vmatprep.subr.bf16.mxu0 %v3708_v46  ;;  %v3470_v46 = vpack.c.bf16 %v316_v32, %v310_v31  ;;  %v3472_v48 = vpack.c.bf16 %v329_v40, %v323_v39  ;;  %v2026_v27 = vld [vmem:[#allocation5 + $0x1bc0] sm:$0xff]  ;;  %v377_v31 = vld [vmem:[#allocation5 + $0x468] sm:$0xff]  ;;  %v2045_v35 = vld [vmem:[#allocation5 + $0x1c58] sm:$0xff] }
 0x1b9   : > { %v2039_v32 = vld [vmem:[#allocation5 + $0x1c28] sm:$0xff]  ;;  %v370_v40 = vld [vmem:[#allocation5 + $0x430] sm:$0xff] }
 0x1ba   : > { %3455 = vmatpush1.bf16.msra.mxu1 %v3454_v52  ;;  %v3728_v52 = vpack.c.bf16 %v1997_v45, %v1991_v43  ;;  %v376_v43 = vld [vmem:[#allocation5 + $0x460] sm:$0xff] }
 0x1bb   : > { %3711 = vmatpush1.bf16.msra.mxu0 %v3710_v53  ;;  %3457 = vmatprep.subr.bf16.mxu1 %v3456_v55  ;;  %v1996_v53 = vld [vmem:[#allocation5 + $0x1ad0] sm:$0xff]  ;;  %v335_v55 = vld [vmem:[#allocation5 + $0x318] sm:$0xff]  ;;  %v2038_v45 = vld [vmem:[#allocation5 + $0x1c20] sm:$0xff] }
 0x1bc   : > { %3713 = vmatprep.subr.bf16.mxu0 %v3712_v59  ;;  %v3474_v59 = vpack.c.bf16 %v328_v50, %v322_v49  ;;  %v3730_v44 = vpack.c.bf16 %v1996_v53, %v1990_v51  ;;  %v3476_v61 = vpack.c.bf16 %v341_v56, %v335_v55  ;;  %v389_v49 = vld [vmem:[#allocation5 + $0x4c8] sm:$0xff]  ;;  %v2057_v51 = vld [vmem:[#allocation5 + $0x1cb8] sm:$0xff]  ;;  %v382_v56 = vld [vmem:[#allocation5 + $0x490] sm:$0xff] }
 0x1bd   : > { %v2051_v50 = vld [vmem:[#allocation5 + $0x1c88] sm:$0xff] }
 0x1be   : > { %3459 = vmatpush1.bf16.msra.mxu1 %v3458_v1  ;;  %v3732_v1 = vpack.c.bf16 %v2009_v58, %v2003_v57  ;;  %v388_v57 = vld [vmem:[#allocation5 + $0x4c0] sm:$0xff] }
 0x1bf   : > { %3715 = vmatpush1.bf16.msra.mxu0 %v3714_v2  ;;  %3461 = vmatprep.subr.bf16.mxu1 %v3460_v3  ;;  %v2008_v2 = vld [vmem:[#allocation5 + $0x1b30] sm:$0xff]  ;;  %v347_v3 = vld [vmem:[#allocation5 + $0x378] sm:$0xff]  ;;  %v2050_v58 = vld [vmem:[#allocation5 + $0x1c80] sm:$0xff] }
 0x1c0   : > { %3717 = vmatprep.subr.bf16.mxu0 %v3716_v7  ;;  %v3478_v7 = vpack.c.bf16 %v340_v0, %v334_v63  ;;  %v3734_v41 = vpack.c.bf16 %v2008_v2, %v2002_v54  ;;  %v3480_v8 = vpack.c.bf16 %v353_v4, %v347_v3  ;;  %v401_v63 = vld [vmem:[#allocation5 + $0x528] sm:$0xff]  ;;  %v2069_v54 = vld [vmem:[#allocation5 + $0x1d18] sm:$0xff]  ;;  %v394_v4 = vld [vmem:[#allocation5 + $0x4f0] sm:$0xff] }
 0x1c1   : > { %v2063_v0 = vld [vmem:[#allocation5 + $0x1ce8] sm:$0xff] }
 0x1c2   : > { %3463 = vmatpush1.bf16.msra.mxu1 %v3462_v15  ;;  %v3736_v15 = vpack.c.bf16 %v2021_v6, %v2015_v5  ;;  %v400_v5 = vld [vmem:[#allocation5 + $0x520] sm:$0xff] }
 0x1c3   : > { %3719 = vmatpush1.bf16.msra.mxu0 %v3718_v16  ;;  %3465 = vmatprep.subr.bf16.mxu1 %v3464_v17  ;;  %v2020_v16 = vld [vmem:[#allocation5 + $0x1b90] sm:$0xff]  ;;  %v359_v17 = vld [vmem:[#allocation5 + $0x3d8] sm:$0xff]  ;;  %v2062_v6 = vld [vmem:[#allocation5 + $0x1ce0] sm:$0xff] }
 0x1c4   : > { %v4690_v36 = vpop.f32.mrb[0].mxu1  ;;  %3721 = vmatprep.subr.bf16.mxu0 %v3720_v21  ;;  %v3482_v21 = vpack.c.bf16 %v352_v13, %v346_v12  ;;  %v3738_v22 = vpack.c.bf16 %v2020_v16, %v2014_v14  ;;  %v3484_v23 = vpack.c.bf16 %v365_v18, %v359_v17  ;;  %v413_v12 = vld [vmem:[#allocation5 + $0x588] sm:$0xff]  ;;  %v2081_v14 = vld [vmem:[#allocation5 + $0x1d78] sm:$0xff]  ;;  %v406_v18 = vld [vmem:[#allocation5 + $0x550] sm:$0xff] }
 0x1c5   : > { %v4692_v42 = vpop.f32.mrb[1].mxu1  ;;  %v2075_v13 = vld [vmem:[#allocation5 + $0x1d48] sm:$0xff] }
 0x1c6   : > { %3467 = vmatpush1.bf16.msra.mxu1 %v3466_v28  ;;  %v3740_v28 = vpack.c.bf16 %v2033_v20, %v2027_v19  ;;  %v412_v19 = vld [vmem:[#allocation5 + $0x580] sm:$0xff] }
 0x1c7   : > { %3723 = vmatpush1.bf16.msra.mxu0 %v3722_v29  ;;  %3469 = vmatprep.subr.bf16.mxu1 %v3468_v30  ;;  %v2032_v29 = vld [vmem:[#allocation5 + $0x1bf0] sm:$0xff]  ;;  %v371_v30 = vld [vmem:[#allocation5 + $0x438] sm:$0xff]  ;;  %v2074_v20 = vld [vmem:[#allocation5 + $0x1d40] sm:$0xff] }
 0x1c8   : > { %3725 = vmatprep.subr.bf16.mxu0 %v3724_v37  ;;  %v3486_v37 = vpack.c.bf16 %v364_v26, %v358_v24  ;;  %v3742_v38 = vpack.c.bf16 %v2032_v29, %v2026_v27  ;;  %v3488_v39 = vpack.c.bf16 %v377_v31, %v371_v30  ;;  %v425_v24 = vld [vmem:[#allocation5 + $0x5e8] sm:$0xff]  ;;  %v2093_v27 = vld [vmem:[#allocation5 + $0x1dd8] sm:$0xff]  ;;  %v418_v31 = vld [vmem:[#allocation5 + $0x5b0] sm:$0xff] }
 0x1c9   : > { %v2087_v26 = vld [vmem:[#allocation5 + $0x1da8] sm:$0xff] }
 0x1ca   : > { %3471 = vmatpush1.bf16.msra.mxu1 %v3470_v46  ;;  %v3744_v46 = vpack.c.bf16 %v2045_v35, %v2039_v32  ;;  %v424_v32 = vld [vmem:[#allocation5 + $0x5e0] sm:$0xff] }
 0x1cb   : > { %3727 = vmatpush1.bf16.msra.mxu0 %v3726_v25  ;;  %3473 = vmatprep.subr.bf16.mxu1 %v3472_v48  ;;  %v2044_v25 = vld [vmem:[#allocation5 + $0x1c50] sm:$0xff]  ;;  %v383_v48 = vld [vmem:[#allocation5 + $0x498] sm:$0xff]  ;;  %v2086_v35 = vld [vmem:[#allocation5 + $0x1da0] sm:$0xff] }
 0x1cc   : > { %3729 = vmatprep.subr.bf16.mxu0 %v3728_v52  ;;  %v3490_v52 = vpack.c.bf16 %v376_v43, %v370_v40  ;;  %v3746_v53 = vpack.c.bf16 %v2044_v25, %v2038_v45  ;;  %v3492_v55 = vpack.c.bf16 %v389_v49, %v383_v48  ;;  %v437_v40 = vld [vmem:[#allocation5 + $0x648] sm:$0xff]  ;;  %v2291_v43 = vcombine.high %v4676_v10, %v4676_v10 }
 0x1cd   : > { %v2099_v45 = vld [vmem:[#allocation5 + $0x1e08] sm:$0xff]  ;;  %v3506_v25 = vpack.c.bf16 %v424_v32, %v418_v31 }
 0x1ce   : > { %3475 = vmatpush1.bf16.msra.mxu1 %v3474_v59  ;;  %v3748_v59 = vpack.c.bf16 %v2057_v51, %v2051_v50  ;;  %v430_v50 = vld [vmem:[#allocation5 + $0x610] sm:$0xff]  ;;  %v436_v51 = vld [vmem:[#allocation5 + $0x640] sm:$0xff]  ;;  %v2111_v10 = vld [vmem:[#allocation5 + $0x1e68] sm:$0xff] }
 0x1cf   : > { %3731 = vmatpush1.bf16.msra.mxu0 %v3730_v44  ;;  %3477 = vmatprep.subr.bf16.mxu1 %v3476_v61  ;;  %v2056_v44 = vld [vmem:[#allocation5 + $0x1cb0] sm:$0xff]  ;;  %v395_v61 = vld [vmem:[#allocation5 + $0x4f8] sm:$0xff]  ;;  %v485_v31 = vld [vmem:[#allocation5 + $0x7c8] sm:$0xff] }
 0x1d0   : > { %3733 = vmatprep.subr.bf16.mxu0 %v3732_v1  ;;  %v3494_v1 = vpack.c.bf16 %v388_v57, %v382_v56  ;;  %v3750_v2 = vpack.c.bf16 %v2056_v44, %v2050_v58  ;;  %v3496_v3 = vpack.c.bf16 %v401_v63, %v395_v61  ;;  %v443_v56 = vld [vmem:[#allocation5 + $0x678] sm:$0xff]  ;;  %v449_v57 = vld [vmem:[#allocation5 + $0x6a8] sm:$0xff]  ;;  %v4697_v58 = vrot.slane %v2291_v43, %v4620_v11  ;;  %v2146_v43 = vld [vmem:[#allocation5 + $0x1f80] sm:$0xff] }
 0x1d1   : > { %v3510_v44 = vpack.c.bf16 %v436_v51, %v430_v50  ;;  %v3512_v63 = vpack.c.bf16 %v449_v57, %v443_v56  ;;  %v2147_v32 = vld [vmem:[#allocation5 + $0x1f88] sm:$0xff]  ;;  %v2165_v50 = vld [vmem:[#allocation5 + $0x2018] sm:$0xff]  ;;  %v496_v56 = vld [vmem:[#allocation5 + $0x820] sm:$0xff] }
 0x1d2   : > { %3479 = vmatpush1.bf16.msra.mxu1 %v3478_v7  ;;  %v3752_v7 = vpack.c.bf16 %v2069_v54, %v2063_v0  ;;  %v442_v0 = vld [vmem:[#allocation5 + $0x670] sm:$0xff]  ;;  %v448_v54 = vld [vmem:[#allocation5 + $0x6a0] sm:$0xff]  ;;  %v4701_v11 = vcombine.high %v4697_v58, %v4697_v58 }
 0x1d3   : > { %3735 = vmatpush1.bf16.msra.mxu0 %v3734_v41  ;;  %3481 = vmatprep.subr.bf16.mxu1 %v3480_v8  ;;  %v2068_v41 = vld [vmem:[#allocation5 + $0x1d10] sm:$0xff]  ;;  %v407_v8 = vld [vmem:[#allocation5 + $0x558] sm:$0xff]  ;;  %v2158_v57 = vld [vmem:[#allocation5 + $0x1fe0] sm:$0xff] }
 0x1d4   : > { %3737 = vmatprep.subr.bf16.mxu0 %v3736_v15  ;;  %v3498_v15 = vpack.c.bf16 %v400_v5, %v394_v4  ;;  %v3754_v16 = vpack.c.bf16 %v2068_v41, %v2062_v6  ;;  %v3500_v17 = vpack.c.bf16 %v413_v12, %v407_v8  ;;  %v455_v4 = vld [vmem:[#allocation5 + $0x6d8] sm:$0xff]  ;;  %v461_v5 = vld [vmem:[#allocation5 + $0x708] sm:$0xff]  ;;  %v3514_v41 = vpack.c.bf16 %v448_v54, %v442_v0 }
 0x1d5   : > { %v2123_v6 = vld [vmem:[#allocation5 + $0x1ec8] sm:$0xff]  ;;  %v3516_v12 = vpack.c.bf16 %v461_v5, %v455_v4  ;;  %v2177_v0 = vld [vmem:[#allocation5 + $0x2078] sm:$0xff]  ;;  %v508_v4 = vld [vmem:[#allocation5 + $0x880] sm:$0xff] }
 0x1d6   : > { %3483 = vmatpush1.bf16.msra.mxu1 %v3482_v21  ;;  %v3756_v21 = vpack.c.bf16 %v2081_v14, %v2075_v13  ;;  %v454_v13 = vld [vmem:[#allocation5 + $0x6d0] sm:$0xff]  ;;  %v460_v14 = vld [vmem:[#allocation5 + $0x700] sm:$0xff] }
 0x1d7   : > { %3739 = vmatpush1.bf16.msra.mxu0 %v3738_v22  ;;  %3485 = vmatprep.subr.bf16.mxu1 %v3484_v23  ;;  %v2080_v22 = vld [vmem:[#allocation5 + $0x1d70] sm:$0xff]  ;;  %v419_v23 = vld [vmem:[#allocation5 + $0x5b8] sm:$0xff]  ;;  %v2170_v5 = vld [vmem:[#allocation5 + $0x2040] sm:$0xff] }
 0x1d8   : > { %3741 = vmatprep.subr.bf16.mxu0 %v3740_v28  ;;  %v3502_v28 = vpack.c.bf16 %v412_v19, %v406_v18  ;;  %v3758_v29 = vpack.c.bf16 %v2080_v22, %v2074_v20  ;;  %v3504_v30 = vpack.c.bf16 %v425_v24, %v419_v23  ;;  %v467_v18 = vld [vmem:[#allocation5 + $0x738] sm:$0xff]  ;;  %v473_v19 = vld [vmem:[#allocation5 + $0x768] sm:$0xff]  ;;  %v466_v24 = vld [vmem:[#allocation5 + $0x730] sm:$0xff] }
 0x1d9   : > { %v2141_v20 = vld [vmem:[#allocation5 + $0x1f58] sm:$0xff]  ;;  %v3520_v23 = vpack.c.bf16 %v473_v19, %v467_v18  ;;  %v520_v18 = vld [vmem:[#allocation5 + $0x8e0] sm:$0xff] }
 0x1da   : > { %3487 = vmatpush1.bf16.msra.mxu1 %v3486_v37  ;;  %v3760_v37 = vpack.c.bf16 %v2093_v27, %v2087_v26  ;;  %v472_v26 = vld [vmem:[#allocation5 + $0x760] sm:$0xff] }
 0x1db   : > { %3743 = vmatpush1.bf16.msra.mxu0 %v3742_v38  ;;  %3489 = vmatprep.subr.bf16.mxu1 %v3488_v39  ;;  %v2092_v38 = vld [vmem:[#allocation5 + $0x1dd0] sm:$0xff]  ;;  %v431_v39 = vld [vmem:[#allocation5 + $0x618] sm:$0xff]  ;;  %v2134_v27 = vld [vmem:[#allocation5 + $0x1f20] sm:$0xff] }
 0x1dc   : > { %3745 = vmatprep.subr.bf16.mxu0 %v3744_v46  ;;  %v2105_v46 = vld [vmem:[#allocation5 + $0x1e38] sm:$0xff]  ;;  %v3762_v48 = vpack.c.bf16 %v2092_v38, %v2086_v35  ;;  %v3508_v49 = vpack.c.bf16 %v437_v40, %v431_v39  ;;  %v478_v39 = vld [vmem:[#allocation5 + $0x790] sm:$0xff]  ;;  %v484_v40 = vld [vmem:[#allocation5 + $0x7c0] sm:$0xff] }
 0x1dd   : > { %v2153_v35 = vld [vmem:[#allocation5 + $0x1fb8] sm:$0xff]  ;;  %v3526_v51 = vpack.c.bf16 %v484_v40, %v478_v39  ;;  %v2182_v19 = vld [vmem:[#allocation5 + $0x20a0] sm:$0xff] }
 0x1de   : > { %3491 = vmatpush1.bf16.msra.mxu1 %v3490_v52  ;;  %v2098_v52 = vld [vmem:[#allocation5 + $0x1e00] sm:$0xff]  ;;  %v2213_v39 = vld [vmem:[#allocation5 + $0x2198] sm:$0xff] }
 0x1df   : > { %3747 = vmatpush1.bf16.msra.mxu0 %v3746_v53  ;;  %3493 = vmatprep.subr.bf16.mxu1 %v3492_v55  ;;  %v3764_v53 = vpack.c.bf16 %v2105_v46, %v2099_v45  ;;  %v2104_v55 = vld [vmem:[#allocation5 + $0x1e30] sm:$0xff]  ;;  %v3780_v45 = vpack.c.bf16 %v2153_v35, %v2147_v32 }
 0x1e0   : > { %3749 = vmatprep.subr.bf16.mxu0 %v3748_v59  ;;  %v2117_v59 = vld [vmem:[#allocation5 + $0x1e98] sm:$0xff]  ;;  %v3766_v61 = vpack.c.bf16 %v2104_v55, %v2098_v52  ;;  %v2152_v46 = vld [vmem:[#allocation5 + $0x1fb0] sm:$0xff] }
 0x1e1   : > { %v3782_v52 = vpack.c.bf16 %v2152_v46, %v2146_v43  ;;  %v490_v55 = vld [vmem:[#allocation5 + $0x7f0] sm:$0xff] }
 0x1e2   : > { %3495 = vmatpush1.bf16.msra.mxu1 %v3494_v1  ;;  %v2110_v1 = vld [vmem:[#allocation5 + $0x1e60] sm:$0xff]  ;;  %v3530_v54 = vpack.c.bf16 %v496_v56, %v490_v55  ;;  %v2200_v35 = vld [vmem:[#allocation5 + $0x2130] sm:$0xff]  ;;  %v2225_v55 = vld [vmem:[#allocation5 + $0x21f8] sm:$0xff] }
 0x1e3   : > { %3751 = vmatpush1.bf16.msra.mxu0 %v3750_v2  ;;  %3497 = vmatprep.subr.bf16.mxu1 %v3496_v3  ;;  %v3768_v2 = vpack.c.bf16 %v2117_v59, %v2111_v10  ;;  %v2116_v3 = vld [vmem:[#allocation5 + $0x1e90] sm:$0xff] }
 0x1e4   : > { %3753 = vmatprep.subr.bf16.mxu0 %v3752_v7  ;;  %v2129_v7 = vld [vmem:[#allocation5 + $0x1ef8] sm:$0xff]  ;;  %v3770_v8 = vpack.c.bf16 %v2116_v3, %v2110_v1  ;;  %v2164_v59 = vld [vmem:[#allocation5 + $0x2010] sm:$0xff] }
 0x1e5   : > { %v3786_v1 = vpack.c.bf16 %v2164_v59, %v2158_v57  ;;  %v502_v3 = vld [vmem:[#allocation5 + $0x850] sm:$0xff] }
 0x1e6   : > { %3499 = vmatpush1.bf16.msra.mxu1 %v3498_v15  ;;  %v2122_v15 = vld [vmem:[#allocation5 + $0x1ec0] sm:$0xff]  ;;  %v538_v46 = vld [vmem:[#allocation5 + $0x970] sm:$0xff] }
 0x1e7   : > { %3755 = vmatpush1.bf16.msra.mxu0 %v3754_v16  ;;  %3501 = vmatprep.subr.bf16.mxu1 %v3500_v17  ;;  %v3772_v16 = vpack.c.bf16 %v2129_v7, %v2123_v6  ;;  %v2128_v17 = vld [vmem:[#allocation5 + $0x1ef0] sm:$0xff] }
 0x1e8   : > { %3757 = vmatprep.subr.bf16.mxu0 %v3756_v21  ;;  %v3518_v21 = vpack.c.bf16 %v460_v14, %v454_v13  ;;  %v3774_v22 = vpack.c.bf16 %v2128_v17, %v2122_v15  ;;  %v2176_v7 = vld [vmem:[#allocation5 + $0x2070] sm:$0xff]  ;;  %v2189_v13 = vld [vmem:[#allocation5 + $0x20d8] sm:$0xff]  ;;  %v3534_v14 = vpack.c.bf16 %v508_v4, %v502_v3 }
 0x1e9   : > { %v3790_v15 = vpack.c.bf16 %v2176_v7, %v2170_v5  ;;  %v514_v17 = vld [vmem:[#allocation5 + $0x8b0] sm:$0xff]  ;;  %v2237_v3 = vld [vmem:[#allocation5 + $0x2258] sm:$0xff] }
 0x1ea   : > { %3503 = vmatpush1.bf16.msra.mxu1 %v3502_v28  ;;  %v550_v59 = vld [vmem:[#allocation5 + $0x9d0] sm:$0xff] }
 0x1eb   : > { %3759 = vmatpush1.bf16.msra.mxu0 %v3758_v29  ;;  %3505 = vmatprep.subr.bf16.mxu1 %v3504_v30  ;;  %v2140_v29 = vld [vmem:[#allocation5 + $0x1f50] sm:$0xff]  ;;  %v479_v30 = vld [vmem:[#allocation5 + $0x798] sm:$0xff] }
 0x1ec   : > { %3761 = vmatprep.subr.bf16.mxu0 %v3760_v37  ;;  %v3522_v37 = vpack.c.bf16 %v472_v26, %v466_v24  ;;  %v3524_v38 = vpack.c.bf16 %v485_v31, %v479_v30  ;;  %v2201_v24 = vld [vmem:[#allocation5 + $0x2138] sm:$0xff]  ;;  %v3538_v26 = vpack.c.bf16 %v520_v18, %v514_v17  ;;  %v532_v30 = vld [vmem:[#allocation5 + $0x940] sm:$0xff]  ;;  %v562_v7 = vld [vmem:[#allocation5 + $0xa30] sm:$0xff] }
 0x1ed   : > { %v2194_v31 = vld [vmem:[#allocation5 + $0x2100] sm:$0xff]  ;;  %v2249_v17 = vld [vmem:[#allocation5 + $0x22b8] sm:$0xff] }
 0x1ee   : > { %3507 = vmatpush1.bf16.msra.mxu1 %v3506_v25  ;;  %v491_v25 = vld [vmem:[#allocation5 + $0x7f8] sm:$0xff]  ;;  %v3798_v43 = vpack.c.bf16 %v2200_v35, %v2194_v31  ;;  %v586_v35 = vld [vmem:[#allocation5 + $0xaf0] sm:$0xff] }
 0x1ef   : > { %3763 = vmatpush1.bf16.msra.mxu0 %v3762_v48  ;;  %3509 = vmatprep.subr.bf16.mxu1 %v3508_v49  ;;  %v497_v48 = vld [vmem:[#allocation5 + $0x828] sm:$0xff] }
 0x1f0   : > { %3765 = vmatprep.subr.bf16.mxu0 %v3764_v53  ;;  %v2159_v49 = vld [vmem:[#allocation5 + $0x1fe8] sm:$0xff]  ;;  %v3528_v53 = vpack.c.bf16 %v497_v48, %v491_v25  ;;  %v544_v25 = vld [vmem:[#allocation5 + $0x9a0] sm:$0xff] }
 0x1f1   : > { %1684 = vmatmul.mubr.f32.vlgmr.msra.gmra.mrb[2].mxu1 %v4647_v47  ;;  %v2135_v47 = vld [vmem:[#allocation5 + $0x1f28] sm:$0xff]  ;;  %v3784_v10 = vpack.c.bf16 %v2165_v50, %v2159_v49  ;;  %v2206_v48 = vld [vmem:[#allocation5 + $0x2160] sm:$0xff]  ;;  %v2212_v50 = vld [vmem:[#allocation5 + $0x2190] sm:$0xff]  ;;  %v3546_v56 = vpack.c.bf16 %v544_v25, %v538_v46 }
 0x1f2   : > { %3511 = vmatpush1.bf16.msra.mxu1 %v3510_v44  ;;  %2377 = vmatmul.mubr.f32.vlgmr.msra.gmra.mrb[2].mxu0 %v4680_v34  ;;  %v3776_v28 = vpack.c.bf16 %v2141_v20, %v2135_v47  ;;  %v503_v44 = vld [vmem:[#allocation5 + $0x858] sm:$0xff]  ;;  %v2188_v20 = vld [vmem:[#allocation5 + $0x20d0] sm:$0xff]  ;;  %v3802_v57 = vpack.c.bf16 %v2212_v50, %v2206_v48 }
 0x1f3   : > { %3767 = vmatpush1.bf16.msra.mxu0 %v3766_v61  ;;  %3513 = vmatprep.subr.bf16.mxu1 %v3512_v63  ;;  %v509_v61 = vld [vmem:[#allocation5 + $0x888] sm:$0xff]  ;;  %v2273_v46 = vld [vmem:[#allocation5 + $0x2378] sm:$0xff]  ;;  %v598_v50 = vld [vmem:[#allocation5 + $0xb50] sm:$0xff] }
 0x1f4   : > { %3769 = vmatprep.subr.bf16.mxu0 %v3768_v2  ;;  %2447 = vmatprep.mubr.f32.mxu0 %v4701_v11  ;;  %v2171_v63 = vld [vmem:[#allocation5 + $0x2048] sm:$0xff]  ;;  %v3532_v2 = vpack.c.bf16 %v509_v61, %v503_v44  ;;  %v556_v44 = vld [vmem:[#allocation5 + $0xa00] sm:$0xff] }
 0x1f5   : > { %1754 = vmatprep.mubr.f32.mxu1 %v4662_v9  ;;  %v3778_v9 = vpack.c.bf16 %v2140_v29, %v2134_v27  ;;  %v3788_v6 = vpack.c.bf16 %v2177_v0, %v2171_v63  ;;  %v3794_v27 = vpack.c.bf16 %v2188_v20, %v2182_v19  ;;  %v526_v29 = vld [vmem:[#allocation5 + $0x910] sm:$0xff]  ;;  %v2218_v61 = vld [vmem:[#allocation5 + $0x21c0] sm:$0xff]  ;;  %v3550_v4 = vpack.c.bf16 %v556_v44, %v550_v59  ;;  %v2285_v59 = vld [vmem:[#allocation5 + $0x23d8] sm:$0xff] }
 0x1f6   : > { %3515 = vmatpush1.bf16.msra.mxu1 %v3514_v41  ;;  %v515_v41 = vld [vmem:[#allocation5 + $0x8b8] sm:$0xff]  ;;  %v3542_v40 = vpack.c.bf16 %v532_v30, %v526_v29  ;;  %v2224_v0 = vld [vmem:[#allocation5 + $0x21f0] sm:$0xff] }
 0x1f7   : > { %3771 = vmatpush1.bf16.msra.mxu0 %v3770_v8  ;;  %3517 = vmatprep.subr.bf16.mxu1 %v3516_v12  ;;  %v521_v8 = vld [vmem:[#allocation5 + $0x8e8] sm:$0xff]  ;;  %v3806_v5 = vpack.c.bf16 %v2224_v0, %v2218_v61  ;;  %v574_v20 = vld [vmem:[#allocation5 + $0xa90] sm:$0xff]  ;;  %v2261_v29 = vld [vmem:[#allocation5 + $0x2318] sm:$0xff] }
 0x1f8   : > { %3773 = vmatprep.subr.bf16.mxu0 %v3772_v16  ;;  %v2183_v12 = vld [vmem:[#allocation5 + $0x20a8] sm:$0xff]  ;;  %v3536_v16 = vpack.c.bf16 %v521_v8, %v515_v41  ;;  %v568_v41 = vld [vmem:[#allocation5 + $0xa60] sm:$0xff]  ;;  %v610_v0 = vld [vmem:[#allocation5 + $0xbb0] sm:$0xff] }
 0x1f9   : > { %v3792_v47 = vpack.c.bf16 %v2189_v13, %v2183_v12  ;;  %v2230_v8 = vld [vmem:[#allocation5 + $0x2220] sm:$0xff]  ;;  %v2236_v13 = vld [vmem:[#allocation5 + $0x2250] sm:$0xff]  ;;  %v3554_v18 = vpack.c.bf16 %v568_v41, %v562_v7  ;;  %v1917_v7 = vld [vmem:[#allocation5 + $0x1858] sm:$0xff] }
 0x1fa   : > { %3519 = vmatpush1.bf16.msra.mxu1 %v3518_v21  ;;  %v527_v21 = vld [vmem:[#allocation5 + $0x918] sm:$0xff]  ;;  %v3810_v19 = vpack.c.bf16 %v2236_v13, %v2230_v8  ;;  %v1908_v13 = vld [vmem:[#allocation5 + $0x1810] sm:$0xff] }
 0x1fb   : > { %3775 = vmatpush1.bf16.msra.mxu0 %v3774_v22  ;;  %3521 = vmatprep.subr.bf16.mxu1 %v3520_v23  ;;  %v533_v22 = vld [vmem:[#allocation5 + $0x948] sm:$0xff] }
 0x1fc   : > { %3777 = vmatprep.subr.bf16.mxu0 %v3776_v28  ;;  %v2195_v23 = vld [vmem:[#allocation5 + $0x2108] sm:$0xff]  ;;  %v3540_v28 = vpack.c.bf16 %v533_v22, %v527_v21  ;;  %v580_v21 = vld [vmem:[#allocation5 + $0xac0] sm:$0xff] }
 0x1fd   : > { %v3796_v32 = vpack.c.bf16 %v2201_v24, %v2195_v23  ;;  %v2242_v22 = vld [vmem:[#allocation5 + $0x2280] sm:$0xff]  ;;  %v2248_v24 = vld [vmem:[#allocation5 + $0x22b0] sm:$0xff]  ;;  %v3558_v30 = vpack.c.bf16 %v580_v21, %v574_v20  ;;  %v1929_v20 = vld [vmem:[#allocation5 + $0x18b8] sm:$0xff] }
 0x1fe   : > { %3523 = vmatpush1.bf16.msra.mxu1 %v3522_v37  ;;  %v539_v37 = vld [vmem:[#allocation5 + $0x978] sm:$0xff]  ;;  %v3814_v31 = vpack.c.bf16 %v2248_v24, %v2242_v22  ;;  %v1920_v24 = vld [vmem:[#allocation5 + $0x1870] sm:$0xff] }
 0x1ff   : > { %3779 = vmatpush1.bf16.msra.mxu0 %v3778_v9  ;;  %3525 = vmatprep.subr.bf16.mxu1 %v3524_v38  ;;  %v545_v9 = vld [vmem:[#allocation5 + $0x9a8] sm:$0xff] }
 0x200   : > { %3781 = vmatprep.subr.bf16.mxu0 %v3780_v45  ;;  %v2207_v38 = vld [vmem:[#allocation5 + $0x2168] sm:$0xff]  ;;  %v3544_v45 = vpack.c.bf16 %v545_v9, %v539_v37  ;;  %v592_v37 = vld [vmem:[#allocation5 + $0xb20] sm:$0xff] }
 0x201   : > { %v3800_v49 = vpack.c.bf16 %v2213_v39, %v2207_v38  ;;  %v2254_v9 = vld [vmem:[#allocation5 + $0x22e0] sm:$0xff]  ;;  %v2260_v39 = vld [vmem:[#allocation5 + $0x2310] sm:$0xff]  ;;  %v3562_v25 = vpack.c.bf16 %v592_v37, %v586_v35  ;;  %v1941_v35 = vld [vmem:[#allocation5 + $0x1918] sm:$0xff] }
 0x202   : > { %3527 = vmatpush1.bf16.msra.mxu1 %v3526_v51  ;;  %v551_v51 = vld [vmem:[#allocation5 + $0x9d8] sm:$0xff]  ;;  %v3818_v48 = vpack.c.bf16 %v2260_v39, %v2254_v9  ;;  %v1932_v39 = vld [vmem:[#allocation5 + $0x18d0] sm:$0xff] }
 0x203   : > { %3783 = vmatpush1.bf16.msra.mxu0 %v3782_v52  ;;  %3529 = vmatprep.subr.bf16.mxu1 %v3528_v53  ;;  %v557_v52 = vld [vmem:[#allocation5 + $0xa08] sm:$0xff] }
 0x204   : > { %3785 = vmatprep.subr.bf16.mxu0 %v3784_v10  ;;  %v2219_v53 = vld [vmem:[#allocation5 + $0x21c8] sm:$0xff]  ;;  %v3548_v10 = vpack.c.bf16 %v557_v52, %v551_v51  ;;  %v604_v51 = vld [vmem:[#allocation5 + $0xb80] sm:$0xff] }
 0x205   : > { %v3804_v63 = vpack.c.bf16 %v2225_v55, %v2219_v53  ;;  %v2266_v52 = vld [vmem:[#allocation5 + $0x2340] sm:$0xff]  ;;  %v2272_v55 = vld [vmem:[#allocation5 + $0x2370] sm:$0xff]  ;;  %v3566_v44 = vpack.c.bf16 %v604_v51, %v598_v50 }
 0x206   : > { %3531 = vmatpush1.bf16.msra.mxu1 %v3530_v54  ;;  %v563_v54 = vld [vmem:[#allocation5 + $0xa38] sm:$0xff]  ;;  %v3822_v61 = vpack.c.bf16 %v2272_v55, %v2266_v52  ;;  %v1950_v55 = vld [vmem:[#allocation5 + $0x1960] sm:$0xff] }
 0x207   : > { %3787 = vmatpush1.bf16.msra.mxu0 %v3786_v1  ;;  %3533 = vmatprep.subr.bf16.mxu1 %v3532_v2  ;;  %v569_v1 = vld [vmem:[#allocation5 + $0xa68] sm:$0xff] }
 0x208   : > { %3789 = vmatprep.subr.bf16.mxu0 %v3788_v6  ;;  %v2231_v2 = vld [vmem:[#allocation5 + $0x2228] sm:$0xff]  ;;  %v3552_v6 = vpack.c.bf16 %v569_v1, %v563_v54  ;;  %v616_v54 = vld [vmem:[#allocation5 + $0xbe0] sm:$0xff] }
 0x209   : > { %v3808_v12 = vpack.c.bf16 %v2237_v3, %v2231_v2  ;;  %v2278_v1 = vld [vmem:[#allocation5 + $0x23a0] sm:$0xff]  ;;  %v2284_v3 = vld [vmem:[#allocation5 + $0x23d0] sm:$0xff]  ;;  %v3570_v41 = vpack.c.bf16 %v616_v54, %v610_v0 }
 0x20a   : > { %3535 = vmatpush1.bf16.msra.mxu1 %v3534_v14  ;;  %v575_v14 = vld [vmem:[#allocation5 + $0xa98] sm:$0xff]  ;;  %v3826_v8 = vpack.c.bf16 %v2284_v3, %v2278_v1  ;;  %v1956_v1 = vld [vmem:[#allocation5 + $0x1990] sm:$0xff]  ;;  %v1958_v3 = vld [vmem:[#allocation5 + $0x19a0] sm:$0xff] }
 0x20b   : > { %3791 = vmatpush1.bf16.msra.mxu0 %v3790_v15  ;;  %3537 = vmatprep.subr.bf16.mxu1 %v3536_v16  ;;  %v581_v15 = vld [vmem:[#allocation5 + $0xac8] sm:$0xff] }
 0x20c   : > { %3793 = vmatprep.subr.bf16.mxu0 %v3792_v47  ;;  %v2243_v16 = vld [vmem:[#allocation5 + $0x2288] sm:$0xff]  ;;  %v3556_v47 = vpack.c.bf16 %v581_v15, %v575_v14  ;;  %v1914_v14 = vld [vmem:[#allocation5 + $0x1840] sm:$0xff] }
 0x20d   : > { %v3812_v23 = vpack.c.bf16 %v2249_v17, %v2243_v16  ;;  %v1910_v15 = vld [vmem:[#allocation5 + $0x1820] sm:$0xff]  ;;  %v1916_v17 = vld [vmem:[#allocation5 + $0x1850] sm:$0xff]  ;;  %v3830_v21 = vpack.c.bf16 %v1914_v14, %v1908_v13 }
 0x20e   : > { %3539 = vmatpush1.bf16.msra.mxu1 %v3538_v26  ;;  %v587_v26 = vld [vmem:[#allocation5 + $0xaf8] sm:$0xff]  ;;  %v3958_v22 = vpack.c.bf16 %v1916_v17, %v1910_v15  ;;  %v1968_v15 = vld [vmem:[#allocation5 + $0x19f0] sm:$0xff]  ;;  %v1970_v17 = vld [vmem:[#allocation5 + $0x1a00] sm:$0xff] }
 0x20f   : > { %3795 = vmatpush1.bf16.msra.mxu0 %v3794_v27  ;;  %3541 = vmatprep.subr.bf16.mxu1 %v3540_v28  ;;  %v593_v27 = vld [vmem:[#allocation5 + $0xb28] sm:$0xff] }
 0x210   : > { %3797 = vmatprep.subr.bf16.mxu0 %v3796_v32  ;;  %v2255_v28 = vld [vmem:[#allocation5 + $0x22e8] sm:$0xff]  ;;  %v3560_v32 = vpack.c.bf16 %v593_v27, %v587_v26  ;;  %v1926_v26 = vld [vmem:[#allocation5 + $0x18a0] sm:$0xff] }
 0x211   : > { %v3816_v38 = vpack.c.bf16 %v2261_v29, %v2255_v28  ;;  %v1922_v27 = vld [vmem:[#allocation5 + $0x1880] sm:$0xff]  ;;  %v1928_v29 = vld [vmem:[#allocation5 + $0x18b0] sm:$0xff]  ;;  %v3834_v37 = vpack.c.bf16 %v1926_v26, %v1920_v24 }
 0x212   : > { %3543 = vmatpush1.bf16.msra.mxu1 %v3542_v40  ;;  %v599_v40 = vld [vmem:[#allocation5 + $0xb58] sm:$0xff]  ;;  %v3962_v9 = vpack.c.bf16 %v1928_v29, %v1922_v27  ;;  %v1980_v27 = vld [vmem:[#allocation5 + $0x1a50] sm:$0xff]  ;;  %v1982_v29 = vld [vmem:[#allocation5 + $0x1a60] sm:$0xff] }
 0x213   : > { %3799 = vmatpush1.bf16.msra.mxu0 %v3798_v43  ;;  %3545 = vmatprep.subr.bf16.mxu1 %v3544_v45  ;;  %v605_v43 = vld [vmem:[#allocation5 + $0xb88] sm:$0xff] }
 0x214   : > { %3801 = vmatprep.subr.bf16.mxu0 %v3800_v49  ;;  %v2267_v45 = vld [vmem:[#allocation5 + $0x2348] sm:$0xff]  ;;  %v3564_v49 = vpack.c.bf16 %v605_v43, %v599_v40  ;;  %v1938_v40 = vld [vmem:[#allocation5 + $0x1900] sm:$0xff] }
 0x215   : > { %v3820_v53 = vpack.c.bf16 %v2273_v46, %v2267_v45  ;;  %v1934_v43 = vld [vmem:[#allocation5 + $0x18e0] sm:$0xff]  ;;  %v1940_v46 = vld [vmem:[#allocation5 + $0x1910] sm:$0xff]  ;;  %v3838_v50 = vpack.c.bf16 %v1938_v40, %v1932_v39 }
 0x216   : > { %3547 = vmatpush1.bf16.msra.mxu1 %v3546_v56  ;;  %v611_v56 = vld [vmem:[#allocation5 + $0xbb8] sm:$0xff]  ;;  %v3966_v51 = vpack.c.bf16 %v1940_v46, %v1934_v43  ;;  %v1992_v43 = vld [vmem:[#allocation5 + $0x1ab0] sm:$0xff]  ;;  %v1994_v46 = vld [vmem:[#allocation5 + $0x1ac0] sm:$0xff] }
 0x217   : > { %3803 = vmatpush1.bf16.msra.mxu0 %v3802_v57  ;;  %3549 = vmatprep.subr.bf16.mxu1 %v3548_v10  ;;  %v617_v57 = vld [vmem:[#allocation5 + $0xbe8] sm:$0xff] }
 0x218   : > { %3805 = vmatprep.subr.bf16.mxu0 %v3804_v63  ;;  %v2279_v10 = vld [vmem:[#allocation5 + $0x23a8] sm:$0xff]  ;;  %v3568_v63 = vpack.c.bf16 %v617_v57, %v611_v56  ;;  %v1946_v56 = vld [vmem:[#allocation5 + $0x1940] sm:$0xff] }
 0x219   : > { %v3824_v2 = vpack.c.bf16 %v2285_v59, %v2279_v10  ;;  %v1952_v10 = vld [vmem:[#allocation5 + $0x1970] sm:$0xff]  ;;  %v1957_v59 = vld [vmem:[#allocation5 + $0x1998] sm:$0xff] }
 0x21a   : > { %3551 = vmatpush1.bf16.msra.mxu1 %v3550_v4  ;;  %v1909_v4 = vld [vmem:[#allocation5 + $0x1818] sm:$0xff] }
 0x21b   : > { %3807 = vmatpush1.bf16.msra.mxu0 %v3806_v5  ;;  %3553 = vmatprep.subr.bf16.mxu1 %v3552_v6  ;;  %v1915_v5 = vld [vmem:[#allocation5 + $0x1848] sm:$0xff] }
 0x21c   : > { %3809 = vmatprep.subr.bf16.mxu0 %v3808_v12  ;;  %v1911_v6 = vld [vmem:[#allocation5 + $0x1828] sm:$0xff]  ;;  %v3828_v12 = vpack.c.bf16 %v1915_v5, %v1909_v4  ;;  %v1964_v5 = vld [vmem:[#allocation5 + $0x19d0] sm:$0xff] }
 0x21d   : > { %v3956_v16 = vpack.c.bf16 %v1917_v7, %v1911_v6  ;;  %v1969_v6 = vld [vmem:[#allocation5 + $0x19f8] sm:$0xff]  ;;  %v1975_v7 = vld [vmem:[#allocation5 + $0x1a28] sm:$0xff]  ;;  %v3974_v13 = vpack.c.bf16 %v1964_v5, %v1958_v3  ;;  %v2016_v3 = vld [vmem:[#allocation5 + $0x1b70] sm:$0xff] }
 0x21e   : > { %3555 = vmatpush1.bf16.msra.mxu1 %v3554_v18  ;;  %v1921_v18 = vld [vmem:[#allocation5 + $0x1878] sm:$0xff]  ;;  %v3848_v14 = vpack.c.bf16 %v1975_v7, %v1969_v6  ;;  %v2018_v5 = vld [vmem:[#allocation5 + $0x1b80] sm:$0xff]  ;;  %v2024_v7 = vld [vmem:[#allocation5 + $0x1bb0] sm:$0xff] }
 0x21f   : > { %3811 = vmatpush1.bf16.msra.mxu0 %v3810_v19  ;;  %3557 = vmatprep.subr.bf16.mxu1 %v3556_v47  ;;  %v1927_v19 = vld [vmem:[#allocation5 + $0x18a8] sm:$0xff] }
 0x220   : > { %3813 = vmatprep.subr.bf16.mxu0 %v3812_v23  ;;  %v1923_v47 = vld [vmem:[#allocation5 + $0x1888] sm:$0xff]  ;;  %v3832_v23 = vpack.c.bf16 %v1927_v19, %v1921_v18  ;;  %v1976_v19 = vld [vmem:[#allocation5 + $0x1a30] sm:$0xff] }
 0x221   : > { %v3960_v28 = vpack.c.bf16 %v1929_v20, %v1923_v47  ;;  %v1981_v47 = vld [vmem:[#allocation5 + $0x1a58] sm:$0xff]  ;;  %v1987_v20 = vld [vmem:[#allocation5 + $0x1a88] sm:$0xff]  ;;  %v3978_v24 = vpack.c.bf16 %v1976_v19, %v1970_v17  ;;  %v2028_v17 = vld [vmem:[#allocation5 + $0x1bd0] sm:$0xff] }
 0x222   : > { %3559 = vmatpush1.bf16.msra.mxu1 %v3558_v30  ;;  %v1933_v30 = vld [vmem:[#allocation5 + $0x18d8] sm:$0xff]  ;;  %v3852_v26 = vpack.c.bf16 %v1987_v20, %v1981_v47  ;;  %v2030_v19 = vld [vmem:[#allocation5 + $0x1be0] sm:$0xff]  ;;  %v2036_v20 = vld [vmem:[#allocation5 + $0x1c10] sm:$0xff] }
 0x223   : > { %3815 = vmatpush1.bf16.msra.mxu0 %v3814_v31  ;;  %3561 = vmatprep.subr.bf16.mxu1 %v3560_v32  ;;  %v1939_v31 = vld [vmem:[#allocation5 + $0x1908] sm:$0xff] }
 0x224   : > { %3817 = vmatprep.subr.bf16.mxu0 %v3816_v38  ;;  %v1935_v32 = vld [vmem:[#allocation5 + $0x18e8] sm:$0xff]  ;;  %v3836_v38 = vpack.c.bf16 %v1939_v31, %v1933_v30  ;;  %v1988_v31 = vld [vmem:[#allocation5 + $0x1a90] sm:$0xff] }
 0x225   : > { %v3964_v45 = vpack.c.bf16 %v1941_v35, %v1935_v32  ;;  %v1993_v32 = vld [vmem:[#allocation5 + $0x1ab8] sm:$0xff]  ;;  %v1999_v35 = vld [vmem:[#allocation5 + $0x1ae8] sm:$0xff]  ;;  %v3982_v39 = vpack.c.bf16 %v1988_v31, %v1982_v29  ;;  %v2040_v29 = vld [vmem:[#allocation5 + $0x1c30] sm:$0xff] }
 0x226   : > { %3563 = vmatpush1.bf16.msra.mxu1 %v3562_v25  ;;  %v1945_v25 = vld [vmem:[#allocation5 + $0x1938] sm:$0xff]  ;;  %v3856_v40 = vpack.c.bf16 %v1999_v35, %v1993_v32  ;;  %v2042_v31 = vld [vmem:[#allocation5 + $0x1c40] sm:$0xff]  ;;  %v2048_v35 = vld [vmem:[#allocation5 + $0x1c70] sm:$0xff] }
 0x227   : > { %3819 = vmatpush1.bf16.msra.mxu0 %v3818_v48  ;;  %3565 = vmatprep.subr.bf16.mxu1 %v3564_v49  ;;  %v1951_v48 = vld [vmem:[#allocation5 + $0x1968] sm:$0xff]  ;;  %v1953_v49 = vld [vmem:[#allocation5 + $0x1978] sm:$0xff] }
 0x228   : > { %3821 = vmatprep.subr.bf16.mxu0 %v3820_v53  ;;  %v3840_v52 = vpack.c.bf16 %v1951_v48, %v1945_v25  ;;  %v1944_v53 = vld [vmem:[#allocation5 + $0x1930] sm:$0xff] }
 0x229   : > { %v3842_v0 = vpack.c.bf16 %v1950_v55, %v1944_v53  ;;  %v2000_v48 = vld [vmem:[#allocation5 + $0x1af0] sm:$0xff] }
 0x22a   : > { %3567 = vmatpush1.bf16.msra.mxu1 %v3566_v44  ;;  %v1963_v44 = vld [vmem:[#allocation5 + $0x19c8] sm:$0xff]  ;;  %v3986_v53 = vpack.c.bf16 %v2000_v48, %v1994_v46  ;;  %v2052_v46 = vld [vmem:[#allocation5 + $0x1c90] sm:$0xff]  ;;  %v2054_v48 = vld [vmem:[#allocation5 + $0x1ca0] sm:$0xff] }
 0x22b   : > { %3823 = vmatpush1.bf16.msra.mxu0 %v3822_v61  ;;  %3569 = vmatprep.subr.bf16.mxu1 %v3568_v63  ;;  %v1959_v61 = vld [vmem:[#allocation5 + $0x19a8] sm:$0xff]  ;;  %v1965_v63 = vld [vmem:[#allocation5 + $0x19d8] sm:$0xff]  ;;  %v3844_v54 = vpack.c.bf16 %v1963_v44, %v1957_v59  ;;  %v2012_v44 = vld [vmem:[#allocation5 + $0x1b50] sm:$0xff] }
 0x22c   : > { %3825 = vmatprep.subr.bf16.mxu0 %v3824_v2  ;;  %v1962_v2 = vld [vmem:[#allocation5 + $0x19c0] sm:$0xff]  ;;  %v3972_v4 = vpack.c.bf16 %v1965_v63, %v1959_v61  ;;  %v2017_v61 = vld [vmem:[#allocation5 + $0x1b78] sm:$0xff]  ;;  %v2023_v63 = vld [vmem:[#allocation5 + $0x1ba8] sm:$0xff] }
 0x22e   : > { %3571 = vmatpush1.bf16.msra.mxu1 %v3570_v41  ;;  %v1971_v41 = vld [vmem:[#allocation5 + $0x1a08] sm:$0xff] }
 0x22f   : > { %3827 = vmatpush1.bf16.msra.mxu0 %v3826_v8  ;;  %3829 = vmatprep.subr.bf16.mxu1 %v3828_v12  ;;  %v1977_v8 = vld [vmem:[#allocation5 + $0x1a38] sm:$0xff]  ;;  %v3846_v12 = vpack.c.bf16 %v1962_v2, %v1956_v1  ;;  %v3864_v2 = vpack.c.bf16 %v2023_v63, %v2017_v61  ;;  %v2072_v63 = vld [vmem:[#allocation5 + $0x1d30] sm:$0xff] }
 0x230   : > { %3957 = vmatprep.subr.bf16.mxu0 %v3956_v16  ;;  %v1974_v16 = vld [vmem:[#allocation5 + $0x1a20] sm:$0xff]  ;;  %v3976_v18 = vpack.c.bf16 %v1977_v8, %v1971_v41  ;;  %v2029_v41 = vld [vmem:[#allocation5 + $0x1bd8] sm:$0xff]  ;;  %v2035_v8 = vld [vmem:[#allocation5 + $0x1c08] sm:$0xff] }
 0x231   : > { %1755 = vmatmul.mubr.f32.vlgmr.msra.gmra.mrb[2].mxu1 %v4657_v60  ;;  %v1947_v60 = vld [vmem:[#allocation5 + $0x1948] sm:$0xff] }
 0x232   : > { %2448 = vmatmul.mubr.f32.vlgmr.msra.gmra.mrb[2].mxu0 %v4697_v58  ;;  %3831 = vmatpush1.bf16.msra.mxu1 %v3830_v21  ;;  %v3968_v57 = vpack.c.bf16 %v1953_v49, %v1947_v60  ;;  %v1983_v21 = vld [vmem:[#allocation5 + $0x1a68] sm:$0xff]  ;;  %v2005_v60 = vld [vmem:[#allocation5 + $0x1b18] sm:$0xff] }
 0x233   : > { %3959 = vmatpush1.bf16.msra.mxu0 %v3958_v22  ;;  %3833 = vmatprep.subr.bf16.mxu1 %v3832_v23  ;;  %v1989_v22 = vld [vmem:[#allocation5 + $0x1a98] sm:$0xff]  ;;  %v3850_v23 = vpack.c.bf16 %v1974_v16, %v1968_v15  ;;  %v2011_v49 = vld [vmem:[#allocation5 + $0x1b48] sm:$0xff]  ;;  %v3994_v15 = vpack.c.bf16 %v2024_v7, %v2018_v5  ;;  %v3868_v16 = vpack.c.bf16 %v2035_v8, %v2029_v41  ;;  %v2076_v5 = vld [vmem:[#allocation5 + $0x1d50] sm:$0xff] }
 0x234   : > { %3961 = vmatprep.subr.bf16.mxu0 %v3960_v28  ;;  %2518 = vmatprep.mubr.f32.mxu1 %v4685_v33  ;;  %v1986_v28 = vld [vmem:[#allocation5 + $0x1a80] sm:$0xff]  ;;  %v3980_v30 = vpack.c.bf16 %v1989_v22, %v1983_v21  ;;  %v3860_v55 = vpack.c.bf16 %v2011_v49, %v2005_v60  ;;  %v2041_v21 = vld [vmem:[#allocation5 + $0x1c38] sm:$0xff]  ;;  %v2047_v22 = vld [vmem:[#allocation5 + $0x1c68] sm:$0xff] }
 0x235   : > { %2660 = vmatprep.mubr.f32.mxu0 %v4685_v33  ;;  %v3970_v33 = vpack.c.bf16 %v1952_v10, %v1946_v56  ;;  %v2004_v56 = vld [vmem:[#allocation5 + $0x1b10] sm:$0xff]  ;;  %v2006_v10 = vld [vmem:[#allocation5 + $0x1b20] sm:$0xff] }
 0x236   : > { %3835 = vmatpush1.bf16.msra.mxu1 %v3834_v37  ;;  %v1995_v37 = vld [vmem:[#allocation5 + $0x1ac8] sm:$0xff]  ;;  %v3990_v1 = vpack.c.bf16 %v2012_v44, %v2006_v10  ;;  %v2060_v49 = vld [vmem:[#allocation5 + $0x1cd0] sm:$0xff]  ;;  %v2066_v44 = vld [vmem:[#allocation5 + $0x1d00] sm:$0xff] }
 0x237   : > { %3963 = vmatpush1.bf16.msra.mxu0 %v3962_v9  ;;  %3837 = vmatprep.subr.bf16.mxu1 %v3836_v38  ;;  %v2001_v9 = vld [vmem:[#allocation5 + $0x1af8] sm:$0xff]  ;;  %v3854_v38 = vpack.c.bf16 %v1986_v28, %v1980_v27  ;;  %v3998_v27 = vpack.c.bf16 %v2036_v20, %v2030_v19  ;;  %v3872_v28 = vpack.c.bf16 %v2047_v22, %v2041_v21  ;;  %v2064_v10 = vld [vmem:[#allocation5 + $0x1cf0] sm:$0xff]  ;;  %v2078_v7 = vld [vmem:[#allocation5 + $0x1d60] sm:$0xff] }
 0x238   : > { %3965 = vmatprep.subr.bf16.mxu0 %v3964_v45  ;;  %v1998_v45 = vld [vmem:[#allocation5 + $0x1ae0] sm:$0xff]  ;;  %v3984_v25 = vpack.c.bf16 %v2001_v9, %v1995_v37  ;;  %v2053_v37 = vld [vmem:[#allocation5 + $0x1c98] sm:$0xff]  ;;  %v2059_v9 = vld [vmem:[#allocation5 + $0x1cc8] sm:$0xff] }
 0x239   : > { %v2084_v8 = vld [vmem:[#allocation5 + $0x1d90] sm:$0xff]  ;;  %v2090_v20 = vld [vmem:[#allocation5 + $0x1dc0] sm:$0xff] }
 0x23a   : > { %3839 = vmatpush1.bf16.msra.mxu1 %v3838_v50  ;;  %v2007_v50 = vld [vmem:[#allocation5 + $0x1b28] sm:$0xff]  ;;  %v2088_v19 = vld [vmem:[#allocation5 + $0x1db0] sm:$0xff] }
 0x23b   : > { %3967 = vmatpush1.bf16.msra.mxu0 %v3966_v51  ;;  %3841 = vmatprep.subr.bf16.mxu1 %v3840_v52  ;;  %v2013_v51 = vld [vmem:[#allocation5 + $0x1b58] sm:$0xff]  ;;  %v3858_v52 = vpack.c.bf16 %v1998_v45, %v1992_v43  ;;  %v4002_v43 = vpack.c.bf16 %v2048_v35, %v2042_v31  ;;  %v3876_v45 = vpack.c.bf16 %v2059_v9, %v2053_v37  ;;  %v2096_v22 = vld [vmem:[#allocation5 + $0x1df0] sm:$0xff]  ;;  %v2102_v35 = vld [vmem:[#allocation5 + $0x1e20] sm:$0xff] }
 0x23c   : > { %3969 = vmatprep.subr.bf16.mxu0 %v3968_v57  ;;  %v2010_v57 = vld [vmem:[#allocation5 + $0x1b40] sm:$0xff]  ;;  %v3988_v59 = vpack.c.bf16 %v2013_v51, %v2007_v50  ;;  %v2065_v50 = vld [vmem:[#allocation5 + $0x1cf8] sm:$0xff]  ;;  %v2071_v51 = vld [vmem:[#allocation5 + $0x1d28] sm:$0xff] }
 0x23d   : > { %v2100_v31 = vld [vmem:[#allocation5 + $0x1e10] sm:$0xff] }
 0x23e   : > { %3843 = vmatpush1.bf16.msra.mxu1 %v3842_v0  ;;  %v2019_v0 = vld [vmem:[#allocation5 + $0x1b88] sm:$0xff]  ;;  %v2108_v9 = vld [vmem:[#allocation5 + $0x1e50] sm:$0xff] }
 0x23f   : > { %3971 = vmatpush1.bf16.msra.mxu0 %v3970_v33  ;;  %3845 = vmatprep.subr.bf16.mxu1 %v3844_v54  ;;  %v2025_v33 = vld [vmem:[#allocation5 + $0x1bb8] sm:$0xff]  ;;  %v3862_v54 = vpack.c.bf16 %v2010_v57, %v2004_v56  ;;  %v4006_v56 = vpack.c.bf16 %v2060_v49, %v2054_v48  ;;  %v3880_v57 = vpack.c.bf16 %v2071_v51, %v2065_v50  ;;  %v2112_v48 = vld [vmem:[#allocation5 + $0x1e70] sm:$0xff]  ;;  %v2114_v49 = vld [vmem:[#allocation5 + $0x1e80] sm:$0xff] }
 0x240   : > { %3973 = vmatprep.subr.bf16.mxu0 %v3972_v4  ;;  %v2022_v4 = vld [vmem:[#allocation5 + $0x1ba0] sm:$0xff]  ;;  %v3992_v6 = vpack.c.bf16 %v2025_v33, %v2019_v0  ;;  %v2077_v0 = vld [vmem:[#allocation5 + $0x1d58] sm:$0xff]  ;;  %v2083_v33 = vld [vmem:[#allocation5 + $0x1d88] sm:$0xff] }
 0x241   : > { %v2120_v51 = vld [vmem:[#allocation5 + $0x1eb0] sm:$0xff] }
 0x242   : > { %3847 = vmatpush1.bf16.msra.mxu1 %v3846_v12  ;;  %v2031_v12 = vld [vmem:[#allocation5 + $0x1be8] sm:$0xff] }
 0x243   : > { %3975 = vmatpush1.bf16.msra.mxu0 %v3974_v13  ;;  %3849 = vmatprep.subr.bf16.mxu1 %v3848_v14  ;;  %v2037_v13 = vld [vmem:[#allocation5 + $0x1c18] sm:$0xff]  ;;  %v3866_v14 = vpack.c.bf16 %v2022_v4, %v2016_v3  ;;  %v4010_v3 = vpack.c.bf16 %v2072_v63, %v2066_v44  ;;  %v3884_v4 = vpack.c.bf16 %v2083_v33, %v2077_v0  ;;  %v2124_v44 = vld [vmem:[#allocation5 + $0x1ed0] sm:$0xff]  ;;  %v2126_v63 = vld [vmem:[#allocation5 + $0x1ee0] sm:$0xff] }
 0x244   : > { %3977 = vmatprep.subr.bf16.mxu0 %v3976_v18  ;;  %v2034_v18 = vld [vmem:[#allocation5 + $0x1c00] sm:$0xff]  ;;  %v3996_v47 = vpack.c.bf16 %v2037_v13, %v2031_v12  ;;  %v2089_v12 = vld [vmem:[#allocation5 + $0x1db8] sm:$0xff]  ;;  %v2095_v13 = vld [vmem:[#allocation5 + $0x1de8] sm:$0xff] }
 0x245   : > { %v2132_v33 = vld [vmem:[#allocation5 + $0x1f10] sm:$0xff] }
 0x246   : > { %3851 = vmatpush1.bf16.msra.mxu1 %v3850_v23  ;;  %v2043_v23 = vld [vmem:[#allocation5 + $0x1c48] sm:$0xff] }
 0x247   : > { %3979 = vmatpush1.bf16.msra.mxu0 %v3978_v24  ;;  %3853 = vmatprep.subr.bf16.mxu1 %v3852_v26  ;;  %v2049_v24 = vld [vmem:[#allocation5 + $0x1c78] sm:$0xff]  ;;  %v3870_v26 = vpack.c.bf16 %v2034_v18, %v2028_v17  ;;  %v4014_v17 = vpack.c.bf16 %v2084_v8, %v2078_v7  ;;  %v3888_v18 = vpack.c.bf16 %v2095_v13, %v2089_v12  ;;  %v2142_v7 = vld [vmem:[#allocation5 + $0x1f60] sm:$0xff]  ;;  %v2144_v12 = vld [vmem:[#allocation5 + $0x1f70] sm:$0xff] }
 0x248   : > { %3981 = vmatprep.subr.bf16.mxu0 %v3980_v30  ;;  %v2046_v30 = vld [vmem:[#allocation5 + $0x1c60] sm:$0xff]  ;;  %v4000_v32 = vpack.c.bf16 %v2049_v24, %v2043_v23  ;;  %v2101_v23 = vld [vmem:[#allocation5 + $0x1e18] sm:$0xff]  ;;  %v2107_v24 = vld [vmem:[#allocation5 + $0x1e48] sm:$0xff] }
 0x249   : > { %v2149_v13 = vld [vmem:[#allocation5 + $0x1f98] sm:$0xff] }
 0x24a   : > { %3855 = vmatpush1.bf16.msra.mxu1 %v3854_v38  ;;  %v2055_v38 = vld [vmem:[#allocation5 + $0x1ca8] sm:$0xff] }
 0x24b   : > { %3983 = vmatpush1.bf16.msra.mxu0 %v3982_v39  ;;  %3857 = vmatprep.subr.bf16.mxu1 %v3856_v40  ;;  %v2061_v39 = vld [vmem:[#allocation5 + $0x1cd8] sm:$0xff]  ;;  %v3874_v40 = vpack.c.bf16 %v2046_v30, %v2040_v29  ;;  %v4018_v29 = vpack.c.bf16 %v2096_v22, %v2090_v20  ;;  %v3892_v30 = vpack.c.bf16 %v2107_v24, %v2101_v23  ;;  %v2150_v20 = vld [vmem:[#allocation5 + $0x1fa0] sm:$0xff]  ;;  %v2156_v22 = vld [vmem:[#allocation5 + $0x1fd0] sm:$0xff] }
 0x24c   : > { %3985 = vmatprep.subr.bf16.mxu0 %v3984_v25  ;;  %v2058_v25 = vld [vmem:[#allocation5 + $0x1cc0] sm:$0xff]  ;;  %v4004_v60 = vpack.c.bf16 %v2061_v39, %v2055_v38  ;;  %v2113_v38 = vld [vmem:[#allocation5 + $0x1e78] sm:$0xff]  ;;  %v2119_v39 = vld [vmem:[#allocation5 + $0x1ea8] sm:$0xff] }
 0x24d   : > { %v2161_v23 = vld [vmem:[#allocation5 + $0x1ff8] sm:$0xff]  ;;  %v2167_v24 = vld [vmem:[#allocation5 + $0x2028] sm:$0xff] }
 0x24e   : > { %3859 = vmatpush1.bf16.msra.mxu1 %v3858_v52  ;;  %v2067_v52 = vld [vmem:[#allocation5 + $0x1d08] sm:$0xff] }
 0x24f   : > { %3987 = vmatpush1.bf16.msra.mxu0 %v3986_v53  ;;  %3861 = vmatprep.subr.bf16.mxu1 %v3860_v55  ;;  %v2073_v53 = vld [vmem:[#allocation5 + $0x1d38] sm:$0xff]  ;;  %v3878_v55 = vpack.c.bf16 %v2058_v25, %v2052_v46  ;;  %v4022_v46 = vpack.c.bf16 %v2108_v9, %v2102_v35  ;;  %v3896_v25 = vpack.c.bf16 %v2119_v39, %v2113_v38  ;;  %v2162_v35 = vld [vmem:[#allocation5 + $0x2000] sm:$0xff]  ;;  %v2168_v9 = vld [vmem:[#allocation5 + $0x2030] sm:$0xff] }
 0x250   : > { %3989 = vmatprep.subr.bf16.mxu0 %v3988_v59  ;;  %v2070_v59 = vld [vmem:[#allocation5 + $0x1d20] sm:$0xff]  ;;  %v4008_v61 = vpack.c.bf16 %v2073_v53, %v2067_v52  ;;  %v2125_v52 = vld [vmem:[#allocation5 + $0x1ed8] sm:$0xff]  ;;  %v2131_v53 = vld [vmem:[#allocation5 + $0x1f08] sm:$0xff] }
 0x251   : > { %v2173_v38 = vld [vmem:[#allocation5 + $0x2058] sm:$0xff]  ;;  %v2179_v39 = vld [vmem:[#allocation5 + $0x2088] sm:$0xff] }
 0x252   : > { %3863 = vmatpush1.bf16.msra.mxu1 %v3862_v54  ;;  %v2079_v54 = vld [vmem:[#allocation5 + $0x1d68] sm:$0xff] }
 0x253   : > { %3991 = vmatpush1.bf16.msra.mxu0 %v3990_v1  ;;  %3865 = vmatprep.subr.bf16.mxu1 %v3864_v2  ;;  %v2085_v1 = vld [vmem:[#allocation5 + $0x1d98] sm:$0xff]  ;;  %v3882_v2 = vpack.c.bf16 %v2070_v59, %v2064_v10  ;;  %v4026_v10 = vpack.c.bf16 %v2120_v51, %v2114_v49  ;;  %v3900_v59 = vpack.c.bf16 %v2131_v53, %v2125_v52  ;;  %v2174_v49 = vld [vmem:[#allocation5 + $0x2060] sm:$0xff]  ;;  %v2180_v52 = vld [vmem:[#allocation5 + $0x2090] sm:$0xff] }
 0x254   : > { %3993 = vmatprep.subr.bf16.mxu0 %v3992_v6  ;;  %v2082_v6 = vld [vmem:[#allocation5 + $0x1d80] sm:$0xff]  ;;  %v4012_v41 = vpack.c.bf16 %v2085_v1, %v2079_v54  ;;  %v2137_v54 = vld [vmem:[#allocation5 + $0x1f38] sm:$0xff]  ;;  %v2143_v1 = vld [vmem:[#allocation5 + $0x1f68] sm:$0xff] }
 0x255   : > { %v2185_v53 = vld [vmem:[#allocation5 + $0x20b8] sm:$0xff] }
 0x256   : > { %3867 = vmatpush1.bf16.msra.mxu1 %v3866_v14  ;;  %v2091_v14 = vld [vmem:[#allocation5 + $0x1dc8] sm:$0xff] }
 0x257   : > { %3995 = vmatpush1.bf16.msra.mxu0 %v3994_v15  ;;  %3869 = vmatprep.subr.bf16.mxu1 %v3868_v16  ;;  %v2097_v15 = vld [vmem:[#allocation5 + $0x1df8] sm:$0xff]  ;;  %v3886_v16 = vpack.c.bf16 %v2082_v6, %v2076_v5  ;;  %v3904_v5 = vpack.c.bf16 %v2143_v1, %v2137_v54  ;;  %v2136_v6 = vld [vmem:[#allocation5 + $0x1f30] sm:$0xff] }
 0x258   : > { %3997 = vmatprep.subr.bf16.mxu0 %v3996_v47  ;;  %v2094_v47 = vld [vmem:[#allocation5 + $0x1de0] sm:$0xff]  ;;  %v4016_v21 = vpack.c.bf16 %v2097_v15, %v2091_v14  ;;  %v2155_v14 = vld [vmem:[#allocation5 + $0x1fc8] sm:$0xff]  ;;  %v2192_v1 = vld [vmem:[#allocation5 + $0x20f0] sm:$0xff] }
 0x259   : > { %v2151_v15 = vld [vmem:[#allocation5 + $0x1fa8] sm:$0xff] }
 0x25a   : > { %3871 = vmatpush1.bf16.msra.mxu1 %v3870_v26  ;;  %v2103_v26 = vld [vmem:[#allocation5 + $0x1e28] sm:$0xff] }
 0x25b   : > { %3999 = vmatpush1.bf16.msra.mxu0 %v3998_v27  ;;  %3873 = vmatprep.subr.bf16.mxu1 %v3872_v28  ;;  %v2109_v27 = vld [vmem:[#allocation5 + $0x1e58] sm:$0xff]  ;;  %v3890_v28 = vpack.c.bf16 %v2094_v47, %v2088_v19  ;;  %v2148_v19 = vld [vmem:[#allocation5 + $0x1f90] sm:$0xff]  ;;  %v2154_v47 = vld [vmem:[#allocation5 + $0x1fc0] sm:$0xff] }
 0x25c   : > { %4001 = vmatprep.subr.bf16.mxu0 %v4000_v32  ;;  %v2106_v32 = vld [vmem:[#allocation5 + $0x1e40] sm:$0xff]  ;;  %v4020_v37 = vpack.c.bf16 %v2109_v27, %v2103_v26  ;;  %v2163_v26 = vld [vmem:[#allocation5 + $0x2008] sm:$0xff]  ;;  %v2169_v27 = vld [vmem:[#allocation5 + $0x2038] sm:$0xff] }
 0x25e   : > { %3875 = vmatpush1.bf16.msra.mxu1 %v3874_v40  ;;  %v2115_v40 = vld [vmem:[#allocation5 + $0x1e88] sm:$0xff] }
 0x25f   : > { %4003 = vmatpush1.bf16.msra.mxu0 %v4002_v43  ;;  %3877 = vmatprep.subr.bf16.mxu1 %v3876_v45  ;;  %v2121_v43 = vld [vmem:[#allocation5 + $0x1eb8] sm:$0xff]  ;;  %v3894_v45 = vpack.c.bf16 %v2106_v32, %v2100_v31  ;;  %v2160_v31 = vld [vmem:[#allocation5 + $0x1ff0] sm:$0xff]  ;;  %v2166_v32 = vld [vmem:[#allocation5 + $0x2020] sm:$0xff] }
 0x260   : > { %4005 = vmatprep.subr.bf16.mxu0 %v4004_v60  ;;  %v2118_v60 = vld [vmem:[#allocation5 + $0x1ea0] sm:$0xff]  ;;  %v4024_v50 = vpack.c.bf16 %v2121_v43, %v2115_v40  ;;  %v2175_v40 = vld [vmem:[#allocation5 + $0x2068] sm:$0xff]  ;;  %v2181_v43 = vld [vmem:[#allocation5 + $0x2098] sm:$0xff] }
 0x261   : > { %v4044_v51 = vpack.c.bf16 %v2181_v43, %v2175_v40  ;;  %v2233_v40 = vld [vmem:[#allocation5 + $0x2238] sm:$0xff]  ;;  %v2239_v43 = vld [vmem:[#allocation5 + $0x2268] sm:$0xff] }
 0x262   : > { %3879 = vmatpush1.bf16.msra.mxu1 %v3878_v55  ;;  %v2127_v55 = vld [vmem:[#allocation5 + $0x1ee8] sm:$0xff] }
 0x263   : > { %4007 = vmatpush1.bf16.msra.mxu0 %v4006_v56  ;;  %3881 = vmatprep.subr.bf16.mxu1 %v3880_v57  ;;  %v2133_v56 = vld [vmem:[#allocation5 + $0x1f18] sm:$0xff]  ;;  %v3898_v57 = vpack.c.bf16 %v2118_v60, %v2112_v48  ;;  %v2172_v48 = vld [vmem:[#allocation5 + $0x2050] sm:$0xff]  ;;  %v2178_v60 = vld [vmem:[#allocation5 + $0x2080] sm:$0xff] }
 0x264   : > { %4009 = vmatprep.subr.bf16.mxu0 %v4008_v61  ;;  %v2130_v61 = vld [vmem:[#allocation5 + $0x1f00] sm:$0xff]  ;;  %v4028_v0 = vpack.c.bf16 %v2133_v56, %v2127_v55  ;;  %v2191_v55 = vld [vmem:[#allocation5 + $0x20e8] sm:$0xff] }
 0x266   : > { %3883 = vmatpush1.bf16.msra.mxu1 %v3882_v2  ;;  %v2139_v2 = vld [vmem:[#allocation5 + $0x1f48] sm:$0xff] }
 0x267   : > { %4011 = vmatpush1.bf16.msra.mxu0 %v4010_v3  ;;  %3885 = vmatprep.subr.bf16.mxu1 %v3884_v4  ;;  %v2145_v3 = vld [vmem:[#allocation5 + $0x1f78] sm:$0xff]  ;;  %v4030_v4 = vpack.c.bf16 %v2132_v33, %v2126_v63  ;;  %v2184_v63 = vld [vmem:[#allocation5 + $0x20b0] sm:$0xff]  ;;  %v2186_v33 = vld [vmem:[#allocation5 + $0x20c0] sm:$0xff] }
 0x268   : > { %4013 = vmatprep.subr.bf16.mxu0 %v4012_v41  ;;  %v2138_v41 = vld [vmem:[#allocation5 + $0x1f40] sm:$0xff]  ;;  %v4032_v8 = vpack.c.bf16 %v2145_v3, %v2139_v2  ;;  %v2197_v2 = vld [vmem:[#allocation5 + $0x2118] sm:$0xff]  ;;  %v2203_v3 = vld [vmem:[#allocation5 + $0x2148] sm:$0xff] }
 0x26a   : > { %3887 = vmatpush1.bf16.msra.mxu1 %v3886_v16  ;;  %v2157_v16 = vld [vmem:[#allocation5 + $0x1fd8] sm:$0xff] }
 0x26b   : > { %4015 = vmatpush1.bf16.msra.mxu0 %v4014_v17  ;;  %3889 = vmatprep.subr.bf16.mxu1 %v3888_v18  ;;  %v3906_v17 = vpack.c.bf16 %v2142_v7, %v2136_v6  ;;  %v3908_v18 = vpack.c.bf16 %v2155_v14, %v2149_v13  ;;  %v4050_v6 = vpack.c.bf16 %v2192_v1, %v2186_v33  ;;  %v2204_v14 = vld [vmem:[#allocation5 + $0x2150] sm:$0xff]  ;;  %v2246_v1 = vld [vmem:[#allocation5 + $0x22a0] sm:$0xff] }
 0x26c   : > { %4017 = vmatprep.subr.bf16.mxu0 %v4016_v21  ;;  %v4036_v21 = vpack.c.bf16 %v2157_v16, %v2151_v15  ;;  %v3924_v7 = vpack.c.bf16 %v2203_v3, %v2197_v2  ;;  %v2209_v15 = vld [vmem:[#allocation5 + $0x2178] sm:$0xff]  ;;  %v2215_v16 = vld [vmem:[#allocation5 + $0x21a8] sm:$0xff]  ;;  %v2244_v33 = vld [vmem:[#allocation5 + $0x2290] sm:$0xff] }
 0x26d   : > { %v2252_v3 = vld [vmem:[#allocation5 + $0x22d0] sm:$0xff] }
 0x26e   : > { %3891 = vmatpush1.bf16.msra.mxu1 %v3890_v28  ;;  %v3910_v28 = vpack.c.bf16 %v2154_v47, %v2148_v19  ;;  %v3928_v47 = vpack.c.bf16 %v2215_v16, %v2209_v15  ;;  %v2264_v16 = vld [vmem:[#allocation5 + $0x2330] sm:$0xff] }
 0x26f   : > { %4019 = vmatpush1.bf16.msra.mxu0 %v4018_v29  ;;  %3893 = vmatprep.subr.bf16.mxu1 %v3892_v30  ;;  %v4038_v29 = vpack.c.bf16 %v2156_v22, %v2150_v20  ;;  %v3912_v30 = vpack.c.bf16 %v2167_v24, %v2161_v23  ;;  %v2208_v20 = vld [vmem:[#allocation5 + $0x2170] sm:$0xff]  ;;  %v2210_v22 = vld [vmem:[#allocation5 + $0x2180] sm:$0xff] }
 0x270   : > { %4021 = vmatprep.subr.bf16.mxu0 %v4020_v37  ;;  %v4040_v37 = vpack.c.bf16 %v2169_v27, %v2163_v26  ;;  %v2216_v24 = vld [vmem:[#allocation5 + $0x21b0] sm:$0xff]  ;;  %v2221_v26 = vld [vmem:[#allocation5 + $0x21d8] sm:$0xff]  ;;  %v2227_v27 = vld [vmem:[#allocation5 + $0x2208] sm:$0xff] }
 0x271   : > { %2519 = vmatmul.mubr.f32.vlgmr.msra.gmra.mrb[2].mxu1 %v4680_v34 }
 0x272   : > { %3895 = vmatpush1.bf16.msra.mxu1 %v3894_v45  ;;  %2661 = vmatmul.mubr.f32.vlgmr.msra.gmra.mrb[0].mxu0 %v4680_v34  ;;  %v3902_v34 = vpack.c.bf16 %v2130_v61, %v2124_v44  ;;  %v3914_v45 = vpack.c.bf16 %v2166_v32, %v2160_v31  ;;  %v4046_v44 = vpack.c.bf16 %v2180_v52, %v2174_v49  ;;  %v2232_v49 = vld [vmem:[#allocation5 + $0x2230] sm:$0xff]  ;;  %v2234_v52 = vld [vmem:[#allocation5 + $0x2240] sm:$0xff] }
 0x273   : > { %4023 = vmatpush1.bf16.msra.mxu0 %v4022_v46  ;;  %3897 = vmatprep.subr.bf16.mxu1 %v3896_v25  ;;  %v4042_v46 = vpack.c.bf16 %v2168_v9, %v2162_v35  ;;  %v3916_v25 = vpack.c.bf16 %v2179_v39, %v2173_v38  ;;  %v3920_v61 = vpack.c.bf16 %v2191_v55, %v2185_v53  ;;  %v2220_v35 = vld [vmem:[#allocation5 + $0x21d0] sm:$0xff]  ;;  %v2222_v9 = vld [vmem:[#allocation5 + $0x21e0] sm:$0xff] }
 0x274   : > { %4025 = vmatprep.subr.bf16.mxu0 %v4024_v50  ;;  %2589 = vmatprep.mubr.f32.mxu1 %v4701_v11  ;;  %v4058_v31 = vpack.c.bf16 %v2216_v24, %v2210_v22  ;;  %v3932_v32 = vpack.c.bf16 %v2227_v27, %v2221_v26  ;;  %v2228_v39 = vld [vmem:[#allocation5 + $0x2210] sm:$0xff]  ;;  %v2270_v24 = vld [vmem:[#allocation5 + $0x2360] sm:$0xff] }
 0x275   : > { %2731 = vmatprep.mubr.f32.mxu0 %v4701_v11  ;;  %v4034_v11 = vpack.c.bf16 %v2144_v12, %v2138_v41  ;;  %v2196_v41 = vld [vmem:[#allocation5 + $0x2110] sm:$0xff]  ;;  %v2198_v12 = vld [vmem:[#allocation5 + $0x2120] sm:$0xff] }
 0x276   : > { %3899 = vmatpush1.bf16.msra.mxu1 %v3898_v57  ;;  %v2187_v57 = vld [vmem:[#allocation5 + $0x20c8] sm:$0xff]  ;;  %v4054_v19 = vpack.c.bf16 %v2204_v14, %v2198_v12  ;;  %v2240_v55 = vld [vmem:[#allocation5 + $0x2270] sm:$0xff]  ;;  %v2258_v14 = vld [vmem:[#allocation5 + $0x2300] sm:$0xff] }
 0x277   : > { %4027 = vmatpush1.bf16.msra.mxu0 %v4026_v10  ;;  %3901 = vmatprep.subr.bf16.mxu1 %v3900_v59  ;;  %v2193_v10 = vld [vmem:[#allocation5 + $0x20f8] sm:$0xff]  ;;  %v3918_v59 = vpack.c.bf16 %v2178_v60, %v2172_v48  ;;  %v4062_v48 = vpack.c.bf16 %v2228_v39, %v2222_v9  ;;  %v3936_v60 = vpack.c.bf16 %v2239_v43, %v2233_v40  ;;  %v2256_v12 = vld [vmem:[#allocation5 + $0x22f0] sm:$0xff]  ;;  %v2282_v40 = vld [vmem:[#allocation5 + $0x23c0] sm:$0xff] }
 0x278   : > { %4029 = vmatprep.subr.bf16.mxu0 %v4028_v0  ;;  %v2190_v0 = vld [vmem:[#allocation5 + $0x20e0] sm:$0xff]  ;;  %v4048_v54 = vpack.c.bf16 %v2193_v10, %v2187_v57  ;;  %v2245_v57 = vld [vmem:[#allocation5 + $0x2298] sm:$0xff]  ;;  %v2251_v10 = vld [vmem:[#allocation5 + $0x22c8] sm:$0xff] }
 0x279   : > { %v2268_v22 = vld [vmem:[#allocation5 + $0x2350] sm:$0xff] }
 0x27a   : > { %3903 = vmatpush1.bf16.msra.mxu1 %v3902_v34  ;;  %v2199_v34 = vld [vmem:[#allocation5 + $0x2128] sm:$0xff]  ;;  %v2276_v27 = vld [vmem:[#allocation5 + $0x2390] sm:$0xff] }
 0x27b   : > { %4031 = vmatpush1.bf16.msra.mxu0 %v4030_v4  ;;  %3905 = vmatprep.subr.bf16.mxu1 %v3904_v5  ;;  %v2205_v4 = vld [vmem:[#allocation5 + $0x2158] sm:$0xff]  ;;  %v3922_v5 = vpack.c.bf16 %v2190_v0, %v2184_v63  ;;  %v4066_v63 = vpack.c.bf16 %v2240_v55, %v2234_v52  ;;  %v3940_v0 = vpack.c.bf16 %v2251_v10, %v2245_v57  ;;  %v2280_v9 = vld [vmem:[#allocation5 + $0x23b0] sm:$0xff] }
 0x27c   : > { %4033 = vmatprep.subr.bf16.mxu0 %v4032_v8  ;;  %v2202_v8 = vld [vmem:[#allocation5 + $0x2140] sm:$0xff]  ;;  %v4052_v13 = vpack.c.bf16 %v2205_v4, %v2199_v34  ;;  %v2257_v34 = vld [vmem:[#allocation5 + $0x22f8] sm:$0xff]  ;;  %v2263_v4 = vld [vmem:[#allocation5 + $0x2328] sm:$0xff] }
 0x27d   : > { %v2288_v43 = vld [vmem:[#allocation5 + $0x23f0] sm:$0xff] }
 0x27e   : > { %3907 = vmatpush1.bf16.msra.mxu1 %v3906_v17  ;;  %v2211_v17 = vld [vmem:[#allocation5 + $0x2188] sm:$0xff] }
 0x27f   : > { %4035 = vmatpush1.bf16.msra.mxu0 %v4034_v11  ;;  %3909 = vmatprep.subr.bf16.mxu1 %v3908_v18  ;;  %v2217_v11 = vld [vmem:[#allocation5 + $0x21b8] sm:$0xff]  ;;  %v3926_v18 = vpack.c.bf16 %v2202_v8, %v2196_v41  ;;  %v4070_v41 = vpack.c.bf16 %v2252_v3, %v2246_v1  ;;  %v3944_v8 = vpack.c.bf16 %v2263_v4, %v2257_v34 }
 0x280   : > { %4037 = vmatprep.subr.bf16.mxu0 %v4036_v21  ;;  %v2214_v21 = vld [vmem:[#allocation5 + $0x21a0] sm:$0xff]  ;;  %v4056_v23 = vpack.c.bf16 %v2217_v11, %v2211_v17  ;;  %v2269_v17 = vld [vmem:[#allocation5 + $0x2358] sm:$0xff]  ;;  %v2275_v11 = vld [vmem:[#allocation5 + $0x2388] sm:$0xff] }
 0x282   : > { %3911 = vmatpush1.bf16.msra.mxu1 %v3910_v28  ;;  %v2223_v28 = vld [vmem:[#allocation5 + $0x21e8] sm:$0xff] }
 0x283   : > { %4039 = vmatpush1.bf16.msra.mxu0 %v4038_v29  ;;  %3913 = vmatprep.subr.bf16.mxu1 %v3912_v30  ;;  %v2229_v29 = vld [vmem:[#allocation5 + $0x2218] sm:$0xff]  ;;  %v3930_v30 = vpack.c.bf16 %v2214_v21, %v2208_v20  ;;  %v4074_v20 = vpack.c.bf16 %v2264_v16, %v2258_v14  ;;  %v3948_v21 = vpack.c.bf16 %v2275_v11, %v2269_v17 }
 0x284   : > { %4041 = vmatprep.subr.bf16.mxu0 %v4040_v37  ;;  %v4715_v50 = vpop.f32.mrb[4].mxu1  ;;  %v2226_v37 = vld [vmem:[#allocation5 + $0x2200] sm:$0xff]  ;;  %v4060_v38 = vpack.c.bf16 %v2229_v29, %v2223_v28  ;;  %v2281_v28 = vld [vmem:[#allocation5 + $0x23b8] sm:$0xff]  ;;  %v2287_v29 = vld [vmem:[#allocation5 + $0x23e8] sm:$0xff] }
 0x285   : > { %v4717_v56 = vpop.f32.mrb[5].mxu1 }
 0x286   : > { %3915 = vmatpush1.bf16.msra.mxu1 %v3914_v45  ;;  %v2235_v45 = vld [vmem:[#allocation5 + $0x2248] sm:$0xff] }
 0x287   : > { %4043 = vmatpush1.bf16.msra.mxu0 %v4042_v46  ;;  %3917 = vmatprep.subr.bf16.mxu1 %v3916_v25  ;;  %v2241_v46 = vld [vmem:[#allocation5 + $0x2278] sm:$0xff]  ;;  %v3934_v25 = vpack.c.bf16 %v2226_v37, %v2220_v35  ;;  %v4078_v35 = vpack.c.bf16 %v2276_v27, %v2270_v24  ;;  %v3952_v37 = vpack.c.bf16 %v2287_v29, %v2281_v28 }
 0x288   : > { %4045 = vmatprep.subr.bf16.mxu0 %v4044_v51  ;;  %v2238_v51 = vld [vmem:[#allocation5 + $0x2260] sm:$0xff]  ;;  %v4064_v53 = vpack.c.bf16 %v2241_v46, %v2235_v45  ;;  %v4082_v46 = vpack.c.bf16 %v2288_v43, %v2282_v40 }
 0x28a   : > { %3919 = vmatpush1.bf16.msra.mxu1 %v3918_v59  ;;  %v2247_v59 = vld [vmem:[#allocation5 + $0x22a8] sm:$0xff] }
 0x28b   : > { %4047 = vmatpush1.bf16.msra.mxu0 %v4046_v44  ;;  %3921 = vmatprep.subr.bf16.mxu1 %v3920_v61  ;;  %v2253_v44 = vld [vmem:[#allocation5 + $0x22d8] sm:$0xff]  ;;  %v3938_v61 = vpack.c.bf16 %v2238_v51, %v2232_v49 }
 0x28c   : > { %4049 = vmatprep.subr.bf16.mxu0 %v4048_v54  ;;  %v2250_v54 = vld [vmem:[#allocation5 + $0x22c0] sm:$0xff]  ;;  %v4068_v2 = vpack.c.bf16 %v2253_v44, %v2247_v59  ;;  %v2759_v44 = vsub.s32 3, %v4617_v62 }
 0x28e   : > { %3923 = vmatpush1.bf16.msra.mxu1 %v3922_v5  ;;  %v2259_v5 = vld [vmem:[#allocation5 + $0x2308] sm:$0xff] }
 0x28f   : > { %4051 = vmatpush1.bf16.msra.mxu0 %v4050_v6  ;;  %3925 = vmatprep.subr.bf16.mxu1 %v3924_v7  ;;  %v2265_v6 = vld [vmem:[#allocation5 + $0x2338] sm:$0xff]  ;;  %v3942_v7 = vpack.c.bf16 %v2250_v54, %v2244_v33 }
 0x290   : > { %4053 = vmatprep.subr.bf16.mxu0 %v4052_v13  ;;  %v2262_v13 = vld [vmem:[#allocation5 + $0x2320] sm:$0xff]  ;;  %v4072_v15 = vpack.c.bf16 %v2265_v6, %v2259_v5 }
 0x292   : > { %3927 = vmatpush1.bf16.msra.mxu1 %v3926_v18  ;;  %v2271_v18 = vld [vmem:[#allocation5 + $0x2368] sm:$0xff] }
 0x293   : > { %4055 = vmatpush1.bf16.msra.mxu0 %v4054_v19  ;;  %3929 = vmatprep.subr.bf16.mxu1 %v3928_v47  ;;  %v2277_v19 = vld [vmem:[#allocation5 + $0x2398] sm:$0xff]  ;;  %v3946_v47 = vpack.c.bf16 %v2262_v13, %v2256_v12 }
 0x294   : > { %4057 = vmatprep.subr.bf16.mxu0 %v4056_v23  ;;  %v2274_v23 = vld [vmem:[#allocation5 + $0x2380] sm:$0xff]  ;;  %v4076_v26 = vpack.c.bf16 %v2277_v19, %v2271_v18 }
 0x296   : > { %3931 = vmatpush1.bf16.msra.mxu1 %v3930_v30  ;;  %v2283_v30 = vld [vmem:[#allocation5 + $0x23c8] sm:$0xff] }
 0x297   : > { %4059 = vmatpush1.bf16.msra.mxu0 %v4058_v31  ;;  %3933 = vmatprep.subr.bf16.mxu1 %v3932_v32  ;;  %v2289_v31 = vld [vmem:[#allocation5 + $0x23f8] sm:$0xff]  ;;  %v3950_v32 = vpack.c.bf16 %v2274_v23, %v2268_v22 }
 0x298   : > { %4061 = vmatprep.subr.bf16.mxu0 %v4060_v38  ;;  %v2286_v38 = vld [vmem:[#allocation5 + $0x23e0] sm:$0xff]  ;;  %v4080_v39 = vpack.c.bf16 %v2289_v31, %v2283_v30 }
 0x299   : > { %v3954_v45 = vpack.c.bf16 %v2286_v38, %v2280_v9 }
 0x29a   : > { %3935 = vmatpush1.bf16.msra.mxu1 %v3934_v25  ;;  %v2747_v25 = vsub.s32 0, %v4617_v62 }
 0x29b   : > { %4063 = vmatpush1.bf16.msra.mxu0 %v4062_v48  ;;  %3937 = vmatprep.subr.bf16.mxu1 %v3936_v60  ;;  %v234_v48 = vld [vmem:[#allocation7] sm:$0x3f]  ;;  %v2751_v60 = vsub.s32 1, %v4617_v62 }
 0x29c   : > { %4065 = vmatprep.subr.bf16.mxu0 %v4064_v53  ;;  %v2748_v49 = vrot.slane %v234_v48, %v2747_v25  ;;  %v2760_v33 = vrot.slane %v234_v48, %v2759_v44 }
 0x29d   : > { %v2752_v52 = vrot.slane %v234_v48, %v2751_v60 }
 0x29e   : > { %3939 = vmatpush1.bf16.msra.mxu1 %v3938_v61  ;;  %v2763_v61 = vsub.s32 4, %v4617_v62 }
 0x29f   : > { %4067 = vmatpush1.bf16.msra.mxu0 %v4066_v63  ;;  %3941 = vmatprep.subr.bf16.mxu1 %v3940_v0  ;;  %v2767_v0 = vsub.s32 5, %v4617_v62 }
 0x2a0   : > { %4069 = vmatprep.subr.bf16.mxu0 %v4068_v2  ;;  %v2764_v54 = vrot.slane %v234_v48, %v2763_v61 }
 0x2a1   : > { %v2768_v3 = vrot.slane %v234_v48, %v2767_v0 }
 0x2a2   : > { %3943 = vmatpush1.bf16.msra.mxu1 %v3942_v7 }
 0x2a3   : > { %4071 = vmatpush1.bf16.msra.mxu0 %v4070_v41  ;;  %3945 = vmatprep.subr.bf16.mxu1 %v3944_v8 }
 0x2a4   : > { %4073 = vmatprep.subr.bf16.mxu0 %v4072_v15 }
 0x2a6   : > { %3947 = vmatpush1.bf16.msra.mxu1 %v3946_v47 }
 0x2a7   : > { %4075 = vmatpush1.bf16.msra.mxu0 %v4074_v20  ;;  %3949 = vmatprep.subr.bf16.mxu1 %v3948_v21 }
 0x2a8   : > { %4077 = vmatprep.subr.bf16.mxu0 %v4076_v26 }
 0x2aa   : > { %3951 = vmatpush1.bf16.msra.mxu1 %v3950_v32 }
 0x2ab   : > { %4079 = vmatpush1.bf16.msra.mxu0 %v4078_v35  ;;  %3953 = vmatprep.subr.bf16.mxu1 %v3952_v37 }
 0x2ac   : > { %4081 = vmatprep.subr.bf16.mxu0 %v4080_v39 }
 0x2ae   : > { %3955 = vmatpush1.bf16.msra.mxu1 %v3954_v45 }
 0x2af   : > { %4083 = vmatpush1.bf16.msra.mxu0 %v4082_v46 }
 0x2b1   : > { %2590 = vmatmul.mubr.f32.vlgmr.msra.gmra.mrb[2].mxu1 %v4697_v58 }
 0x2b2   : > { %2732 = vmatmul.mubr.f32.vlgmr.msra.gmra.mrb[0].mxu0 %v4697_v58  ;;  %v2755_v58 = vsub.s32 2, %v4617_v62 }
 0x2b4   : > { %v2756_v63 = vrot.slane %v234_v48, %v2755_v58 }
 0x305   : > { %v2449_v51 = vpop.f32.mrb[2].mxu0 }
 0x306   : > { %v4084_v53 = vadd.f32 %v2449_v51, %v4690_v36  ;;  %v2451_v55 = vpop.f32.mrb[3].mxu0 }
 0x307   : > { %v4085_v57 = vadd.f32 %v2451_v55, %v4692_v42 }
 0x308   : > { %v2775_v10 = vadd.f32 %v4084_v53, %v2748_v49 }
 0x309   : > { %v2776_v59 = vadd.f32 %v4085_v57, %v2752_v52 }
 0x30a   : > { %2781 = vst [vmem:[%s233_s22] sm:$0x3] %v2775_v10 }
 0x30b   : > { %2924 = vst [vmem:[%s233_s22 + $0x2] sm:$0x3] %v2776_v59 }
 0x384   : > { %v2591_v36 = vpop.f32.mrb[2].mxu1 }
 0x385   : > { %v2777_v42 = vadd.f32 %v2756_v63, %v2591_v36  ;;  %v2733_v1 = vpop.f32.mrb[0].mxu0  ;;  %v2593_v2 = vpop.f32.mrb[3].mxu1 }
 0x386   : > { %v4086_v34 = vadd.f32 %v2733_v1, %v4715_v50  ;;  %v2778_v4 = vadd.f32 %v2760_v33, %v2593_v2  ;;  %v2735_v5 = vpop.f32.mrb[1].mxu0 }
 0x387   : > { %2925 = vst [vmem:[%s233_s22 + $0x4] sm:$0x3] %v2777_v42  ;;  %v4087_v62 = vadd.f32 %v2735_v5, %v4717_v56 }
 0x388   : > { %v2779_v6 = vadd.f32 %v4086_v34, %v2764_v54  ;;  %2926 = vst [vmem:[%s233_s22 + $0x6] sm:$0x3] %v2778_v4 }
 0x389   : > { %v2780_v7 = vadd.f32 %v4087_v62, %v2768_v3 }
 0x38a   : > { %2927 = vst [vmem:[%s233_s22 + $0x8] sm:$0x3] %v2779_v6 }
 0x38b   : > { %2928 = vst [vmem:[%s233_s22 + $0xa] sm:$0x3] %v2780_v7 }
 0x38c   : > { %4311 = shalt.err (!%p4308_p2)
}
 0x38d   : > { %s4312_s9 = scalar_lea.hbm %s4738_s8, 192  ;;  %s4316_s29 = scalar_lea.hbm %s4790_s3, 384 }
 0x38e   : > { %p4313_p0 = scmp.ne.s32.totalorder %s4738_s8, %s4312_s9  ;;  %p4317_p6 = scmp.lt.u32.totalorder %s4738_s8, %s4790_s3 }
 0x38f   : > { %p4318_p7 = scmp.lt.u32.totalorder %s4316_s29, %s4312_s9  ;;  %p4320_p8 = scmp.lt.u32.totalorder %s4312_s9, %s4738_s8 }
 0x390   : > { %p4314_p4 = pnand %p4313_p0, %p4805_p12 }
 0x391   : > { %p4319_p11 = por %p4318_p7, %p4317_p6 }
 0x392   : > { %p4315_p13 = pneg %p4314_p4 }
 0x393   : > { %p4321_p1 = por %p4320_p8, %p4319_p11 }
 0x395   : > { %p4322_p10 = pnand %p4321_p1, %p4315_p13 }
 0x397   : > { %4325 = shalt.err (!%p4322_p10)
}
 0x398   : > { %s4395_s22 = smov 32   ;;  %s4396_s28 = smov 2  }
 0x399   : > { %4129 = dma.vmem_to_hbm [thread:$0]  (%p4805_p12), %s4732_s24, 192, %s4738_s8, %s2793_s26, %s4395_s22, %s4395_s22, %s4396_s28  }
 0x39a PF: > { %s2822_s15 = sand.u32 1, %s4364_s12   ;;  %p4806_p3 = scmp.ne.s32.totalorder %s4798_s23, 0 }
 0x39b   : > { %p4807_p5 = scmp.ge.s32.totalorder %s4384_s17, 2  ;;  %s2823_s6 = scalar_lea.sflag [#allocation4], %s2822_s15 }
 0x39d   : > { %p4143_p9 = pnand %p4807_p5, %p4806_p3 }
 0x39f   : > { %4359 = dma.done.wait (!%p4143_p9), %s2823_s6, 192  }
 0x3a0   : > { %4361 = vsyncadd (!%p4143_p9), %s2823_s6, 4294967104  ;;  %s20_s17 = sadd.s32 1, %s4384_s17   ;;  %s4808_s12 = smov %s4368_s13 }
 0x3a1   : > { %p17_p2 = scmp.ge.s32.totalorder %s20_s17, 4   ;;  %s4809_s13 = smov %s4372_s14 }
 0x3a2   : > { %s4810_s14 = smov %s4562_s30  ;;  %s4811_s15 = smov %s4380_s16 }
 0x3a3   : > { %s4812_s16 = smov %s4814_s11  ;;  %19 = sbr.rel (!%p17_p2) target bundleno = 7 (0x7), region = 94 }
 0x3aa   :  { %2828 = vsyncpa [#allocation3], 1 }
 0x3ab   :  { %2830 = vsyncpa [#allocation3 + $0x1], 1 }
 0x3ac   :  { %2831 = vsyncpa [#allocation6], 1 }
 0x3ad   :  { %2832 = vsyncpa [#allocation4], 1 }
 0x3ae   :  { %2834 = vsyncpa [#allocation4 + $0x1], 1 }

</bundles_post_ra>
